<compile_context>
chip_gen: v7x
topology: tpu7x:2x2x1
jax: 0.10.0
libtpu: 0.0.40
codegen_flags: <defaults>
</compile_context>

<pallas_src>
import functools

import numpy as np
import jax
import jax.numpy as jnp
from jax.experimental import pallas as pl
from jax.experimental.pallas import tpu as pltpu


# -----------------------------------------------------------------------------
# Tap bookkeeping for 3x3x3 convs (cross-correlation, zero padding = dilation,
# so the spatial size is preserved, exactly like the PyTorch module).
# Tap order is t = kd*9 + kh*3 + kw.  A torch weight (Cout,Cin,3,3,3) maps to
# the tap-major layout used here via w.transpose(2,3,4,0,1).reshape(27,Cout,Cin).
# -----------------------------------------------------------------------------
def _tap_offsets(H, W, dilation):
    """(od, oh, ow, flattened_offset) for the 27 taps."""
    taps = []
    for kd in range(3):
        for kh in range(3):
            for kw in range(3):
                od = (kd - 1) * dilation
                oh = (kh - 1) * dilation
                ow = (kw - 1) * dilation
                taps.append((od, oh, ow, od * H * W + oh * W + ow))
    return taps


def _tap_masks(D, H, W, dilation):
    """(27, 1, S) f32 constants; mask[t,0,s]=1 iff tap t of output voxel s
    reads an in-bounds input voxel (emulates Conv3d zero padding)."""
    d = np.arange(D)[:, None, None]
    h = np.arange(H)[None, :, None]
    w = np.arange(W)[None, None, :]
    masks = []
    for od, oh, ow, _ in _tap_offsets(H, W, dilation):
        m = ((d + od >= 0) & (d + od < D) &
             (h + oh >= 0) & (h + oh < H) &
             (w + ow >= 0) & (w + ow < W))
        masks.append(m.reshape(1, D * H * W))
    return jnp.asarray(np.stack(masks, axis=0), dtype=jnp.float32)


# -----------------------------------------------------------------------------
# In-kernel helpers
# -----------------------------------------------------------------------------
def _conv3d_im2col(x, w2d_ref, b_ref, m_ref, patch_ref, *, H, W, dilation):
    """3x3x3 cross-correlation (padding=dilation) on a flattened (C, S) tile.

    Builds an im2col patch matrix (27*C, S) in VMEM via 27 masked lane rolls
    (XLU + VPU filler), then a single (Cout, 27*C) @ (27*C, S) MXU dot.
    w2d_ref: (Cout, 27*C) weights with K ordered tap-major (t*C + c);
    b_ref: (Cout, 1); m_ref: (27, 1, S) boundary masks. Returns (Cout, S) f32.
    """
    C, S = x.shape
    for t, (od, oh, ow, off) in enumerate(_tap_offsets(H, W, dilation)):
        # xs[:, s] == x[:, (s + off) mod S]; wrapped entries are zeroed by the
        # mask, so this matches zero-padded Conv3d semantics exactly.
        xs = x if off == 0 else pltpu.roll(x, shift=(-off) % S, axis=1)
        if not (od == 0 and oh == 0 and ow == 0):   # center tap: mask == 1
            xs = xs * m_ref[t]                      # (C,S) * (1,S)
        patch_ref[t * C:(t + 1) * C, :] = xs        # sublane-aligned store
    return (jnp.dot(w2d_ref[...], patch_ref[...],
                    preferred_element_type=jnp.float32) + b_ref[...])


def _recomb_kernel(x_ref, m1_ref, m2_ref,
                   exp_w, exp_b, norm_w, norm_b,
                   dila_w, dila_b, se1_w, se1_b,
                   zoom_w, zoom_b, skip_w, skip_b,
                   o_ref, patch_ref, *, H, W):
    x_in = x_ref[...]                                            # (Cin, S)

    # expansion_conv (1x1x1): (Cexp, Cin) @ (Cin, S) + b
    x = jnp.dot(exp_w[...], x_in,
                preferred_element_type=jnp.float32) + exp_b[...]

    # InstanceNorm3d (affine=False, eps=1e-5, biased variance) + ReLU6.
    mean = jnp.mean(x, axis=1, keepdims=True)
    var = jnp.mean(jnp.square(x - mean), axis=1, keepdims=True)
    x = (x - mean) * jax.lax.rsqrt(var + 1e-5)
    x = jnp.clip(x, 0.0, 6.0)

    # norm_conv: Conv3d(Cexp, Cexp, 3, padding=1)  -- single im2col MXU dot.
    x = _conv3d_im2col(x, norm_w, norm_b, m1_ref, patch_ref,
                       H=H, W=W, dilation=1)

    # SegSEBlock: dila_conv (3x3x3, padding=2, dilation=2) -> conv1 (1x1x1)
    # -> sigmoid, then gate x.  (patch scratch is safely reused: the previous
    # dot has already consumed its contents.)
    se = _conv3d_im2col(x, dila_w, dila_b, m2_ref, patch_ref,
                        H=H, W=W, dilation=2)
    gate = jax.nn.sigmoid(
        jnp.dot(se1_w[...], se, preferred_element_type=jnp.float32) + se1_b[...])
    x = x * gate

    # zoom_conv(x) + skip_conv(input): fused residual epilogue.
    o_ref[...] = (
        jnp.dot(zoom_w[...], x, preferred_element_type=jnp.float32) + zoom_b[...]
        + jnp.dot(skip_w[...], x_in, preferred_element_type=jnp.float32)
        + skip_b[...])


# -----------------------------------------------------------------------------
# Wrapper
# -----------------------------------------------------------------------------
def _const_spec(*shape):
    rank = len(shape)

    def index_map(n):
        return (0,) * rank

    return pl.BlockSpec(shape, index_map)


def recombination_block(x_ncdhw, params):
    """x_ncdhw: (N, Cin, D, H, W) float32 (same NCDHW layout as PyTorch)."""
    N, Cin, D, H, W = x_ncdhw.shape
    S = D * H * W
    Cexp = params["exp_w"].shape[0]
    Cmid = params["dila_w"].shape[1]
    Cout = params["zoom_w"].shape[0]

    x = x_ncdhw.reshape(N, Cin, S)                 # lane-dense (spatial on lanes)
    m1 = _tap_masks(D, H, W, dilation=1)           # (27, 1, S) constants
    m2 = _tap_masks(D, H, W, dilation=2)

    # Tap-major (27, Cout, Cin) -> 2D (Cout, 27*Cin); column order t*Cin + c
    # matches the im2col patch-row order built inside the kernel.
    norm_w2d = jnp.transpose(params["norm_w"], (1, 0, 2)).reshape(Cexp, 27 * Cexp)
    dila_w2d = jnp.transpose(params["dila_w"], (1, 0, 2)).reshape(Cmid, 27 * Cexp)

    kernel = functools.partial(_recomb_kernel, H=H, W=W)

    out = pl.pallas_call(
        kernel,
        out_shape=jax.ShapeDtypeStruct((N, Cout, S), jnp.float32),
        grid=(N,),
        in_specs=[
            pl.BlockSpec((None, Cin, S), lambda n: (n, 0, 0)),   # input sample
            _const_spec(27, 1, S),                               # masks, dil=1
            _const_spec(27, 1, S),                               # masks, dil=2
            _const_spec(Cexp, Cin), _const_spec(Cexp, 1),        # expansion_conv
            _const_spec(Cexp, 27 * Cexp), _const_spec(Cexp, 1),  # norm_conv
            _const_spec(Cmid, 27 * Cexp), _const_spec(Cmid, 1),  # segse.dila_conv
            _const_spec(Cexp, Cmid), _const_spec(Cexp, 1),       # segse.conv1
            _const_spec(Cout, Cexp), _const_spec(Cout, 1),       # zoom_conv
            _const_spec(Cout, Cin), _const_spec(Cout, 1),        # skip_conv
        ],
        out_specs=pl.BlockSpec((None, Cout, S), lambda n: (n, 0, 0)),
        scratch_shapes=[pltpu.VMEM((27 * Cexp, S), jnp.float32)],  # im2col patches
        compiler_params=pltpu.CompilerParams(
            dimension_semantics=("parallel",)),
    )(x, m1, m2,
      params["exp_w"], params["exp_b"],
      norm_w2d, params["norm_b"],
      dila_w2d, params["dila_b"],
      params["se1_w"], params["se1_b"],
      params["zoom_w"], params["zoom_b"],
      params["skip_w"], params["skip_b"])

    return out.reshape(N, Cout, D, H, W)


# -----------------------------------------------------------------------------
# Deterministic synthetic parameters (shapes mirror the PyTorch module).
# 1x1x1 conv weights are stored as (Cout, Cin) (== torch layout squeezed);
# 3x3x3 conv weights are tap-major (27, Cout, Cin); biases as (C, 1).
# -----------------------------------------------------------------------------
def init_params(key, in_channels, out_channels):
    rate = 2
    cexp = out_channels * rate        # expansion channels
    cmid = cexp // rate               # SegSE bottleneck channels

    def conv_w(k, shape, fan_in):
        return jax.random.normal(k, shape, jnp.float32) / np.sqrt(float(fan_in))

    def conv_b(k, c):
        return 0.01 * jax.random.normal(k, (c, 1), jnp.float32)

    ks = jax.random.split(key, 12)
    return {
        # expansion_conv: Conv3d(in, cexp, 1)
        "exp_w": conv_w(ks[0], (cexp, in_channels), in_channels),
        "exp_b": conv_b(ks[1], cexp),
        # norm_conv: Conv3d(cexp, cexp, 3, padding=1)
        "norm_w": conv_w(ks[2], (27, cexp, cexp), 27 * cexp),
        "norm_b": conv_b(ks[3], cexp),
        # segse.dila_conv: Conv3d(cexp, cexp//2, 3, padding=2, dilation=2)
        "dila_w": conv_w(ks[4], (27, cmid, cexp), 27 * cexp),
        "dila_b": conv_b(ks[5], cmid),
        # segse.conv1: Conv3d(cexp//2, cexp, 1)
        "se1_w": conv_w(ks[6], (cexp, cmid), cmid),
        "se1_b": conv_b(ks[7], cexp),
        # zoom_conv: Conv3d(cexp, out, 1)
        "zoom_w": conv_w(ks[8], (out_channels, cexp), cexp),
        "zoom_b": conv_b(ks[9], out_channels),
        # skip_conv: Conv3d(in, out, 1)
        "skip_w": conv_w(ks[10], (out_channels, in_channels), in_channels),
        "skip_b": conv_b(ks[11], out_channels),
    }


if __name__ == "__main__":
    in_channels, out_channels = 4, 4
    N, D, H, W = 2, 8, 8, 8           # PyTorch input shape: (2, 4, 8, 8, 8)

    key = jax.random.PRNGKey(0)
    k_x, k_p = jax.random.split(key)
    x = jax.random.normal(k_x, (N, in_channels, D, H, W), dtype=jnp.float32)
    params = init_params(k_p, in_channels, out_channels)

    fwd = jax.jit(recombination_block)
    out = fwd(x, params)
    jax.block_until_ready(out)

    assert out.shape == (N, out_channels, D, H, W)
    assert bool(jnp.all(jnp.isfinite(out)))
    print("KERNEL_OK")
</pallas_src>

<mosaic_0001>
module attributes {stable_mosaic.version = 11 : i64} {
  func.func @_recomb_kernel(%arg0: i32, %arg1: memref<1x4x512xf32, #tpu.memory_space<vmem>>, %arg2: memref<27x1x512xf32, #tpu.memory_space<vmem>>, %arg3: memref<27x1x512xf32, #tpu.memory_space<vmem>>, %arg4: memref<8x4xf32, #tpu.memory_space<vmem>>, %arg5: memref<8x1xf32, #tpu.memory_space<vmem>>, %arg6: memref<8x216xf32, #tpu.memory_space<vmem>>, %arg7: memref<8x1xf32, #tpu.memory_space<vmem>>, %arg8: memref<4x216xf32, #tpu.memory_space<vmem>>, %arg9: memref<4x1xf32, #tpu.memory_space<vmem>>, %arg10: memref<8x4xf32, #tpu.memory_space<vmem>>, %arg11: memref<8x1xf32, #tpu.memory_space<vmem>>, %arg12: memref<4x8xf32, #tpu.memory_space<vmem>>, %arg13: memref<4x1xf32, #tpu.memory_space<vmem>>, %arg14: memref<4x4xf32, #tpu.memory_space<vmem>>, %arg15: memref<4x1xf32, #tpu.memory_space<vmem>>, %arg16: memref<1x4x512xf32, #tpu.memory_space<vmem>>, %arg17: memref<216x512xf32, #tpu.memory_space<vmem>>) attributes {dimension_semantics = [#tpu.dimension_semantics<parallel>], iteration_bounds = array<i64: 2>, scalar_prefetch = 0 : i64, scratch_operands = 1 : i64, tpu.core_type = #tpu.core_type<tc>, window_params = [{transform_indices = @transform_0, window_bounds = array<i64: 1, 4, 512>}, {pipeline_mode = #tpu.pipeline_mode<synchronous>, transform_indices = @transform_1, window_bounds = array<i64: 27, 1, 512>}, {pipeline_mode = #tpu.pipeline_mode<synchronous>, transform_indices = @transform_2, window_bounds = array<i64: 27, 1, 512>}, {pipeline_mode = #tpu.pipeline_mode<synchronous>, transform_indices = @transform_3, window_bounds = array<i64: 8, 4>}, {pipeline_mode = #tpu.pipeline_mode<synchronous>, transform_indices = @transform_4, window_bounds = array<i64: 8, 1>}, {pipeline_mode = #tpu.pipeline_mode<synchronous>, transform_indices = @transform_5, window_bounds = array<i64: 8, 216>}, {pipeline_mode = #tpu.pipeline_mode<synchronous>, transform_indices = @transform_6, window_bounds = array<i64: 8, 1>}, {pipeline_mode = #tpu.pipeline_mode<synchronous>, transform_indices = @transform_7, window_bounds = array<i64: 4, 216>}, {pipeline_mode = #tpu.pipeline_mode<synchronous>, transform_indices = @transform_8, window_bounds = array<i64: 4, 1>}, {pipeline_mode = #tpu.pipeline_mode<synchronous>, transform_indices = @transform_9, window_bounds = array<i64: 8, 4>}, {pipeline_mode = #tpu.pipeline_mode<synchronous>, transform_indices = @transform_10, window_bounds = array<i64: 8, 1>}, {pipeline_mode = #tpu.pipeline_mode<synchronous>, transform_indices = @transform_11, window_bounds = array<i64: 4, 8>}, {pipeline_mode = #tpu.pipeline_mode<synchronous>, transform_indices = @transform_12, window_bounds = array<i64: 4, 1>}, {pipeline_mode = #tpu.pipeline_mode<synchronous>, transform_indices = @transform_13, window_bounds = array<i64: 4, 4>}, {pipeline_mode = #tpu.pipeline_mode<synchronous>, transform_indices = @transform_14, window_bounds = array<i64: 4, 1>}, {transform_indices = @transform_15, window_bounds = array<i64: 1, 4, 512>}]} {
    %c0 = arith.constant 0 : index
    %c0_0 = arith.constant 0 : index
    %c0_1 = arith.constant 0 : index
    %0 = vector.load %arg1[%c0, %c0_0, %c0_1] : memref<1x4x512xf32, #tpu.memory_space<vmem>>, vector<1x4x512xf32>
    %1 = vector.shape_cast %0 : vector<1x4x512xf32> to vector<4x512xf32>
    %c0_2 = arith.constant 0 : index
    %c0_3 = arith.constant 0 : index
    %2 = vector.load %arg4[%c0_2, %c0_3] : memref<8x4xf32, #tpu.memory_space<vmem>>, vector<8x4xf32>
    %cst = arith.constant dense<0.000000e+00> : vector<8x512xf32>
    %3 = tpu.matmul %2, %1, %cst {dimension_numbers = #tpu.dot_dimension_numbers<[1], [0], [0], [1], [0, 0, 1, 1], [], []>} : vector<8x4xf32>, vector<4x512xf32>, vector<8x512xf32> -> vector<8x512xf32>
    %c0_4 = arith.constant 0 : index
    %c0_5 = arith.constant 0 : index
    %4 = vector.load %arg5[%c0_4, %c0_5] : memref<8x1xf32, #tpu.memory_space<vmem>>, vector<8x1xf32>
    %5 = vector.broadcast %4 : vector<8x1xf32> to vector<8x512xf32>
    %6 = arith.addf %3, %5 : vector<8x512xf32>
    %cst_6 = arith.constant dense<0.000000e+00> : vector<8xf32>
    %7 = vector.multi_reduction <add>, %6, %cst_6 [1] : vector<8x512xf32> to vector<8xf32>
    %8 = vector.shape_cast %7 : vector<8xf32> to vector<8x1xf32>
    %cst_7 = arith.constant 5.120000e+02 : f32
    %9 = vector.broadcast %cst_7 : f32 to vector<8x1xf32>
    %10 = arith.divf %8, %9 : vector<8x1xf32>
    %11 = vector.broadcast %10 : vector<8x1xf32> to vector<8x512xf32>
    %12 = arith.subf %6, %11 : vector<8x512xf32>
    %13 = arith.mulf %12, %12 : vector<8x512xf32>
    %cst_8 = arith.constant dense<0.000000e+00> : vector<8xf32>
    %14 = vector.multi_reduction <add>, %13, %cst_8 [1] : vector<8x512xf32> to vector<8xf32>
    %15 = vector.shape_cast %14 : vector<8xf32> to vector<8x1xf32>
    %cst_9 = arith.constant 5.120000e+02 : f32
    %16 = vector.broadcast %cst_9 : f32 to vector<8x1xf32>
    %17 = arith.divf %15, %16 : vector<8x1xf32>
    %18 = vector.broadcast %10 : vector<8x1xf32> to vector<8x512xf32>
    %19 = arith.subf %6, %18 : vector<8x512xf32>
    %cst_10 = arith.constant 9.99999974E-6 : f32
    %20 = vector.broadcast %cst_10 : f32 to vector<8x1xf32>
    %21 = arith.addf %17, %20 : vector<8x1xf32>
    %22 = math.rsqrt %21 : vector<8x1xf32>
    %23 = vector.broadcast %22 : vector<8x1xf32> to vector<8x512xf32>
    %24 = arith.mulf %19, %23 : vector<8x512xf32>
    %cst_11 = arith.constant 0.000000e+00 : f32
    %cst_12 = arith.constant 6.000000e+00 : f32
    %25 = vector.broadcast %cst_11 : f32 to vector<8x512xf32>
    %26 = arith.maximumf %25, %24 : vector<8x512xf32>
    %27 = vector.broadcast %cst_12 : f32 to vector<8x512xf32>
    %28 = arith.minimumf %27, %26 : vector<8x512xf32>
    %c73_i32 = arith.constant 73 : i32
    %29 = tpu.dynamic_rotate %28 by %c73_i32 dim 1 : vector<8x512xf32>, i32 -> vector<8x512xf32>
    %c0_13 = arith.constant 0 : index
    %c0_14 = arith.constant 0 : index
    %c0_15 = arith.constant 0 : index
    %30 = vector.load %arg2[%c0_13, %c0_14, %c0_15] : memref<27x1x512xf32, #tpu.memory_space<vmem>>, vector<1x1x512xf32>
    %31 = vector.shape_cast %30 : vector<1x1x512xf32> to vector<1x512xf32>
    %32 = vector.broadcast %31 : vector<1x512xf32> to vector<8x512xf32>
    %33 = arith.mulf %29, %32 : vector<8x512xf32>
    %c0_16 = arith.constant 0 : index
    %c0_17 = arith.constant 0 : index
    %34 = vector.load %arg17[%c0_16, %c0_17] : memref<216x512xf32, #tpu.memory_space<vmem>>, vector<8x512xf32>
    tpu.vector_store %arg17[%c0_16, %c0_17], %33 {strides = array<i32>} : memref<216x512xf32, #tpu.memory_space<vmem>>, vector<8x512xf32>,
    %c72_i32 = arith.constant 72 : i32
    %35 = tpu.dynamic_rotate %28 by %c72_i32 dim 1 : vector<8x512xf32>, i32 -> vector<8x512xf32>
    %c1 = arith.constant 1 : index
    %c0_18 = arith.constant 0 : index
    %c0_19 = arith.constant 0 : index
    %36 = vector.load %arg2[%c1, %c0_18, %c0_19] : memref<27x1x512xf32, #tpu.memory_space<vmem>>, vector<1x1x512xf32>
    %37 = vector.shape_cast %36 : vector<1x1x512xf32> to vector<1x512xf32>
    %38 = vector.broadcast %37 : vector<1x512xf32> to vector<8x512xf32>
    %39 = arith.mulf %35, %38 : vector<8x512xf32>
    %c8 = arith.constant 8 : index
    %c0_20 = arith.constant 0 : index
    %40 = vector.load %arg17[%c8, %c0_20] : memref<216x512xf32, #tpu.memory_space<vmem>>, vector<8x512xf32>
    tpu.vector_store %arg17[%c8, %c0_20], %39 {strides = array<i32>} : memref<216x512xf32, #tpu.memory_space<vmem>>, vector<8x512xf32>,
    %c71_i32 = arith.constant 71 : i32
    %41 = tpu.dynamic_rotate %28 by %c71_i32 dim 1 : vector<8x512xf32>, i32 -> vector<8x512xf32>
    %c2 = arith.constant 2 : index
    %c0_21 = arith.constant 0 : index
    %c0_22 = arith.constant 0 : index
    %42 = vector.load %arg2[%c2, %c0_21, %c0_22] : memref<27x1x512xf32, #tpu.memory_space<vmem>>, vector<1x1x512xf32>
    %43 = vector.shape_cast %42 : vector<1x1x512xf32> to vector<1x512xf32>
    %44 = vector.broadcast %43 : vector<1x512xf32> to vector<8x512xf32>
    %45 = arith.mulf %41, %44 : vector<8x512xf32>
    %c16 = arith.constant 16 : index
    %c0_23 = arith.constant 0 : index
    %46 = vector.load %arg17[%c16, %c0_23] : memref<216x512xf32, #tpu.memory_space<vmem>>, vector<8x512xf32>
    tpu.vector_store %arg17[%c16, %c0_23], %45 {strides = array<i32>} : memref<216x512xf32, #tpu.memory_space<vmem>>, vector<8x512xf32>,
    %c65_i32 = arith.constant 65 : i32
    %47 = tpu.dynamic_rotate %28 by %c65_i32 dim 1 : vector<8x512xf32>, i32 -> vector<8x512xf32>
    %c3 = arith.constant 3 : index
    %c0_24 = arith.constant 0 : index
    %c0_25 = arith.constant 0 : index
    %48 = vector.load %arg2[%c3, %c0_24, %c0_25] : memref<27x1x512xf32, #tpu.memory_space<vmem>>, vector<1x1x512xf32>
    %49 = vector.shape_cast %48 : vector<1x1x512xf32> to vector<1x512xf32>
    %50 = vector.broadcast %49 : vector<1x512xf32> to vector<8x512xf32>
    %51 = arith.mulf %47, %50 : vector<8x512xf32>
    %c24 = arith.constant 24 : index
    %c0_26 = arith.constant 0 : index
    %52 = vector.load %arg17[%c24, %c0_26] : memref<216x512xf32, #tpu.memory_space<vmem>>, vector<8x512xf32>
    tpu.vector_store %arg17[%c24, %c0_26], %51 {strides = array<i32>} : memref<216x512xf32, #tpu.memory_space<vmem>>, vector<8x512xf32>,
    %c64_i32 = arith.constant 64 : i32
    %53 = tpu.dynamic_rotate %28 by %c64_i32 dim 1 : vector<8x512xf32>, i32 -> vector<8x512xf32>
    %c4 = arith.constant 4 : index
    %c0_27 = arith.constant 0 : index
    %c0_28 = arith.constant 0 : index
    %54 = vector.load %arg2[%c4, %c0_27, %c0_28] : memref<27x1x512xf32, #tpu.memory_space<vmem>>, vector<1x1x512xf32>
    %55 = vector.shape_cast %54 : vector<1x1x512xf32> to vector<1x512xf32>
    %56 = vector.broadcast %55 : vector<1x512xf32> to vector<8x512xf32>
    %57 = arith.mulf %53, %56 : vector<8x512xf32>
    %c32 = arith.constant 32 : index
    %c0_29 = arith.constant 0 : index
    %58 = vector.load %arg17[%c32, %c0_29] : memref<216x512xf32, #tpu.memory_space<vmem>>, vector<8x512xf32>
    tpu.vector_store %arg17[%c32, %c0_29], %57 {strides = array<i32>} : memref<216x512xf32, #tpu.memory_space<vmem>>, vector<8x512xf32>,
    %c63_i32 = arith.constant 63 : i32
    %59 = tpu.dynamic_rotate %28 by %c63_i32 dim 1 : vector<8x512xf32>, i32 -> vector<8x512xf32>
    %c5 = arith.constant 5 : index
    %c0_30 = arith.constant 0 : index
    %c0_31 = arith.constant 0 : index
    %60 = vector.load %arg2[%c5, %c0_30, %c0_31] : memref<27x1x512xf32, #tpu.memory_space<vmem>>, vector<1x1x512xf32>
    %61 = vector.shape_cast %60 : vector<1x1x512xf32> to vector<1x512xf32>
    %62 = vector.broadcast %61 : vector<1x512xf32> to vector<8x512xf32>
    %63 = arith.mulf %59, %62 : vector<8x512xf32>
    %c40 = arith.constant 40 : index
    %c0_32 = arith.constant 0 : index
    %64 = vector.load %arg17[%c40, %c0_32] : memref<216x512xf32, #tpu.memory_space<vmem>>, vector<8x512xf32>
    tpu.vector_store %arg17[%c40, %c0_32], %63 {strides = array<i32>} : memref<216x512xf32, #tpu.memory_space<vmem>>, vector<8x512xf32>,
    %c57_i32 = arith.constant 57 : i32
    %65 = tpu.dynamic_rotate %28 by %c57_i32 dim 1 : vector<8x512xf32>, i32 -> vector<8x512xf32>
    %c6 = arith.constant 6 : index
    %c0_33 = arith.constant 0 : index
    %c0_34 = arith.constant 0 : index
    %66 = vector.load %arg2[%c6, %c0_33, %c0_34] : memref<27x1x512xf32, #tpu.memory_space<vmem>>, vector<1x1x512xf32>
    %67 = vector.shape_cast %66 : vector<1x1x512xf32> to vector<1x512xf32>
    %68 = vector.broadcast %67 : vector<1x512xf32> to vector<8x512xf32>
    %69 = arith.mulf %65, %68 : vector<8x512xf32>
    %c48 = arith.constant 48 : index
    %c0_35 = arith.constant 0 : index
    %70 = vector.load %arg17[%c48, %c0_35] : memref<216x512xf32, #tpu.memory_space<vmem>>, vector<8x512xf32>
    tpu.vector_store %arg17[%c48, %c0_35], %69 {strides = array<i32>} : memref<216x512xf32, #tpu.memory_space<vmem>>, vector<8x512xf32>,
    %c56_i32 = arith.constant 56 : i32
    %71 = tpu.dynamic_rotate %28 by %c56_i32 dim 1 : vector<8x512xf32>, i32 -> vector<8x512xf32>
    %c7 = arith.constant 7 : index
    %c0_36 = arith.constant 0 : index
    %c0_37 = arith.constant 0 : index
    %72 = vector.load %arg2[%c7, %c0_36, %c0_37] : memref<27x1x512xf32, #tpu.memory_space<vmem>>, vector<1x1x512xf32>
    %73 = vector.shape_cast %72 : vector<1x1x512xf32> to vector<1x512xf32>
    %74 = vector.broadcast %73 : vector<1x512xf32> to vector<8x512xf32>
    %75 = arith.mulf %71, %74 : vector<8x512xf32>
    %c56 = arith.constant 56 : index
    %c0_38 = arith.constant 0 : index
    %76 = vector.load %arg17[%c56, %c0_38] : memref<216x512xf32, #tpu.memory_space<vmem>>, vector<8x512xf32>
    tpu.vector_store %arg17[%c56, %c0_38], %75 {strides = array<i32>} : memref<216x512xf32, #tpu.memory_space<vmem>>, vector<8x512xf32>,
    %c55_i32 = arith.constant 55 : i32
    %77 = tpu.dynamic_rotate %28 by %c55_i32 dim 1 : vector<8x512xf32>, i32 -> vector<8x512xf32>
    %c8_39 = arith.constant 8 : index
    %c0_40 = arith.constant 0 : index
    %c0_41 = arith.constant 0 : index
    %78 = vector.load %arg2[%c8_39, %c0_40, %c0_41] : memref<27x1x512xf32, #tpu.memory_space<vmem>>, vector<1x1x512xf32>
    %79 = vector.shape_cast %78 : vector<1x1x512xf32> to vector<1x512xf32>
    %80 = vector.broadcast %79 : vector<1x512xf32> to vector<8x512xf32>
    %81 = arith.mulf %77, %80 : vector<8x512xf32>
    %c64 = arith.constant 64 : index
    %c0_42 = arith.constant 0 : index
    %82 = vector.load %arg17[%c64, %c0_42] : memref<216x512xf32, #tpu.memory_space<vmem>>, vector<8x512xf32>
    tpu.vector_store %arg17[%c64, %c0_42], %81 {strides = array<i32>} : memref<216x512xf32, #tpu.memory_space<vmem>>, vector<8x512xf32>,
    %c9_i32 = arith.constant 9 : i32
    %83 = tpu.dynamic_rotate %28 by %c9_i32 dim 1 : vector<8x512xf32>, i32 -> vector<8x512xf32>
    %c9 = arith.constant 9 : index
    %c0_43 = arith.constant 0 : index
    %c0_44 = arith.constant 0 : index
    %84 = vector.load %arg2[%c9, %c0_43, %c0_44] : memref<27x1x512xf32, #tpu.memory_space<vmem>>, vector<1x1x512xf32>
    %85 = vector.shape_cast %84 : vector<1x1x512xf32> to vector<1x512xf32>
    %86 = vector.broadcast %85 : vector<1x512xf32> to vector<8x512xf32>
    %87 = arith.mulf %83, %86 : vector<8x512xf32>
    %c72 = arith.constant 72 : index
    %c0_45 = arith.constant 0 : index
    %88 = vector.load %arg17[%c72, %c0_45] : memref<216x512xf32, #tpu.memory_space<vmem>>, vector<8x512xf32>
    tpu.vector_store %arg17[%c72, %c0_45], %87 {strides = array<i32>} : memref<216x512xf32, #tpu.memory_space<vmem>>, vector<8x512xf32>,
    %c8_i32 = arith.constant 8 : i32
    %89 = tpu.dynamic_rotate %28 by %c8_i32 dim 1 : vector<8x512xf32>, i32 -> vector<8x512xf32>
    %c10 = arith.constant 10 : index
    %c0_46 = arith.constant 0 : index
    %c0_47 = arith.constant 0 : index
    %90 = vector.load %arg2[%c10, %c0_46, %c0_47] : memref<27x1x512xf32, #tpu.memory_space<vmem>>, vector<1x1x512xf32>
    %91 = vector.shape_cast %90 : vector<1x1x512xf32> to vector<1x512xf32>
    %92 = vector.broadcast %91 : vector<1x512xf32> to vector<8x512xf32>
    %93 = arith.mulf %89, %92 : vector<8x512xf32>
    %c80 = arith.constant 80 : index
    %c0_48 = arith.constant 0 : index
    %94 = vector.load %arg17[%c80, %c0_48] : memref<216x512xf32, #tpu.memory_space<vmem>>, vector<8x512xf32>
    tpu.vector_store %arg17[%c80, %c0_48], %93 {strides = array<i32>} : memref<216x512xf32, #tpu.memory_space<vmem>>, vector<8x512xf32>,
    %c7_i32 = arith.constant 7 : i32
    %95 = tpu.dynamic_rotate %28 by %c7_i32 dim 1 : vector<8x512xf32>, i32 -> vector<8x512xf32>
    %c11 = arith.constant 11 : index
    %c0_49 = arith.constant 0 : index
    %c0_50 = arith.constant 0 : index
    %96 = vector.load %arg2[%c11, %c0_49, %c0_50] : memref<27x1x512xf32, #tpu.memory_space<vmem>>, vector<1x1x512xf32>
    %97 = vector.shape_cast %96 : vector<1x1x512xf32> to vector<1x512xf32>
    %98 = vector.broadcast %97 : vector<1x512xf32> to vector<8x512xf32>
    %99 = arith.mulf %95, %98 : vector<8x512xf32>
    %c88 = arith.constant 88 : index
    %c0_51 = arith.constant 0 : index
    %100 = vector.load %arg17[%c88, %c0_51] : memref<216x512xf32, #tpu.memory_space<vmem>>, vector<8x512xf32>
    tpu.vector_store %arg17[%c88, %c0_51], %99 {strides = array<i32>} : memref<216x512xf32, #tpu.memory_space<vmem>>, vector<8x512xf32>,
    %c1_i32 = arith.constant 1 : i32
    %101 = tpu.dynamic_rotate %28 by %c1_i32 dim 1 : vector<8x512xf32>, i32 -> vector<8x512xf32>
    %c12 = arith.constant 12 : index
    %c0_52 = arith.constant 0 : index
    %c0_53 = arith.constant 0 : index
    %102 = vector.load %arg2[%c12, %c0_52, %c0_53] : memref<27x1x512xf32, #tpu.memory_space<vmem>>, vector<1x1x512xf32>
    %103 = vector.shape_cast %102 : vector<1x1x512xf32> to vector<1x512xf32>
    %104 = vector.broadcast %103 : vector<1x512xf32> to vector<8x512xf32>
    %105 = arith.mulf %101, %104 : vector<8x512xf32>
    %c96 = arith.constant 96 : index
    %c0_54 = arith.constant 0 : index
    %106 = vector.load %arg17[%c96, %c0_54] : memref<216x512xf32, #tpu.memory_space<vmem>>, vector<8x512xf32>
    tpu.vector_store %arg17[%c96, %c0_54], %105 {strides = array<i32>} : memref<216x512xf32, #tpu.memory_space<vmem>>, vector<8x512xf32>,
    %c104 = arith.constant 104 : index
    %c0_55 = arith.constant 0 : index
    %107 = vector.load %arg17[%c104, %c0_55] : memref<216x512xf32, #tpu.memory_space<vmem>>, vector<8x512xf32>
    tpu.vector_store %arg17[%c104, %c0_55], %28 {strides = array<i32>} : memref<216x512xf32, #tpu.memory_space<vmem>>, vector<8x512xf32>,
    %c511_i32 = arith.constant 511 : i32
    %108 = tpu.dynamic_rotate %28 by %c511_i32 dim 1 : vector<8x512xf32>, i32 -> vector<8x512xf32>
    %c14 = arith.constant 14 : index
    %c0_56 = arith.constant 0 : index
    %c0_57 = arith.constant 0 : index
    %109 = vector.load %arg2[%c14, %c0_56, %c0_57] : memref<27x1x512xf32, #tpu.memory_space<vmem>>, vector<1x1x512xf32>
    %110 = vector.shape_cast %109 : vector<1x1x512xf32> to vector<1x512xf32>
    %111 = vector.broadcast %110 : vector<1x512xf32> to vector<8x512xf32>
    %112 = arith.mulf %108, %111 : vector<8x512xf32>
    %c112 = arith.constant 112 : index
    %c0_58 = arith.constant 0 : index
    %113 = vector.load %arg17[%c112, %c0_58] : memref<216x512xf32, #tpu.memory_space<vmem>>, vector<8x512xf32>
    tpu.vector_store %arg17[%c112, %c0_58], %112 {strides = array<i32>} : memref<216x512xf32, #tpu.memory_space<vmem>>, vector<8x512xf32>,
    %c505_i32 = arith.constant 505 : i32
    %114 = tpu.dynamic_rotate %28 by %c505_i32 dim 1 : vector<8x512xf32>, i32 -> vector<8x512xf32>
    %c15 = arith.constant 15 : index
    %c0_59 = arith.constant 0 : index
    %c0_60 = arith.constant 0 : index
    %115 = vector.load %arg2[%c15, %c0_59, %c0_60] : memref<27x1x512xf32, #tpu.memory_space<vmem>>, vector<1x1x512xf32>
    %116 = vector.shape_cast %115 : vector<1x1x512xf32> to vector<1x512xf32>
    %117 = vector.broadcast %116 : vector<1x512xf32> to vector<8x512xf32>
    %118 = arith.mulf %114, %117 : vector<8x512xf32>
    %c120 = arith.constant 120 : index
    %c0_61 = arith.constant 0 : index
    %119 = vector.load %arg17[%c120, %c0_61] : memref<216x512xf32, #tpu.memory_space<vmem>>, vector<8x512xf32>
    tpu.vector_store %arg17[%c120, %c0_61], %118 {strides = array<i32>} : memref<216x512xf32, #tpu.memory_space<vmem>>, vector<8x512xf32>,
    %c504_i32 = arith.constant 504 : i32
    %120 = tpu.dynamic_rotate %28 by %c504_i32 dim 1 : vector<8x512xf32>, i32 -> vector<8x512xf32>
    %c16_62 = arith.constant 16 : index
    %c0_63 = arith.constant 0 : index
    %c0_64 = arith.constant 0 : index
    %121 = vector.load %arg2[%c16_62, %c0_63, %c0_64] : memref<27x1x512xf32, #tpu.memory_space<vmem>>, vector<1x1x512xf32>
    %122 = vector.shape_cast %121 : vector<1x1x512xf32> to vector<1x512xf32>
    %123 = vector.broadcast %122 : vector<1x512xf32> to vector<8x512xf32>
    %124 = arith.mulf %120, %123 : vector<8x512xf32>
    %c128 = arith.constant 128 : index
    %c0_65 = arith.constant 0 : index
    %125 = vector.load %arg17[%c128, %c0_65] : memref<216x512xf32, #tpu.memory_space<vmem>>, vector<8x512xf32>
    tpu.vector_store %arg17[%c128, %c0_65], %124 {strides = array<i32>} : memref<216x512xf32, #tpu.memory_space<vmem>>, vector<8x512xf32>,
    %c503_i32 = arith.constant 503 : i32
    %126 = tpu.dynamic_rotate %28 by %c503_i32 dim 1 : vector<8x512xf32>, i32 -> vector<8x512xf32>
    %c17 = arith.constant 17 : index
    %c0_66 = arith.constant 0 : index
    %c0_67 = arith.constant 0 : index
    %127 = vector.load %arg2[%c17, %c0_66, %c0_67] : memref<27x1x512xf32, #tpu.memory_space<vmem>>, vector<1x1x512xf32>
    %128 = vector.shape_cast %127 : vector<1x1x512xf32> to vector<1x512xf32>
    %129 = vector.broadcast %128 : vector<1x512xf32> to vector<8x512xf32>
    %130 = arith.mulf %126, %129 : vector<8x512xf32>
    %c136 = arith.constant 136 : index
    %c0_68 = arith.constant 0 : index
    %131 = vector.load %arg17[%c136, %c0_68] : memref<216x512xf32, #tpu.memory_space<vmem>>, vector<8x512xf32>
    tpu.vector_store %arg17[%c136, %c0_68], %130 {strides = array<i32>} : memref<216x512xf32, #tpu.memory_space<vmem>>, vector<8x512xf32>,
    %c457_i32 = arith.constant 457 : i32
    %132 = tpu.dynamic_rotate %28 by %c457_i32 dim 1 : vector<8x512xf32>, i32 -> vector<8x512xf32>
    %c18 = arith.constant 18 : index
    %c0_69 = arith.constant 0 : index
    %c0_70 = arith.constant 0 : index
    %133 = vector.load %arg2[%c18, %c0_69, %c0_70] : memref<27x1x512xf32, #tpu.memory_space<vmem>>, vector<1x1x512xf32>
    %134 = vector.shape_cast %133 : vector<1x1x512xf32> to vector<1x512xf32>
    %135 = vector.broadcast %134 : vector<1x512xf32> to vector<8x512xf32>
    %136 = arith.mulf %132, %135 : vector<8x512xf32>
    %c144 = arith.constant 144 : index
    %c0_71 = arith.constant 0 : index
    %137 = vector.load %arg17[%c144, %c0_71] : memref<216x512xf32, #tpu.memory_space<vmem>>, vector<8x512xf32>
    tpu.vector_store %arg17[%c144, %c0_71], %136 {strides = array<i32>} : memref<216x512xf32, #tpu.memory_space<vmem>>, vector<8x512xf32>,
    %c456_i32 = arith.constant 456 : i32
    %138 = tpu.dynamic_rotate %28 by %c456_i32 dim 1 : vector<8x512xf32>, i32 -> vector<8x512xf32>
    %c19 = arith.constant 19 : index
    %c0_72 = arith.constant 0 : index
    %c0_73 = arith.constant 0 : index
    %139 = vector.load %arg2[%c19, %c0_72, %c0_73] : memref<27x1x512xf32, #tpu.memory_space<vmem>>, vector<1x1x512xf32>
    %140 = vector.shape_cast %139 : vector<1x1x512xf32> to vector<1x512xf32>
    %141 = vector.broadcast %140 : vector<1x512xf32> to vector<8x512xf32>
    %142 = arith.mulf %138, %141 : vector<8x512xf32>
    %c152 = arith.constant 152 : index
    %c0_74 = arith.constant 0 : index
    %143 = vector.load %arg17[%c152, %c0_74] : memref<216x512xf32, #tpu.memory_space<vmem>>, vector<8x512xf32>
    tpu.vector_store %arg17[%c152, %c0_74], %142 {strides = array<i32>} : memref<216x512xf32, #tpu.memory_space<vmem>>, vector<8x512xf32>,
    %c455_i32 = arith.constant 455 : i32
    %144 = tpu.dynamic_rotate %28 by %c455_i32 dim 1 : vector<8x512xf32>, i32 -> vector<8x512xf32>
    %c20 = arith.constant 20 : index
    %c0_75 = arith.constant 0 : index
    %c0_76 = arith.constant 0 : index
    %145 = vector.load %arg2[%c20, %c0_75, %c0_76] : memref<27x1x512xf32, #tpu.memory_space<vmem>>, vector<1x1x512xf32>
    %146 = vector.shape_cast %145 : vector<1x1x512xf32> to vector<1x512xf32>
    %147 = vector.broadcast %146 : vector<1x512xf32> to vector<8x512xf32>
    %148 = arith.mulf %144, %147 : vector<8x512xf32>
    %c160 = arith.constant 160 : index
    %c0_77 = arith.constant 0 : index
    %149 = vector.load %arg17[%c160, %c0_77] : memref<216x512xf32, #tpu.memory_space<vmem>>, vector<8x512xf32>
    tpu.vector_store %arg17[%c160, %c0_77], %148 {strides = array<i32>} : memref<216x512xf32, #tpu.memory_space<vmem>>, vector<8x512xf32>,
    %c449_i32 = arith.constant 449 : i32
    %150 = tpu.dynamic_rotate %28 by %c449_i32 dim 1 : vector<8x512xf32>, i32 -> vector<8x512xf32>
    %c21 = arith.constant 21 : index
    %c0_78 = arith.constant 0 : index
    %c0_79 = arith.constant 0 : index
    %151 = vector.load %arg2[%c21, %c0_78, %c0_79] : memref<27x1x512xf32, #tpu.memory_space<vmem>>, vector<1x1x512xf32>
    %152 = vector.shape_cast %151 : vector<1x1x512xf32> to vector<1x512xf32>
    %153 = vector.broadcast %152 : vector<1x512xf32> to vector<8x512xf32>
    %154 = arith.mulf %150, %153 : vector<8x512xf32>
    %c168 = arith.constant 168 : index
    %c0_80 = arith.constant 0 : index
    %155 = vector.load %arg17[%c168, %c0_80] : memref<216x512xf32, #tpu.memory_space<vmem>>, vector<8x512xf32>
    tpu.vector_store %arg17[%c168, %c0_80], %154 {strides = array<i32>} : memref<216x512xf32, #tpu.memory_space<vmem>>, vector<8x512xf32>,
    %c448_i32 = arith.constant 448 : i32
    %156 = tpu.dynamic_rotate %28 by %c448_i32 dim 1 : vector<8x512xf32>, i32 -> vector<8x512xf32>
    %c22 = arith.constant 22 : index
    %c0_81 = arith.constant 0 : index
    %c0_82 = arith.constant 0 : index
    %157 = vector.load %arg2[%c22, %c0_81, %c0_82] : memref<27x1x512xf32, #tpu.memory_space<vmem>>, vector<1x1x512xf32>
    %158 = vector.shape_cast %157 : vector<1x1x512xf32> to vector<1x512xf32>
    %159 = vector.broadcast %158 : vector<1x512xf32> to vector<8x512xf32>
    %160 = arith.mulf %156, %159 : vector<8x512xf32>
    %c176 = arith.constant 176 : index
    %c0_83 = arith.constant 0 : index
    %161 = vector.load %arg17[%c176, %c0_83] : memref<216x512xf32, #tpu.memory_space<vmem>>, vector<8x512xf32>
    tpu.vector_store %arg17[%c176, %c0_83], %160 {strides = array<i32>} : memref<216x512xf32, #tpu.memory_space<vmem>>, vector<8x512xf32>,
    %c447_i32 = arith.constant 447 : i32
    %162 = tpu.dynamic_rotate %28 by %c447_i32 dim 1 : vector<8x512xf32>, i32 -> vector<8x512xf32>
    %c23 = arith.constant 23 : index
    %c0_84 = arith.constant 0 : index
    %c0_85 = arith.constant 0 : index
    %163 = vector.load %arg2[%c23, %c0_84, %c0_85] : memref<27x1x512xf32, #tpu.memory_space<vmem>>, vector<1x1x512xf32>
    %164 = vector.shape_cast %163 : vector<1x1x512xf32> to vector<1x512xf32>
    %165 = vector.broadcast %164 : vector<1x512xf32> to vector<8x512xf32>
    %166 = arith.mulf %162, %165 : vector<8x512xf32>
    %c184 = arith.constant 184 : index
    %c0_86 = arith.constant 0 : index
    %167 = vector.load %arg17[%c184, %c0_86] : memref<216x512xf32, #tpu.memory_space<vmem>>, vector<8x512xf32>
    tpu.vector_store %arg17[%c184, %c0_86], %166 {strides = array<i32>} : memref<216x512xf32, #tpu.memory_space<vmem>>, vector<8x512xf32>,
    %c441_i32 = arith.constant 441 : i32
    %168 = tpu.dynamic_rotate %28 by %c441_i32 dim 1 : vector<8x512xf32>, i32 -> vector<8x512xf32>
    %c24_87 = arith.constant 24 : index
    %c0_88 = arith.constant 0 : index
    %c0_89 = arith.constant 0 : index
    %169 = vector.load %arg2[%c24_87, %c0_88, %c0_89] : memref<27x1x512xf32, #tpu.memory_space<vmem>>, vector<1x1x512xf32>
    %170 = vector.shape_cast %169 : vector<1x1x512xf32> to vector<1x512xf32>
    %171 = vector.broadcast %170 : vector<1x512xf32> to vector<8x512xf32>
    %172 = arith.mulf %168, %171 : vector<8x512xf32>
    %c192 = arith.constant 192 : index
    %c0_90 = arith.constant 0 : index
    %173 = vector.load %arg17[%c192, %c0_90] : memref<216x512xf32, #tpu.memory_space<vmem>>, vector<8x512xf32>
    tpu.vector_store %arg17[%c192, %c0_90], %172 {strides = array<i32>} : memref<216x512xf32, #tpu.memory_space<vmem>>, vector<8x512xf32>,
    %c440_i32 = arith.constant 440 : i32
    %174 = tpu.dynamic_rotate %28 by %c440_i32 dim 1 : vector<8x512xf32>, i32 -> vector<8x512xf32>
    %c25 = arith.constant 25 : index
    %c0_91 = arith.constant 0 : index
    %c0_92 = arith.constant 0 : index
    %175 = vector.load %arg2[%c25, %c0_91, %c0_92] : memref<27x1x512xf32, #tpu.memory_space<vmem>>, vector<1x1x512xf32>
    %176 = vector.shape_cast %175 : vector<1x1x512xf32> to vector<1x512xf32>
    %177 = vector.broadcast %176 : vector<1x512xf32> to vector<8x512xf32>
    %178 = arith.mulf %174, %177 : vector<8x512xf32>
    %c200 = arith.constant 200 : index
    %c0_93 = arith.constant 0 : index
    %179 = vector.load %arg17[%c200, %c0_93] : memref<216x512xf32, #tpu.memory_space<vmem>>, vector<8x512xf32>
    tpu.vector_store %arg17[%c200, %c0_93], %178 {strides = array<i32>} : memref<216x512xf32, #tpu.memory_space<vmem>>, vector<8x512xf32>,
    %c439_i32 = arith.constant 439 : i32
    %180 = tpu.dynamic_rotate %28 by %c439_i32 dim 1 : vector<8x512xf32>, i32 -> vector<8x512xf32>
    %c26 = arith.constant 26 : index
    %c0_94 = arith.constant 0 : index
    %c0_95 = arith.constant 0 : index
    %181 = vector.load %arg2[%c26, %c0_94, %c0_95] : memref<27x1x512xf32, #tpu.memory_space<vmem>>, vector<1x1x512xf32>
    %182 = vector.shape_cast %181 : vector<1x1x512xf32> to vector<1x512xf32>
    %183 = vector.broadcast %182 : vector<1x512xf32> to vector<8x512xf32>
    %184 = arith.mulf %180, %183 : vector<8x512xf32>
    %c208 = arith.constant 208 : index
    %c0_96 = arith.constant 0 : index
    %185 = vector.load %arg17[%c208, %c0_96] : memref<216x512xf32, #tpu.memory_space<vmem>>, vector<8x512xf32>
    tpu.vector_store %arg17[%c208, %c0_96], %184 {strides = array<i32>} : memref<216x512xf32, #tpu.memory_space<vmem>>, vector<8x512xf32>,
    %c0_97 = arith.constant 0 : index
    %c0_98 = arith.constant 0 : index
    %186 = vector.load %arg6[%c0_97, %c0_98] : memref<8x216xf32, #tpu.memory_space<vmem>>, vector<8x216xf32>
    %c0_99 = arith.constant 0 : index
    %c0_100 = arith.constant 0 : index
    %187 = vector.load %arg17[%c0_99, %c0_100] : memref<216x512xf32, #tpu.memory_space<vmem>>, vector<216x512xf32>
    %cst_101 = arith.constant dense<0.000000e+00> : vector<8x512xf32>
    %188 = tpu.matmul %186, %187, %cst_101 {dimension_numbers = #tpu.dot_dimension_numbers<[1], [0], [0], [1], [0, 0, 1, 1], [], []>} : vector<8x216xf32>, vector<216x512xf32>, vector<8x512xf32> -> vector<8x512xf32>
    %c0_102 = arith.constant 0 : index
    %c0_103 = arith.constant 0 : index
    %189 = vector.load %arg7[%c0_102, %c0_103] : memref<8x1xf32, #tpu.memory_space<vmem>>, vector<8x1xf32>
    %190 = vector.broadcast %189 : vector<8x1xf32> to vector<8x512xf32>
    %191 = arith.addf %188, %190 : vector<8x512xf32>
    %c146_i32 = arith.constant 146 : i32
    %192 = tpu.dynamic_rotate %191 by %c146_i32 dim 1 : vector<8x512xf32>, i32 -> vector<8x512xf32>
    %c0_104 = arith.constant 0 : index
    %c0_105 = arith.constant 0 : index
    %c0_106 = arith.constant 0 : index
    %193 = vector.load %arg3[%c0_104, %c0_105, %c0_106] : memref<27x1x512xf32, #tpu.memory_space<vmem>>, vector<1x1x512xf32>
    %194 = vector.shape_cast %193 : vector<1x1x512xf32> to vector<1x512xf32>
    %195 = vector.broadcast %194 : vector<1x512xf32> to vector<8x512xf32>
    %196 = arith.mulf %192, %195 : vector<8x512xf32>
    %c0_107 = arith.constant 0 : index
    %c0_108 = arith.constant 0 : index
    %197 = vector.load %arg17[%c0_107, %c0_108] : memref<216x512xf32, #tpu.memory_space<vmem>>, vector<8x512xf32>
    tpu.vector_store %arg17[%c0_107, %c0_108], %196 {strides = array<i32>} : memref<216x512xf32, #tpu.memory_space<vmem>>, vector<8x512xf32>,
    %c144_i32 = arith.constant 144 : i32
    %198 = tpu.dynamic_rotate %191 by %c144_i32 dim 1 : vector<8x512xf32>, i32 -> vector<8x512xf32>
    %c1_109 = arith.constant 1 : index
    %c0_110 = arith.constant 0 : index
    %c0_111 = arith.constant 0 : index
    %199 = vector.load %arg3[%c1_109, %c0_110, %c0_111] : memref<27x1x512xf32, #tpu.memory_space<vmem>>, vector<1x1x512xf32>
    %200 = vector.shape_cast %199 : vector<1x1x512xf32> to vector<1x512xf32>
    %201 = vector.broadcast %200 : vector<1x512xf32> to vector<8x512xf32>
    %202 = arith.mulf %198, %201 : vector<8x512xf32>
    %c8_112 = arith.constant 8 : index
    %c0_113 = arith.constant 0 : index
    %203 = vector.load %arg17[%c8_112, %c0_113] : memref<216x512xf32, #tpu.memory_space<vmem>>, vector<8x512xf32>
    tpu.vector_store %arg17[%c8_112, %c0_113], %202 {strides = array<i32>} : memref<216x512xf32, #tpu.memory_space<vmem>>, vector<8x512xf32>,
    %c142_i32 = arith.constant 142 : i32
    %204 = tpu.dynamic_rotate %191 by %c142_i32 dim 1 : vector<8x512xf32>, i32 -> vector<8x512xf32>
    %c2_114 = arith.constant 2 : index
    %c0_115 = arith.constant 0 : index
    %c0_116 = arith.constant 0 : index
    %205 = vector.load %arg3[%c2_114, %c0_115, %c0_116] : memref<27x1x512xf32, #tpu.memory_space<vmem>>, vector<1x1x512xf32>
    %206 = vector.shape_cast %205 : vector<1x1x512xf32> to vector<1x512xf32>
    %207 = vector.broadcast %206 : vector<1x512xf32> to vector<8x512xf32>
    %208 = arith.mulf %204, %207 : vector<8x512xf32>
    %c16_117 = arith.constant 16 : index
    %c0_118 = arith.constant 0 : index
    %209 = vector.load %arg17[%c16_117, %c0_118] : memref<216x512xf32, #tpu.memory_space<vmem>>, vector<8x512xf32>
    tpu.vector_store %arg17[%c16_117, %c0_118], %208 {strides = array<i32>} : memref<216x512xf32, #tpu.memory_space<vmem>>, vector<8x512xf32>,
    %c130_i32 = arith.constant 130 : i32
    %210 = tpu.dynamic_rotate %191 by %c130_i32 dim 1 : vector<8x512xf32>, i32 -> vector<8x512xf32>
    %c3_119 = arith.constant 3 : index
    %c0_120 = arith.constant 0 : index
    %c0_121 = arith.constant 0 : index
    %211 = vector.load %arg3[%c3_119, %c0_120, %c0_121] : memref<27x1x512xf32, #tpu.memory_space<vmem>>, vector<1x1x512xf32>
    %212 = vector.shape_cast %211 : vector<1x1x512xf32> to vector<1x512xf32>
    %213 = vector.broadcast %212 : vector<1x512xf32> to vector<8x512xf32>
    %214 = arith.mulf %210, %213 : vector<8x512xf32>
    %c24_122 = arith.constant 24 : index
    %c0_123 = arith.constant 0 : index
    %215 = vector.load %arg17[%c24_122, %c0_123] : memref<216x512xf32, #tpu.memory_space<vmem>>, vector<8x512xf32>
    tpu.vector_store %arg17[%c24_122, %c0_123], %214 {strides = array<i32>} : memref<216x512xf32, #tpu.memory_space<vmem>>, vector<8x512xf32>,
    %c128_i32 = arith.constant 128 : i32
    %216 = tpu.dynamic_rotate %191 by %c128_i32 dim 1 : vector<8x512xf32>, i32 -> vector<8x512xf32>
    %c4_124 = arith.constant 4 : index
    %c0_125 = arith.constant 0 : index
    %c0_126 = arith.constant 0 : index
    %217 = vector.load %arg3[%c4_124, %c0_125, %c0_126] : memref<27x1x512xf32, #tpu.memory_space<vmem>>, vector<1x1x512xf32>
    %218 = vector.shape_cast %217 : vector<1x1x512xf32> to vector<1x512xf32>
    %219 = vector.broadcast %218 : vector<1x512xf32> to vector<8x512xf32>
    %220 = arith.mulf %216, %219 : vector<8x512xf32>
    %c32_127 = arith.constant 32 : index
    %c0_128 = arith.constant 0 : index
    %221 = vector.load %arg17[%c32_127, %c0_128] : memref<216x512xf32, #tpu.memory_space<vmem>>, vector<8x512xf32>
    tpu.vector_store %arg17[%c32_127, %c0_128], %220 {strides = array<i32>} : memref<216x512xf32, #tpu.memory_space<vmem>>, vector<8x512xf32>,
    %c126_i32 = arith.constant 126 : i32
    %222 = tpu.dynamic_rotate %191 by %c126_i32 dim 1 : vector<8x512xf32>, i32 -> vector<8x512xf32>
    %c5_129 = arith.constant 5 : index
    %c0_130 = arith.constant 0 : index
    %c0_131 = arith.constant 0 : index
    %223 = vector.load %arg3[%c5_129, %c0_130, %c0_131] : memref<27x1x512xf32, #tpu.memory_space<vmem>>, vector<1x1x512xf32>
    %224 = vector.shape_cast %223 : vector<1x1x512xf32> to vector<1x512xf32>
    %225 = vector.broadcast %224 : vector<1x512xf32> to vector<8x512xf32>
    %226 = arith.mulf %222, %225 : vector<8x512xf32>
    %c40_132 = arith.constant 40 : index
    %c0_133 = arith.constant 0 : index
    %227 = vector.load %arg17[%c40_132, %c0_133] : memref<216x512xf32, #tpu.memory_space<vmem>>, vector<8x512xf32>
    tpu.vector_store %arg17[%c40_132, %c0_133], %226 {strides = array<i32>} : memref<216x512xf32, #tpu.memory_space<vmem>>, vector<8x512xf32>,
    %c114_i32 = arith.constant 114 : i32
    %228 = tpu.dynamic_rotate %191 by %c114_i32 dim 1 : vector<8x512xf32>, i32 -> vector<8x512xf32>
    %c6_134 = arith.constant 6 : index
    %c0_135 = arith.constant 0 : index
    %c0_136 = arith.constant 0 : index
    %229 = vector.load %arg3[%c6_134, %c0_135, %c0_136] : memref<27x1x512xf32, #tpu.memory_space<vmem>>, vector<1x1x512xf32>
    %230 = vector.shape_cast %229 : vector<1x1x512xf32> to vector<1x512xf32>
    %231 = vector.broadcast %230 : vector<1x512xf32> to vector<8x512xf32>
    %232 = arith.mulf %228, %231 : vector<8x512xf32>
    %c48_137 = arith.constant 48 : index
    %c0_138 = arith.constant 0 : index
    %233 = vector.load %arg17[%c48_137, %c0_138] : memref<216x512xf32, #tpu.memory_space<vmem>>, vector<8x512xf32>
    tpu.vector_store %arg17[%c48_137, %c0_138], %232 {strides = array<i32>} : memref<216x512xf32, #tpu.memory_space<vmem>>, vector<8x512xf32>,
    %c112_i32 = arith.constant 112 : i32
    %234 = tpu.dynamic_rotate %191 by %c112_i32 dim 1 : vector<8x512xf32>, i32 -> vector<8x512xf32>
    %c7_139 = arith.constant 7 : index
    %c0_140 = arith.constant 0 : index
    %c0_141 = arith.constant 0 : index
    %235 = vector.load %arg3[%c7_139, %c0_140, %c0_141] : memref<27x1x512xf32, #tpu.memory_space<vmem>>, vector<1x1x512xf32>
    %236 = vector.shape_cast %235 : vector<1x1x512xf32> to vector<1x512xf32>
    %237 = vector.broadcast %236 : vector<1x512xf32> to vector<8x512xf32>
    %238 = arith.mulf %234, %237 : vector<8x512xf32>
    %c56_142 = arith.constant 56 : index
    %c0_143 = arith.constant 0 : index
    %239 = vector.load %arg17[%c56_142, %c0_143] : memref<216x512xf32, #tpu.memory_space<vmem>>, vector<8x512xf32>
    tpu.vector_store %arg17[%c56_142, %c0_143], %238 {strides = array<i32>} : memref<216x512xf32, #tpu.memory_space<vmem>>, vector<8x512xf32>,
    %c110_i32 = arith.constant 110 : i32
    %240 = tpu.dynamic_rotate %191 by %c110_i32 dim 1 : vector<8x512xf32>, i32 -> vector<8x512xf32>
    %c8_144 = arith.constant 8 : index
    %c0_145 = arith.constant 0 : index
    %c0_146 = arith.constant 0 : index
    %241 = vector.load %arg3[%c8_144, %c0_145, %c0_146] : memref<27x1x512xf32, #tpu.memory_space<vmem>>, vector<1x1x512xf32>
    %242 = vector.shape_cast %241 : vector<1x1x512xf32> to vector<1x512xf32>
    %243 = vector.broadcast %242 : vector<1x512xf32> to vector<8x512xf32>
    %244 = arith.mulf %240, %243 : vector<8x512xf32>
    %c64_147 = arith.constant 64 : index
    %c0_148 = arith.constant 0 : index
    %245 = vector.load %arg17[%c64_147, %c0_148] : memref<216x512xf32, #tpu.memory_space<vmem>>, vector<8x512xf32>
    tpu.vector_store %arg17[%c64_147, %c0_148], %244 {strides = array<i32>} : memref<216x512xf32, #tpu.memory_space<vmem>>, vector<8x512xf32>,
    %c18_i32 = arith.constant 18 : i32
    %246 = tpu.dynamic_rotate %191 by %c18_i32 dim 1 : vector<8x512xf32>, i32 -> vector<8x512xf32>
    %c9_149 = arith.constant 9 : index
    %c0_150 = arith.constant 0 : index
    %c0_151 = arith.constant 0 : index
    %247 = vector.load %arg3[%c9_149, %c0_150, %c0_151] : memref<27x1x512xf32, #tpu.memory_space<vmem>>, vector<1x1x512xf32>
    %248 = vector.shape_cast %247 : vector<1x1x512xf32> to vector<1x512xf32>
    %249 = vector.broadcast %248 : vector<1x512xf32> to vector<8x512xf32>
    %250 = arith.mulf %246, %249 : vector<8x512xf32>
    %c72_152 = arith.constant 72 : index
    %c0_153 = arith.constant 0 : index
    %251 = vector.load %arg17[%c72_152, %c0_153] : memref<216x512xf32, #tpu.memory_space<vmem>>, vector<8x512xf32>
    tpu.vector_store %arg17[%c72_152, %c0_153], %250 {strides = array<i32>} : memref<216x512xf32, #tpu.memory_space<vmem>>, vector<8x512xf32>,
    %c16_i32 = arith.constant 16 : i32
    %252 = tpu.dynamic_rotate %191 by %c16_i32 dim 1 : vector<8x512xf32>, i32 -> vector<8x512xf32>
    %c10_154 = arith.constant 10 : index
    %c0_155 = arith.constant 0 : index
    %c0_156 = arith.constant 0 : index
    %253 = vector.load %arg3[%c10_154, %c0_155, %c0_156] : memref<27x1x512xf32, #tpu.memory_space<vmem>>, vector<1x1x512xf32>
    %254 = vector.shape_cast %253 : vector<1x1x512xf32> to vector<1x512xf32>
    %255 = vector.broadcast %254 : vector<1x512xf32> to vector<8x512xf32>
    %256 = arith.mulf %252, %255 : vector<8x512xf32>
    %c80_157 = arith.constant 80 : index
    %c0_158 = arith.constant 0 : index
    %257 = vector.load %arg17[%c80_157, %c0_158] : memref<216x512xf32, #tpu.memory_space<vmem>>, vector<8x512xf32>
    tpu.vector_store %arg17[%c80_157, %c0_158], %256 {strides = array<i32>} : memref<216x512xf32, #tpu.memory_space<vmem>>, vector<8x512xf32>,
    %c14_i32 = arith.constant 14 : i32
    %258 = tpu.dynamic_rotate %191 by %c14_i32 dim 1 : vector<8x512xf32>, i32 -> vector<8x512xf32>
    %c11_159 = arith.constant 11 : index
    %c0_160 = arith.constant 0 : index
    %c0_161 = arith.constant 0 : index
    %259 = vector.load %arg3[%c11_159, %c0_160, %c0_161] : memref<27x1x512xf32, #tpu.memory_space<vmem>>, vector<1x1x512xf32>
    %260 = vector.shape_cast %259 : vector<1x1x512xf32> to vector<1x512xf32>
    %261 = vector.broadcast %260 : vector<1x512xf32> to vector<8x512xf32>
    %262 = arith.mulf %258, %261 : vector<8x512xf32>
    %c88_162 = arith.constant 88 : index
    %c0_163 = arith.constant 0 : index
    %263 = vector.load %arg17[%c88_162, %c0_163] : memref<216x512xf32, #tpu.memory_space<vmem>>, vector<8x512xf32>
    tpu.vector_store %arg17[%c88_162, %c0_163], %262 {strides = array<i32>} : memref<216x512xf32, #tpu.memory_space<vmem>>, vector<8x512xf32>,
    %c2_i32 = arith.constant 2 : i32
    %264 = tpu.dynamic_rotate %191 by %c2_i32 dim 1 : vector<8x512xf32>, i32 -> vector<8x512xf32>
    %c12_164 = arith.constant 12 : index
    %c0_165 = arith.constant 0 : index
    %c0_166 = arith.constant 0 : index
    %265 = vector.load %arg3[%c12_164, %c0_165, %c0_166] : memref<27x1x512xf32, #tpu.memory_space<vmem>>, vector<1x1x512xf32>
    %266 = vector.shape_cast %265 : vector<1x1x512xf32> to vector<1x512xf32>
    %267 = vector.broadcast %266 : vector<1x512xf32> to vector<8x512xf32>
    %268 = arith.mulf %264, %267 : vector<8x512xf32>
    %c96_167 = arith.constant 96 : index
    %c0_168 = arith.constant 0 : index
    %269 = vector.load %arg17[%c96_167, %c0_168] : memref<216x512xf32, #tpu.memory_space<vmem>>, vector<8x512xf32>
    tpu.vector_store %arg17[%c96_167, %c0_168], %268 {strides = array<i32>} : memref<216x512xf32, #tpu.memory_space<vmem>>, vector<8x512xf32>,
    %c104_169 = arith.constant 104 : index
    %c0_170 = arith.constant 0 : index
    %270 = vector.load %arg17[%c104_169, %c0_170] : memref<216x512xf32, #tpu.memory_space<vmem>>, vector<8x512xf32>
    tpu.vector_store %arg17[%c104_169, %c0_170], %191 {strides = array<i32>} : memref<216x512xf32, #tpu.memory_space<vmem>>, vector<8x512xf32>,
    %c510_i32 = arith.constant 510 : i32
    %271 = tpu.dynamic_rotate %191 by %c510_i32 dim 1 : vector<8x512xf32>, i32 -> vector<8x512xf32>
    %c14_171 = arith.constant 14 : index
    %c0_172 = arith.constant 0 : index
    %c0_173 = arith.constant 0 : index
    %272 = vector.load %arg3[%c14_171, %c0_172, %c0_173] : memref<27x1x512xf32, #tpu.memory_space<vmem>>, vector<1x1x512xf32>
    %273 = vector.shape_cast %272 : vector<1x1x512xf32> to vector<1x512xf32>
    %274 = vector.broadcast %273 : vector<1x512xf32> to vector<8x512xf32>
    %275 = arith.mulf %271, %274 : vector<8x512xf32>
    %c112_174 = arith.constant 112 : index
    %c0_175 = arith.constant 0 : index
    %276 = vector.load %arg17[%c112_174, %c0_175] : memref<216x512xf32, #tpu.memory_space<vmem>>, vector<8x512xf32>
    tpu.vector_store %arg17[%c112_174, %c0_175], %275 {strides = array<i32>} : memref<216x512xf32, #tpu.memory_space<vmem>>, vector<8x512xf32>,
    %c498_i32 = arith.constant 498 : i32
    %277 = tpu.dynamic_rotate %191 by %c498_i32 dim 1 : vector<8x512xf32>, i32 -> vector<8x512xf32>
    %c15_176 = arith.constant 15 : index
    %c0_177 = arith.constant 0 : index
    %c0_178 = arith.constant 0 : index
    %278 = vector.load %arg3[%c15_176, %c0_177, %c0_178] : memref<27x1x512xf32, #tpu.memory_space<vmem>>, vector<1x1x512xf32>
    %279 = vector.shape_cast %278 : vector<1x1x512xf32> to vector<1x512xf32>
    %280 = vector.broadcast %279 : vector<1x512xf32> to vector<8x512xf32>
    %281 = arith.mulf %277, %280 : vector<8x512xf32>
    %c120_179 = arith.constant 120 : index
    %c0_180 = arith.constant 0 : index
    %282 = vector.load %arg17[%c120_179, %c0_180] : memref<216x512xf32, #tpu.memory_space<vmem>>, vector<8x512xf32>
    tpu.vector_store %arg17[%c120_179, %c0_180], %281 {strides = array<i32>} : memref<216x512xf32, #tpu.memory_space<vmem>>, vector<8x512xf32>,
    %c496_i32 = arith.constant 496 : i32
    %283 = tpu.dynamic_rotate %191 by %c496_i32 dim 1 : vector<8x512xf32>, i32 -> vector<8x512xf32>
    %c16_181 = arith.constant 16 : index
    %c0_182 = arith.constant 0 : index
    %c0_183 = arith.constant 0 : index
    %284 = vector.load %arg3[%c16_181, %c0_182, %c0_183] : memref<27x1x512xf32, #tpu.memory_space<vmem>>, vector<1x1x512xf32>
    %285 = vector.shape_cast %284 : vector<1x1x512xf32> to vector<1x512xf32>
    %286 = vector.broadcast %285 : vector<1x512xf32> to vector<8x512xf32>
    %287 = arith.mulf %283, %286 : vector<8x512xf32>
    %c128_184 = arith.constant 128 : index
    %c0_185 = arith.constant 0 : index
    %288 = vector.load %arg17[%c128_184, %c0_185] : memref<216x512xf32, #tpu.memory_space<vmem>>, vector<8x512xf32>
    tpu.vector_store %arg17[%c128_184, %c0_185], %287 {strides = array<i32>} : memref<216x512xf32, #tpu.memory_space<vmem>>, vector<8x512xf32>,
    %c494_i32 = arith.constant 494 : i32
    %289 = tpu.dynamic_rotate %191 by %c494_i32 dim 1 : vector<8x512xf32>, i32 -> vector<8x512xf32>
    %c17_186 = arith.constant 17 : index
    %c0_187 = arith.constant 0 : index
    %c0_188 = arith.constant 0 : index
    %290 = vector.load %arg3[%c17_186, %c0_187, %c0_188] : memref<27x1x512xf32, #tpu.memory_space<vmem>>, vector<1x1x512xf32>
    %291 = vector.shape_cast %290 : vector<1x1x512xf32> to vector<1x512xf32>
    %292 = vector.broadcast %291 : vector<1x512xf32> to vector<8x512xf32>
    %293 = arith.mulf %289, %292 : vector<8x512xf32>
    %c136_189 = arith.constant 136 : index
    %c0_190 = arith.constant 0 : index
    %294 = vector.load %arg17[%c136_189, %c0_190] : memref<216x512xf32, #tpu.memory_space<vmem>>, vector<8x512xf32>
    tpu.vector_store %arg17[%c136_189, %c0_190], %293 {strides = array<i32>} : memref<216x512xf32, #tpu.memory_space<vmem>>, vector<8x512xf32>,
    %c402_i32 = arith.constant 402 : i32
    %295 = tpu.dynamic_rotate %191 by %c402_i32 dim 1 : vector<8x512xf32>, i32 -> vector<8x512xf32>
    %c18_191 = arith.constant 18 : index
    %c0_192 = arith.constant 0 : index
    %c0_193 = arith.constant 0 : index
    %296 = vector.load %arg3[%c18_191, %c0_192, %c0_193] : memref<27x1x512xf32, #tpu.memory_space<vmem>>, vector<1x1x512xf32>
    %297 = vector.shape_cast %296 : vector<1x1x512xf32> to vector<1x512xf32>
    %298 = vector.broadcast %297 : vector<1x512xf32> to vector<8x512xf32>
    %299 = arith.mulf %295, %298 : vector<8x512xf32>
    %c144_194 = arith.constant 144 : index
    %c0_195 = arith.constant 0 : index
    %300 = vector.load %arg17[%c144_194, %c0_195] : memref<216x512xf32, #tpu.memory_space<vmem>>, vector<8x512xf32>
    tpu.vector_store %arg17[%c144_194, %c0_195], %299 {strides = array<i32>} : memref<216x512xf32, #tpu.memory_space<vmem>>, vector<8x512xf32>,
    %c400_i32 = arith.constant 400 : i32
    %301 = tpu.dynamic_rotate %191 by %c400_i32 dim 1 : vector<8x512xf32>, i32 -> vector<8x512xf32>
    %c19_196 = arith.constant 19 : index
    %c0_197 = arith.constant 0 : index
    %c0_198 = arith.constant 0 : index
    %302 = vector.load %arg3[%c19_196, %c0_197, %c0_198] : memref<27x1x512xf32, #tpu.memory_space<vmem>>, vector<1x1x512xf32>
    %303 = vector.shape_cast %302 : vector<1x1x512xf32> to vector<1x512xf32>
    %304 = vector.broadcast %303 : vector<1x512xf32> to vector<8x512xf32>
    %305 = arith.mulf %301, %304 : vector<8x512xf32>
    %c152_199 = arith.constant 152 : index
    %c0_200 = arith.constant 0 : index
    %306 = vector.load %arg17[%c152_199, %c0_200] : memref<216x512xf32, #tpu.memory_space<vmem>>, vector<8x512xf32>
    tpu.vector_store %arg17[%c152_199, %c0_200], %305 {strides = array<i32>} : memref<216x512xf32, #tpu.memory_space<vmem>>, vector<8x512xf32>,
    %c398_i32 = arith.constant 398 : i32
    %307 = tpu.dynamic_rotate %191 by %c398_i32 dim 1 : vector<8x512xf32>, i32 -> vector<8x512xf32>
    %c20_201 = arith.constant 20 : index
    %c0_202 = arith.constant 0 : index
    %c0_203 = arith.constant 0 : index
    %308 = vector.load %arg3[%c20_201, %c0_202, %c0_203] : memref<27x1x512xf32, #tpu.memory_space<vmem>>, vector<1x1x512xf32>
    %309 = vector.shape_cast %308 : vector<1x1x512xf32> to vector<1x512xf32>
    %310 = vector.broadcast %309 : vector<1x512xf32> to vector<8x512xf32>
    %311 = arith.mulf %307, %310 : vector<8x512xf32>
    %c160_204 = arith.constant 160 : index
    %c0_205 = arith.constant 0 : index
    %312 = vector.load %arg17[%c160_204, %c0_205] : memref<216x512xf32, #tpu.memory_space<vmem>>, vector<8x512xf32>
    tpu.vector_store %arg17[%c160_204, %c0_205], %311 {strides = array<i32>} : memref<216x512xf32, #tpu.memory_space<vmem>>, vector<8x512xf32>,
    %c386_i32 = arith.constant 386 : i32
    %313 = tpu.dynamic_rotate %191 by %c386_i32 dim 1 : vector<8x512xf32>, i32 -> vector<8x512xf32>
    %c21_206 = arith.constant 21 : index
    %c0_207 = arith.constant 0 : index
    %c0_208 = arith.constant 0 : index
    %314 = vector.load %arg3[%c21_206, %c0_207, %c0_208] : memref<27x1x512xf32, #tpu.memory_space<vmem>>, vector<1x1x512xf32>
    %315 = vector.shape_cast %314 : vector<1x1x512xf32> to vector<1x512xf32>
    %316 = vector.broadcast %315 : vector<1x512xf32> to vector<8x512xf32>
    %317 = arith.mulf %313, %316 : vector<8x512xf32>
    %c168_209 = arith.constant 168 : index
    %c0_210 = arith.constant 0 : index
    %318 = vector.load %arg17[%c168_209, %c0_210] : memref<216x512xf32, #tpu.memory_space<vmem>>, vector<8x512xf32>
    tpu.vector_store %arg17[%c168_209, %c0_210], %317 {strides = array<i32>} : memref<216x512xf32, #tpu.memory_space<vmem>>, vector<8x512xf32>,
    %c384_i32 = arith.constant 384 : i32
    %319 = tpu.dynamic_rotate %191 by %c384_i32 dim 1 : vector<8x512xf32>, i32 -> vector<8x512xf32>
    %c22_211 = arith.constant 22 : index
    %c0_212 = arith.constant 0 : index
    %c0_213 = arith.constant 0 : index
    %320 = vector.load %arg3[%c22_211, %c0_212, %c0_213] : memref<27x1x512xf32, #tpu.memory_space<vmem>>, vector<1x1x512xf32>
    %321 = vector.shape_cast %320 : vector<1x1x512xf32> to vector<1x512xf32>
    %322 = vector.broadcast %321 : vector<1x512xf32> to vector<8x512xf32>
    %323 = arith.mulf %319, %322 : vector<8x512xf32>
    %c176_214 = arith.constant 176 : index
    %c0_215 = arith.constant 0 : index
    %324 = vector.load %arg17[%c176_214, %c0_215] : memref<216x512xf32, #tpu.memory_space<vmem>>, vector<8x512xf32>
    tpu.vector_store %arg17[%c176_214, %c0_215], %323 {strides = array<i32>} : memref<216x512xf32, #tpu.memory_space<vmem>>, vector<8x512xf32>,
    %c382_i32 = arith.constant 382 : i32
    %325 = tpu.dynamic_rotate %191 by %c382_i32 dim 1 : vector<8x512xf32>, i32 -> vector<8x512xf32>
    %c23_216 = arith.constant 23 : index
    %c0_217 = arith.constant 0 : index
    %c0_218 = arith.constant 0 : index
    %326 = vector.load %arg3[%c23_216, %c0_217, %c0_218] : memref<27x1x512xf32, #tpu.memory_space<vmem>>, vector<1x1x512xf32>
    %327 = vector.shape_cast %326 : vector<1x1x512xf32> to vector<1x512xf32>
    %328 = vector.broadcast %327 : vector<1x512xf32> to vector<8x512xf32>
    %329 = arith.mulf %325, %328 : vector<8x512xf32>
    %c184_219 = arith.constant 184 : index
    %c0_220 = arith.constant 0 : index
    %330 = vector.load %arg17[%c184_219, %c0_220] : memref<216x512xf32, #tpu.memory_space<vmem>>, vector<8x512xf32>
    tpu.vector_store %arg17[%c184_219, %c0_220], %329 {strides = array<i32>} : memref<216x512xf32, #tpu.memory_space<vmem>>, vector<8x512xf32>,
    %c370_i32 = arith.constant 370 : i32
    %331 = tpu.dynamic_rotate %191 by %c370_i32 dim 1 : vector<8x512xf32>, i32 -> vector<8x512xf32>
    %c24_221 = arith.constant 24 : index
    %c0_222 = arith.constant 0 : index
    %c0_223 = arith.constant 0 : index
    %332 = vector.load %arg3[%c24_221, %c0_222, %c0_223] : memref<27x1x512xf32, #tpu.memory_space<vmem>>, vector<1x1x512xf32>
    %333 = vector.shape_cast %332 : vector<1x1x512xf32> to vector<1x512xf32>
    %334 = vector.broadcast %333 : vector<1x512xf32> to vector<8x512xf32>
    %335 = arith.mulf %331, %334 : vector<8x512xf32>
    %c192_224 = arith.constant 192 : index
    %c0_225 = arith.constant 0 : index
    %336 = vector.load %arg17[%c192_224, %c0_225] : memref<216x512xf32, #tpu.memory_space<vmem>>, vector<8x512xf32>
    tpu.vector_store %arg17[%c192_224, %c0_225], %335 {strides = array<i32>} : memref<216x512xf32, #tpu.memory_space<vmem>>, vector<8x512xf32>,
    %c368_i32 = arith.constant 368 : i32
    %337 = tpu.dynamic_rotate %191 by %c368_i32 dim 1 : vector<8x512xf32>, i32 -> vector<8x512xf32>
    %c25_226 = arith.constant 25 : index
    %c0_227 = arith.constant 0 : index
    %c0_228 = arith.constant 0 : index
    %338 = vector.load %arg3[%c25_226, %c0_227, %c0_228] : memref<27x1x512xf32, #tpu.memory_space<vmem>>, vector<1x1x512xf32>
    %339 = vector.shape_cast %338 : vector<1x1x512xf32> to vector<1x512xf32>
    %340 = vector.broadcast %339 : vector<1x512xf32> to vector<8x512xf32>
    %341 = arith.mulf %337, %340 : vector<8x512xf32>
    %c200_229 = arith.constant 200 : index
    %c0_230 = arith.constant 0 : index
    %342 = vector.load %arg17[%c200_229, %c0_230] : memref<216x512xf32, #tpu.memory_space<vmem>>, vector<8x512xf32>
    tpu.vector_store %arg17[%c200_229, %c0_230], %341 {strides = array<i32>} : memref<216x512xf32, #tpu.memory_space<vmem>>, vector<8x512xf32>,
    %c366_i32 = arith.constant 366 : i32
    %343 = tpu.dynamic_rotate %191 by %c366_i32 dim 1 : vector<8x512xf32>, i32 -> vector<8x512xf32>
    %c26_231 = arith.constant 26 : index
    %c0_232 = arith.constant 0 : index
    %c0_233 = arith.constant 0 : index
    %344 = vector.load %arg3[%c26_231, %c0_232, %c0_233] : memref<27x1x512xf32, #tpu.memory_space<vmem>>, vector<1x1x512xf32>
    %345 = vector.shape_cast %344 : vector<1x1x512xf32> to vector<1x512xf32>
    %346 = vector.broadcast %345 : vector<1x512xf32> to vector<8x512xf32>
    %347 = arith.mulf %343, %346 : vector<8x512xf32>
    %c208_234 = arith.constant 208 : index
    %c0_235 = arith.constant 0 : index
    %348 = vector.load %arg17[%c208_234, %c0_235] : memref<216x512xf32, #tpu.memory_space<vmem>>, vector<8x512xf32>
    tpu.vector_store %arg17[%c208_234, %c0_235], %347 {strides = array<i32>} : memref<216x512xf32, #tpu.memory_space<vmem>>, vector<8x512xf32>,
    %c0_236 = arith.constant 0 : index
    %c0_237 = arith.constant 0 : index
    %349 = vector.load %arg8[%c0_236, %c0_237] : memref<4x216xf32, #tpu.memory_space<vmem>>, vector<4x216xf32>
    %c0_238 = arith.constant 0 : index
    %c0_239 = arith.constant 0 : index
    %350 = vector.load %arg17[%c0_238, %c0_239] : memref<216x512xf32, #tpu.memory_space<vmem>>, vector<216x512xf32>
    %cst_240 = arith.constant dense<0.000000e+00> : vector<4x512xf32>
    %351 = tpu.matmul %349, %350, %cst_240 {dimension_numbers = #tpu.dot_dimension_numbers<[1], [0], [0], [1], [0, 0, 1, 1], [], []>} : vector<4x216xf32>, vector<216x512xf32>, vector<4x512xf32> -> vector<4x512xf32>
    %c0_241 = arith.constant 0 : index
    %c0_242 = arith.constant 0 : index
    %352 = vector.load %arg9[%c0_241, %c0_242] : memref<4x1xf32, #tpu.memory_space<vmem>>, vector<4x1xf32>
    %353 = vector.broadcast %352 : vector<4x1xf32> to vector<4x512xf32>
    %354 = arith.addf %351, %353 : vector<4x512xf32>
    %c0_243 = arith.constant 0 : index
    %c0_244 = arith.constant 0 : index
    %355 = vector.load %arg10[%c0_243, %c0_244] : memref<8x4xf32, #tpu.memory_space<vmem>>, vector<8x4xf32>
    %cst_245 = arith.constant dense<0.000000e+00> : vector<8x512xf32>
    %356 = tpu.matmul %355, %354, %cst_245 {dimension_numbers = #tpu.dot_dimension_numbers<[1], [0], [0], [1], [0, 0, 1, 1], [], []>} : vector<8x4xf32>, vector<4x512xf32>, vector<8x512xf32> -> vector<8x512xf32>
    %c0_246 = arith.constant 0 : index
    %c0_247 = arith.constant 0 : index
    %357 = vector.load %arg11[%c0_246, %c0_247] : memref<8x1xf32, #tpu.memory_space<vmem>>, vector<8x1xf32>
    %358 = vector.broadcast %357 : vector<8x1xf32> to vector<8x512xf32>
    %359 = arith.addf %356, %358 : vector<8x512xf32>
    %360 = arith.negf %359 : vector<8x512xf32>
    %361 = math.exp %360 : vector<8x512xf32>
    %cst_248 = arith.constant 1.000000e+00 : f32
    %362 = vector.broadcast %cst_248 : f32 to vector<8x512xf32>
    %363 = arith.addf %362, %361 : vector<8x512xf32>
    %364 = arith.divf %362, %363 : vector<8x512xf32>
    %365 = arith.mulf %191, %364 : vector<8x512xf32>
    %c0_249 = arith.constant 0 : index
    %c0_250 = arith.constant 0 : index
    %366 = vector.load %arg12[%c0_249, %c0_250] : memref<4x8xf32, #tpu.memory_space<vmem>>, vector<4x8xf32>
    %cst_251 = arith.constant dense<0.000000e+00> : vector<4x512xf32>
    %367 = tpu.matmul %366, %365, %cst_251 {dimension_numbers = #tpu.dot_dimension_numbers<[1], [0], [0], [1], [0, 0, 1, 1], [], []>} : vector<4x8xf32>, vector<8x512xf32>, vector<4x512xf32> -> vector<4x512xf32>
    %c0_252 = arith.constant 0 : index
    %c0_253 = arith.constant 0 : index
    %368 = vector.load %arg13[%c0_252, %c0_253] : memref<4x1xf32, #tpu.memory_space<vmem>>, vector<4x1xf32>
    %369 = vector.broadcast %368 : vector<4x1xf32> to vector<4x512xf32>
    %370 = arith.addf %367, %369 : vector<4x512xf32>
    %c0_254 = arith.constant 0 : index
    %c0_255 = arith.constant 0 : index
    %371 = vector.load %arg14[%c0_254, %c0_255] : memref<4x4xf32, #tpu.memory_space<vmem>>, vector<4x4xf32>
    %cst_256 = arith.constant dense<0.000000e+00> : vector<4x512xf32>
    %372 = tpu.matmul %371, %1, %cst_256 {dimension_numbers = #tpu.dot_dimension_numbers<[1], [0], [0], [1], [0, 0, 1, 1], [], []>} : vector<4x4xf32>, vector<4x512xf32>, vector<4x512xf32> -> vector<4x512xf32>
    %373 = arith.addf %370, %372 : vector<4x512xf32>
    %c0_257 = arith.constant 0 : index
    %c0_258 = arith.constant 0 : index
    %374 = vector.load %arg15[%c0_257, %c0_258] : memref<4x1xf32, #tpu.memory_space<vmem>>, vector<4x1xf32>
    %375 = vector.broadcast %374 : vector<4x1xf32> to vector<4x512xf32>
    %376 = arith.addf %373, %375 : vector<4x512xf32>
    %c0_259 = arith.constant 0 : index
    %c0_260 = arith.constant 0 : index
    %c0_261 = arith.constant 0 : index
    %377 = vector.load %arg16[%c0_259, %c0_260, %c0_261] : memref<1x4x512xf32, #tpu.memory_space<vmem>>, vector<1x4x512xf32>
    %378 = vector.shape_cast %377 : vector<1x4x512xf32> to vector<4x512xf32>
    %379 = vector.shape_cast %376 : vector<4x512xf32> to vector<1x4x512xf32>
    tpu.vector_store %arg16[%c0_259, %c0_260, %c0_261], %379 {strides = array<i32>} : memref<1x4x512xf32, #tpu.memory_space<vmem>>, vector<1x4x512xf32>,
    return
  }
  func.func @transform_0(%arg0: i32) -> (i32, i32, i32) {
    %c0_i32 = arith.constant 0 : i32
    %c0_i32_0 = arith.constant 0 : i32
    %c0_i32_1 = arith.constant 0 : i32
    return %arg0, %c0_i32, %c0_i32_0 : i32, i32, i32
  }
  func.func @transform_1(%arg0: i32) -> (i32, i32, i32) {
    %c0_i32 = arith.constant 0 : i32
    %c0_i32_0 = arith.constant 0 : i32
    %c0_i32_1 = arith.constant 0 : i32
    %c0_i32_2 = arith.constant 0 : i32
    return %c0_i32, %c0_i32_0, %c0_i32_1 : i32, i32, i32
  }
  func.func @transform_2(%arg0: i32) -> (i32, i32, i32) {
    %c0_i32 = arith.constant 0 : i32
    %c0_i32_0 = arith.constant 0 : i32
    %c0_i32_1 = arith.constant 0 : i32
    %c0_i32_2 = arith.constant 0 : i32
    return %c0_i32, %c0_i32_0, %c0_i32_1 : i32, i32, i32
  }
  func.func @transform_3(%arg0: i32) -> (i32, i32) {
    %c0_i32 = arith.constant 0 : i32
    %c0_i32_0 = arith.constant 0 : i32
    %c0_i32_1 = arith.constant 0 : i32
    return %c0_i32, %c0_i32_0 : i32, i32
  }
  func.func @transform_4(%arg0: i32) -> (i32, i32) {
    %c0_i32 = arith.constant 0 : i32
    %c0_i32_0 = arith.constant 0 : i32
    %c0_i32_1 = arith.constant 0 : i32
    return %c0_i32, %c0_i32_0 : i32, i32
  }
  func.func @transform_5(%arg0: i32) -> (i32, i32) {
    %c0_i32 = arith.constant 0 : i32
    %c0_i32_0 = arith.constant 0 : i32
    %c0_i32_1 = arith.constant 0 : i32
    return %c0_i32, %c0_i32_0 : i32, i32
  }
  func.func @transform_6(%arg0: i32) -> (i32, i32) {
    %c0_i32 = arith.constant 0 : i32
    %c0_i32_0 = arith.constant 0 : i32
    %c0_i32_1 = arith.constant 0 : i32
    return %c0_i32, %c0_i32_0 : i32, i32
  }
  func.func @transform_7(%arg0: i32) -> (i32, i32) {
    %c0_i32 = arith.constant 0 : i32
    %c0_i32_0 = arith.constant 0 : i32
    %c0_i32_1 = arith.constant 0 : i32
    return %c0_i32, %c0_i32_0 : i32, i32
  }
  func.func @transform_8(%arg0: i32) -> (i32, i32) {
    %c0_i32 = arith.constant 0 : i32
    %c0_i32_0 = arith.constant 0 : i32
    %c0_i32_1 = arith.constant 0 : i32
    return %c0_i32, %c0_i32_0 : i32, i32
  }
  func.func @transform_9(%arg0: i32) -> (i32, i32) {
    %c0_i32 = arith.constant 0 : i32
    %c0_i32_0 = arith.constant 0 : i32
    %c0_i32_1 = arith.constant 0 : i32
    return %c0_i32, %c0_i32_0 : i32, i32
  }
  func.func @transform_10(%arg0: i32) -> (i32, i32) {
    %c0_i32 = arith.constant 0 : i32
    %c0_i32_0 = arith.constant 0 : i32
    %c0_i32_1 = arith.constant 0 : i32
    return %c0_i32, %c0_i32_0 : i32, i32
  }
  func.func @transform_11(%arg0: i32) -> (i32, i32) {
    %c0_i32 = arith.constant 0 : i32
    %c0_i32_0 = arith.constant 0 : i32
    %c0_i32_1 = arith.constant 0 : i32
    return %c0_i32, %c0_i32_0 : i32, i32
  }
  func.func @transform_12(%arg0: i32) -> (i32, i32) {
    %c0_i32 = arith.constant 0 : i32
    %c0_i32_0 = arith.constant 0 : i32
    %c0_i32_1 = arith.constant 0 : i32
    return %c0_i32, %c0_i32_0 : i32, i32
  }
  func.func @transform_13(%arg0: i32) -> (i32, i32) {
    %c0_i32 = arith.constant 0 : i32
    %c0_i32_0 = arith.constant 0 : i32
    %c0_i32_1 = arith.constant 0 : i32
    return %c0_i32, %c0_i32_0 : i32, i32
  }
  func.func @transform_14(%arg0: i32) -> (i32, i32) {
    %c0_i32 = arith.constant 0 : i32
    %c0_i32_0 = arith.constant 0 : i32
    %c0_i32_1 = arith.constant 0 : i32
    return %c0_i32, %c0_i32_0 : i32, i32
  }
  func.func @transform_15(%arg0: i32) -> (i32, i32, i32) {
    %c0_i32 = arith.constant 0 : i32
    %c0_i32_0 = arith.constant 0 : i32
    %c0_i32_1 = arith.constant 0 : i32
    return %arg0, %c0_i32, %c0_i32_0 : i32, i32, i32
  }
}

</mosaic_0001>

<bundles_post_ra>
// kernel: recombination_block.1
= control target key start
LH: loop header
LB: loop body
LE: loop exit
PB: predicated region body
PF: predicated region fallthrough
CT: control target
= control target key end

     0   :  { %s4218_s18 = smov 0   ;;  %s5636_s0 = inlined_call_operand.vmem [shape: f32[2,4,512], index: 0, kind: input, shape index: {}]   ;;  %s5637_s1 = inlined_call_operand.vmem [shape: f32[27,1,512], index: 1, kind: input, shape index: {}]   ;;  %s5638_s2 = inlined_call_operand.vmem [shape: f32[27,1,512], index: 2, kind: input, shape index: {}]   ;;  %s5639_s3 = inlined_call_operand.vmem [shape: f32[8,4], index: 3, kind: input, shape index: {}]   ;;  %s5640_s4 = inlined_call_operand.vmem [shape: f32[8,1], index: 4, kind: input, shape index: {}]   ;;  %s5641_s5 = inlined_call_operand.vmem [shape: f32[8,216], index: 5, kind: input, shape index: {}]   ;;  %s5642_s6 = inlined_call_operand.vmem [shape: f32[8,1], index: 6, kind: input, shape index: {}]   ;;  %s5643_s7 = inlined_call_operand.vmem [shape: f32[4,216], index: 7, kind: input, shape index: {}]   ;;  %s5644_s8 = inlined_call_operand.vmem [shape: f32[4,1], index: 8, kind: input, shape index: {}]   ;;  %s5645_s9 = inlined_call_operand.vmem [shape: f32[8,4], index: 9, kind: input, shape index: {}]   ;;  %s5646_s10 = inlined_call_operand.vmem [shape: f32[8,1], index: 10, kind: input, shape index: {}]   ;;  %s5647_s11 = inlined_call_operand.vmem [shape: f32[4,8], index: 11, kind: input, shape index: {}]   ;;  %s5648_s12 = inlined_call_operand.vmem [shape: f32[4,1], index: 12, kind: input, shape index: {}]   ;;  %s5649_s13 = inlined_call_operand.vmem [shape: f32[4,4], index: 13, kind: input, shape index: {}]   ;;  %s5650_s14 = inlined_call_operand.vmem [shape: f32[4,1], index: 14, kind: input, shape index: {}]   ;;  %s5651_s15 = inlined_call_operand.vmem [shape: f32[2,4,512], index: 15, kind: output, shape index: {}]  }
   0x1 LB: > { %s3736_s19 = sadd.s32 4294967295, %s4109_s18   ;;  %p3740_p0 = scmp.ge.s32.totalorder %s4109_s18, 1  ;;  %s4109_s18 = sphi %s4218_s18, %s25_s18  }
   0x2   : > { %p437_p1 = scmp.lt.s32.totalorder %s4109_s18, 3 }
   0x4   : > { %p438_p2 = pnand %p3740_p0, %p437_p1 }
   0x6   : > { %441 = sbr.rel (%p438_p2) target bundleno = 1981 (0x7bd), region = 80 }
   0xd   : > { %p485_p3 = scmp.lt.s32.totalorder %s3736_s19, 1  ;;  %v5653_v0 = vmov 0.0   ;;  %v498_v1 = vld [vmem:[%s5640_s4] sm:$0xff]  ;;  %v4112_v2 = vmov 0   ;;  %vm512_vm0 = vcmask 1043456   ;;  %vm508_vm1 = vcmask 31744  }
   0xe   : > { %585 = vmatprep.mubr.f32.mxu0 %v5653_v0  ;;  %656 = vmatprep.mubr.f32.mxu1 %v5653_v0  ;;  %v497_v7 = vld [vmem:[%s5639_s3] sm:$0xff]  ;;  %s4113_s28 = smov 72   ;;  %s4114_s29 = smov 73   ;;  %v706_v51 = vlaneseq  ;;  %v3767_v61 = vld [vmem:[%s5637_s1 + $0x48] sm:$0xf]  ;;  %vm1846_vm6 = vcmask 719872  }
   0xf   : > { %s5778_s19 = smov (!%p485_p3, %s3736_s19), 1  ;;  %4078 = vset.pattern.permute.xlu0 %v4112_v2  ;;  %4079 = vset.pattern.permute.xlu1 %v4112_v2  ;;  %s4115_s30 = smov 71   ;;  %v4347_v59 = vld [vmem:[%s5637_s1] sm:$0xf]  ;;  %v3751_v62 = vld [vmem:[%s5637_s1 + $0x4] sm:$0xf] }
  0x10   : > { %501 = vperm.xlu0 %4078, %v498_v1   ;;  %s5652_s22 = sshll.u32 %s5778_s19, 4  ;;  %s4116_s16 = smov 65   ;;  %v716_v54 = vshrl.u32 %v706_v51, 7  ;;  %v4338_v55 = vand.u32 127, %v706_v51  ;;  %v3768_v63 = vld [vmem:[%s5637_s1 + $0x4c] sm:$0xf] }
  0x11   : > { %s4239_s25 = scalar_lea.vmem %s5636_s0, %s5652_s22  ;;  %s4117_s17 = smov 64  }
  0x12   : > { %v495_v3 = vld [vmem:[%s4239_s25] sm:$0xff]  ;;  %v496_v4 = vld [vmem:[%s4239_s25 + $0x8] sm:$0xff]  ;;  %s4118_s20 = smov 63   ;;  %s4119_s21 = smov 57   ;;  %v4342_v58 = vsub.s32 1, %v716_v54  ;;  %v4349_v60 = vsub.s32 0, %v716_v54 }
  0x13   : > { %v4243_v5 = vcombine.high %v495_v3, %v495_v3  ;;  %v4245_v6 = vcombine.high %v496_v4, %v496_v4  ;;  %s4120_s23 = smov 56   ;;  %s4121_s24 = smov 55   ;;  %vm708_vm2 = vcmp.lt.s32.totalorder %v4338_v55, 73  ;;  %vm751_vm3 = vcmp.lt.s32.totalorder %v4338_v55, 72 }
  0x14   : > { %s4122_s26 = smov 9   ;;  %s4123_s27 = smov 8   ;;  %vm795_vm4 = vcmp.lt.s32.totalorder %v4338_v55, 71  ;;  %vm839_vm5 = vcmp.lt.s32.totalorder %v4338_v55, 65  ;;  %vm883_vm7 = vcmp.lt.s32.totalorder %v4338_v55, 64  ;;  %vm927_vm8 = vcmp.lt.s32.totalorder %v4338_v55, 63 }
  0x15   : > { %5686 = vst [vmem:[#allocation3_spill] sm:$0xff] %v4243_v5  ;;  %5687 = vst [vmem:[#allocation4_spill] sm:$0xff] %v4245_v6  ;;  %3745 = vmatprep.subr.msk.mxu0 %vm512_vm0, %v4243_v5  ;;  %3748 = vmatprep.subr.msk.mxu1 %vm512_vm0, %v4245_v6  ;;  %vm971_vm9 = vcmp.lt.s32.totalorder %v4338_v55, 57  ;;  %vm1015_vm10 = vcmp.lt.s32.totalorder %v4338_v55, 56  ;;  %vm1059_vm11 = vcmp.lt.s32.totalorder %v4338_v55, 55  ;;  %vm1103_vm12 = vcmp.lt.s32.totalorder %v4338_v55, 9 }
  0x16   : > { %3746 = vmatpush1.msk.msra.mxu0 %vm512_vm0, %v495_v3  ;;  %3749 = vmatpush1.msk.msra.mxu1 %vm512_vm0, %v496_v4  ;;  %v722_v3 = vrot.slane %v4347_v59, %v4342_v58  ;;  %v4367_v4 = vsub.s32 3, %v716_v54  ;;  %vm1147_vm13 = vcmp.lt.s32.totalorder %v4338_v55, 8  ;;  %vm1191_vm14 = vcmp.lt.s32.totalorder %v4338_v55, 7 }
  0x17   : > { %3747 = vmatmul.mubr.msk.f32.vlgmr.msra.gmra.mrb[0].mxu0 %vm508_vm1, %v497_v7  ;;  %3750 = vmatmul.mubr.msk.f32.vlgmr.msra.gmra.mrb[0].mxu1 %vm508_vm1, %v497_v7  ;;  %v1457_v7 = vrot.slane %v3767_v61, %v4349_v60  ;;  %vm1235_vm15 = vcmp.lt.s32.totalorder %v4338_v55, 1 }
  0x8f   : > { %v502_v8 = vpop.permute.xlu0 %501 }
  0xea   : > { %v587_v9 = vpop.f32.mrb[0].mxu0  ;;  %v658_v10 = vpop.f32.mrb[0].mxu1 }
  0xeb   : > { %v588_v11 = vadd.f32 %v587_v9, %v502_v8  ;;  %v589_v12 = vpop.f32.mrb[1].mxu0  ;;  %v660_v13 = vpop.f32.mrb[1].mxu1  ;;  %v659_v15 = vadd.f32 %v658_v10, %v502_v8  ;;  %v1488_v9 = vrot.slane %v3768_v63, %v4349_v60 }
  0xec   : > { %v590_v14 = vadd.f32 %v589_v12, %v502_v8  ;;  %v661_v17 = vadd.f32 %v660_v13, %v502_v8  ;;  %v766_v8 = vrot.slane %v3751_v62, %v4342_v58  ;;  %v1461_v12 = vrot.slane %v3767_v61, %v4342_v58 }
  0xee   : > { %v663_v16 = vadd.f32 %v590_v14, %v588_v11 }
  0xf0   : > { %v664_v18 = vadd.f32 %v663_v16, %v659_v15  ;;  %v730_v16 = vrot.slane %v4347_v59, %v4367_v4 }
  0xf2   : > { %v665_v19 = vadd.f32 %v664_v18, %v661_v17  ;;  %v1492_v18 = vrot.slane %v3768_v63, %v4342_v58 }
  0xf4   : > { %666 = vadd.xlane.f32.xlu0 %v665_v19 }
 0x181   : > { %v667_v20 = vpop.xlane.xlu0 %666 }
 0x182   : > { %v669_v21 = vmul.f32 0.001953125, %v667_v20 }
 0x184   : > { %v670_v22 = vsub.f32 %v588_v11, %v669_v21  ;;  %v671_v23 = vsub.f32 %v590_v14, %v669_v21  ;;  %v672_v24 = vsub.f32 %v659_v15, %v669_v21  ;;  %v673_v25 = vsub.f32 %v661_v17, %v669_v21 }
 0x185   : > { %v4377_v11 = vsub.s32 2, %v716_v54  ;;  %v718_v15 = vrot.slane %v4347_v59, %v4349_v60 }
 0x186   : > { %v674_v26 = vmul.f32 %v670_v22, %v670_v22  ;;  %v675_v27 = vmul.f32 %v671_v23, %v671_v23  ;;  %v676_v28 = vmul.f32 %v672_v24, %v672_v24  ;;  %v677_v30 = vmul.f32 %v673_v25, %v673_v25 }
 0x188   : > { %v678_v29 = vadd.f32 %v675_v27, %v674_v26  ;;  %v770_v26 = vrot.slane %v3751_v62, %v4377_v11 }
 0x18a   : > { %v679_v31 = vadd.f32 %v678_v29, %v676_v28 }
 0x18c   : > { %v680_v32 = vadd.f32 %v679_v31, %v677_v30  ;;  %v762_v31 = vrot.slane %v3751_v62, %v4349_v60 }
 0x18e   : > { %681 = vadd.xlane.f32.xlu1 %v680_v32  ;;  %v774_v32 = vrot.slane %v3751_v62, %v4367_v4 }
 0x21b   : > { %v682_v33 = vpop.xlane.xlu1 %681 }
 0x21c   : > { %v683_v34 = vmul.f32 0.001953125, %v682_v33 }
 0x21e   : > { %v684_v35 = vadd.f32 1e-05, %v683_v34 }
 0x220   : > { %4083 = vrsqrt.f32 %v684_v35 }
 0x22a   : > { %v4084_v36 = vpop.eup %4083 }
 0x22b   : > { %v686_v37 = vmul.f32 %v4084_v36, %v670_v22  ;;  %v687_v38 = vmul.f32 %v4084_v36, %v671_v23  ;;  %v689_v39 = vmul.f32 %v4084_v36, %v673_v25  ;;  %v688_v42 = vmul.f32 %v4084_v36, %v672_v24 }
 0x22c   : > { %v1465_v24 = vrot.slane %v3767_v61, %v4377_v11  ;;  %v1469_v25 = vrot.slane %v3767_v61, %v4367_v4  ;;  %v1496_v36 = vrot.slane %v3768_v63, %v4377_v11 }
 0x22d   : > { %v690_v40 = vmax.f32 %v686_v37, 0.0  ;;  %v691_v41 = vmax.f32 %v687_v38, 0.0  ;;  %v693_v43 = vmax.f32 %v689_v39, 0.0  ;;  %v692_v46 = vmax.f32 %v688_v42, 0.0 }
 0x22e   : > { %v1500_v39 = vrot.slane %v3768_v63, %v4367_v4 }
 0x22f   : > { %v4258_v44 = vmin.f32 %v690_v40, 6.0  ;;  %v4260_v45 = vmin.f32 %v691_v41, 6.0  ;;  %v4264_v47 = vmin.f32 %v693_v43, 6.0  ;;  %v4268_v48 = vmin.f32 %v692_v46, 6.0 }
 0x230   : > { %v726_v40 = vrot.slane %v4347_v59, %v4377_v11 }
 0x231   : > { %745 = vrot.lane.b32.xlu0 %v4260_v45, %s4113_s28  ;;  %698 = vrot.lane.b32.xlu1 %v4258_v44, %s4114_s29 }
 0x235   : > { %793 = vrot.lane.b32.xlu0 %v4264_v47, %s4115_s30  ;;  %700 = vrot.lane.b32.xlu1 %v4260_v45, %s4114_s29 }
 0x239   : > { %833 = vrot.lane.b32.xlu0 %v4260_v45, %s4116_s16  ;;  %702 = vrot.lane.b32.xlu1 %v4268_v48, %s4114_s29 }
 0x23d   : > { %837 = vrot.lane.b32.xlu0 %v4264_v47, %s4116_s16  ;;  %704 = vrot.lane.b32.xlu1 %v4264_v47, %s4114_s29  ;;  %s4125_s29 = smov 1  }
 0x241   : > { %877 = vrot.lane.b32.xlu0 %v4260_v45, %s4117_s17  ;;  %743 = vrot.lane.b32.xlu1 %v4258_v44, %s4113_s28 }
 0x245   : > { %881 = vrot.lane.b32.xlu0 %v4264_v47, %s4117_s17  ;;  %747 = vrot.lane.b32.xlu1 %v4268_v48, %s4113_s28 }
 0x249   : > { %921 = vrot.lane.b32.xlu0 %v4260_v45, %s4118_s20  ;;  %749 = vrot.lane.b32.xlu1 %v4264_v47, %s4113_s28  ;;  %s4124_s28 = smov 7  }
 0x24d   : > { %925 = vrot.lane.b32.xlu0 %v4264_v47, %s4118_s20  ;;  %787 = vrot.lane.b32.xlu1 %v4258_v44, %s4115_s30 }
 0x251   : > { %965 = vrot.lane.b32.xlu0 %v4260_v45, %s4119_s21  ;;  %789 = vrot.lane.b32.xlu1 %v4260_v45, %s4115_s30 }
 0x255   : > { %969 = vrot.lane.b32.xlu0 %v4264_v47, %s4119_s21  ;;  %791 = vrot.lane.b32.xlu1 %v4268_v48, %s4115_s30  ;;  %s4126_s30 = smov 127  }
 0x259   : > { %1009 = vrot.lane.b32.xlu0 %v4260_v45, %s4120_s23  ;;  %831 = vrot.lane.b32.xlu1 %v4258_v44, %s4116_s16 }
 0x25d   : > { %1013 = vrot.lane.b32.xlu0 %v4264_v47, %s4120_s23  ;;  %835 = vrot.lane.b32.xlu1 %v4268_v48, %s4116_s16  ;;  %s4127_s16 = smov 121  }
 0x261   : > { %1053 = vrot.lane.b32.xlu0 %v4260_v45, %s4121_s24  ;;  %875 = vrot.lane.b32.xlu1 %v4258_v44, %s4117_s17 }
 0x265   : > { %1057 = vrot.lane.b32.xlu0 %v4264_v47, %s4121_s24  ;;  %879 = vrot.lane.b32.xlu1 %v4268_v48, %s4117_s17  ;;  %s4128_s17 = smov 120  }
 0x269   : > { %1097 = vrot.lane.b32.xlu0 %v4260_v45, %s4122_s26  ;;  %919 = vrot.lane.b32.xlu1 %v4258_v44, %s4118_s20 }
 0x26d   : > { %1101 = vrot.lane.b32.xlu0 %v4264_v47, %s4122_s26  ;;  %923 = vrot.lane.b32.xlu1 %v4268_v48, %s4118_s20  ;;  %s4129_s20 = smov 119  }
 0x271   : > { %1141 = vrot.lane.b32.xlu0 %v4260_v45, %s4123_s27  ;;  %963 = vrot.lane.b32.xlu1 %v4258_v44, %s4119_s21 }
 0x275   : > { %1145 = vrot.lane.b32.xlu0 %v4264_v47, %s4123_s27  ;;  %967 = vrot.lane.b32.xlu1 %v4268_v48, %s4119_s21  ;;  %s4132_s21 = smov 14  }
 0x279   : > { %1185 = vrot.lane.b32.xlu0 %v4260_v45, %s4124_s28  ;;  %1007 = vrot.lane.b32.xlu1 %v4258_v44, %s4120_s23 }
 0x27d   : > { %1189 = vrot.lane.b32.xlu0 %v4264_v47, %s4124_s28  ;;  %1011 = vrot.lane.b32.xlu1 %v4268_v48, %s4120_s23  ;;  %s4133_s23 = smov 2  }
 0x281   : > { %1229 = vrot.lane.b32.xlu0 %v4260_v45, %s4125_s29  ;;  %1051 = vrot.lane.b32.xlu1 %v4258_v44, %s4121_s24 }
 0x285   : > { %1233 = vrot.lane.b32.xlu0 %v4264_v47, %s4125_s29  ;;  %1055 = vrot.lane.b32.xlu1 %v4268_v48, %s4121_s24  ;;  %s4134_s24 = smov 126  }
 0x289   : > { %1277 = vrot.lane.b32.xlu0 %v4260_v45, %s4126_s30  ;;  %1095 = vrot.lane.b32.xlu1 %v4258_v44, %s4122_s26 }
 0x28d   : > { %1281 = vrot.lane.b32.xlu0 %v4264_v47, %s4126_s30  ;;  %1099 = vrot.lane.b32.xlu1 %v4268_v48, %s4122_s26  ;;  %s4135_s26 = smov 114  }
 0x291   : > { %1321 = vrot.lane.b32.xlu0 %v4260_v45, %s4127_s16  ;;  %1139 = vrot.lane.b32.xlu1 %v4258_v44, %s4123_s27 }
 0x295   : > { %1325 = vrot.lane.b32.xlu0 %v4264_v47, %s4127_s16  ;;  %1143 = vrot.lane.b32.xlu1 %v4268_v48, %s4123_s27  ;;  %s4137_s27 = smov 110  }
 0x299   : > { %1365 = vrot.lane.b32.xlu0 %v4260_v45, %s4128_s17  ;;  %1183 = vrot.lane.b32.xlu1 %v4258_v44, %s4124_s28 }
 0x29d   : > { %1369 = vrot.lane.b32.xlu0 %v4264_v47, %s4128_s17  ;;  %1187 = vrot.lane.b32.xlu1 %v4268_v48, %s4124_s28 }
 0x2a1   : > { %1409 = vrot.lane.b32.xlu0 %v4260_v45, %s4129_s20  ;;  %1227 = vrot.lane.b32.xlu1 %v4258_v44, %s4125_s29 }
 0x2a3   : > { %v746_v49 = vpop.permute.xlu0 %745  ;;  %v699_v50 = vpop.permute.xlu1 %698 }
 0x2a5   : > { %1413 = vrot.lane.b32.xlu0 %v4264_v47, %s4129_s20  ;;  %1231 = vrot.lane.b32.xlu1 %v4268_v48, %s4125_s29 }
 0x2a7   : > { %v4334_v52 = vpop.permute.xlu0 %793  ;;  %v701_v53 = vpop.permute.xlu1 %700 }
 0x2a8   : > { %v711_v10 = vsel %vm708_vm2, %v699_v50, %v701_v53 }
 0x2a9   : > { %1275 = vrot.lane.b32.xlu1 %v4258_v44, %s4126_s30  ;;  %v736_v19 = vmul.f32 %v722_v3, %v711_v10  ;;  %v4389_v20 = vmul.f32 %v1457_v7, %v711_v10 }
 0x2ab   : > { %v4340_v56 = vpop.permute.xlu0 %833  ;;  %v703_v57 = vpop.permute.xlu1 %702 }
 0x2ac   : > { %v710_v23 = vsel %vm708_vm2, %v701_v53, %v703_v57 }
 0x2ad   : > { %1279 = vrot.lane.b32.xlu1 %v4268_v48, %s4126_s30  ;;  %v4413_v37 = vmul.f32 %v1461_v12, %v710_v23 }
 0x2af   : > { %v4363_v1 = vpop.permute.xlu0 %837  ;;  %v705_v2 = vpop.permute.xlu1 %704 }
 0x2b0   : > { %v709_v33 = vsel %vm708_vm2, %v703_v57, %v705_v2  ;;  %v712_v34 = vsel %vm708_vm2, %v705_v2, %v699_v50  ;;  %v737_v2 = vmul.f32 %v726_v40, %v710_v23  ;;  %vm1283_vm2 = vcmp.lt.s32.totalorder %v4338_v55, 127 }
 0x2b1   : > { %1319 = vrot.lane.b32.xlu1 %v4258_v44, %s4127_s16  ;;  %v735_v41 = vmul.f32 %v718_v15, %v712_v34  ;;  %v738_v42 = vmul.f32 %v730_v16, %v709_v33  ;;  %v4422_v43 = vmul.f32 %v1465_v24, %v709_v33  ;;  %v4428_v51 = vmul.f32 %v1469_v25, %v712_v34  ;;  %v3752_v15 = vld [vmem:[%s5637_s1 + $0x8] sm:$0xf]  ;;  %v3769_v16 = vld [vmem:[%s5637_s1 + $0x50] sm:$0xf]  ;;  %v3770_v25 = vld [vmem:[%s5637_s1 + $0x54] sm:$0xf] }
 0x2b2   : > { %v1531_v23 = vrot.slane %v3769_v16, %v4367_v4  ;;  %v810_v24 = vrot.slane %v3752_v15, %v4342_v58 }
 0x2b3   : > { %v4380_v13 = vpop.permute.xlu0 %877  ;;  %v744_v14 = vpop.permute.xlu1 %743 }
 0x2b4   : > { %v754_v17 = vsel %vm751_vm3, %v744_v14, %v746_v49 }
 0x2b5   : > { %v780_v21 = vmul.f32 %v766_v8, %v754_v17  ;;  %v4391_v22 = vmul.f32 %v1488_v9, %v754_v17  ;;  %1323 = vrot.lane.b32.xlu1 %v4268_v48, %s4127_s16  ;;  %s4130_s16 = smov 18  }
 0x2b7   : > { %v4402_v28 = vpop.permute.xlu0 %881  ;;  %v748_v29 = vpop.permute.xlu1 %747  ;;  %v3827_v30 = vpack.c.bf16 %v780_v21, %v736_v19  ;;  %v3753_v19 = vld [vmem:[%s5637_s1 + $0xc] sm:$0xf]  ;;  %v806_v21 = vrot.slane %v3752_v15, %v4349_v60 }
 0x2b8   : > { %v753_v35 = vsel %vm751_vm3, %v746_v49, %v748_v29  ;;  %v854_v40 = vrot.slane %v3753_v19, %v4342_v58 }
 0x2b9   : > { %v4415_v38 = vmul.f32 %v1492_v18, %v753_v35  ;;  %1363 = vrot.lane.b32.xlu1 %v4258_v44, %s4128_s17  ;;  %3828 = vmatprep.subr.bf16.mxu0 %v3827_v30  ;;  %v781_v53 = vmul.f32 %v770_v26, %v753_v35  ;;  %v1519_v26 = vrot.slane %v3769_v16, %v4349_v60 }
 0x2ba   : > { %v814_v30 = vrot.slane %v3752_v15, %v4377_v11  ;;  %v1527_v35 = vrot.slane %v3769_v16, %v4377_v11 }
 0x2bb   : > { %v4424_v46 = vpop.permute.xlu0 %921  ;;  %v750_v49 = vpop.permute.xlu1 %749 }
 0x2bc   : > { %v752_v54 = vsel %vm751_vm3, %v748_v29, %v750_v49  ;;  %v755_v57 = vsel %vm751_vm3, %v750_v49, %v744_v14  ;;  %v3881_v14 = vpack.c.bf16 %v781_v53, %v737_v2  ;;  %v858_v49 = vrot.slane %v3753_v19, %v4377_v11 }
 0x2bd   : > { %v779_v59 = vmul.f32 %v762_v31, %v755_v57  ;;  %v782_v61 = vmul.f32 %v774_v32, %v752_v54  ;;  %v4434_v62 = vmul.f32 %v1496_v36, %v752_v54  ;;  %v4436_v63 = vmul.f32 %v1500_v39, %v755_v57  ;;  %1367 = vrot.lane.b32.xlu1 %v4268_v48, %s4128_s17  ;;  %s4131_s17 = smov 16  }
 0x2be   : > { %v818_v31 = vrot.slane %v3752_v15, %v4367_v4  ;;  %v1523_v32 = vrot.slane %v3769_v16, %v4342_v58  ;;  %v850_v36 = vrot.slane %v3753_v19, %v4349_v60  ;;  %v862_v53 = vrot.slane %v3753_v19, %v4367_v4 }
 0x2bf   : > { %v3829_v3 = vpack.c.bf16 %v779_v59, %v735_v41  ;;  %v4442_v8 = vpop.permute.xlu0 %925  ;;  %v788_v9 = vpop.permute.xlu1 %787  ;;  %v3879_v10 = vpack.c.bf16 %v782_v61, %v738_v42  ;;  %v1550_v41 = vrot.slane %v3770_v25, %v4349_v60  ;;  %v1562_v42 = vrot.slane %v3770_v25, %v4367_v4 }
 0x2c0   : > { %v799_v34 = vsel %vm795_vm4, %v4334_v52, %v788_v9  ;;  %v1554_v54 = vrot.slane %v3770_v25, %v4342_v58  ;;  %v1558_v57 = vrot.slane %v3770_v25, %v4377_v11  ;;  %vm1327_vm3 = vcmp.lt.s32.totalorder %v4338_v55, 121 }
 0x2c1   : > { %1407 = vrot.lane.b32.xlu1 %v4258_v44, %s4129_s20  ;;  %3830 = vmatpush1.bf16.msra.mxu0 %v3829_v3  ;;  %v823_v59 = vmul.f32 %v806_v21, %v799_v34  ;;  %v4489_v61 = vmul.f32 %v1531_v23, %v799_v34 }
 0x2c2   : > { %3880 = vmatprep.subr.bf16.mxu1 %v3879_v10 }
 0x2c3   : > { %3882 = vmatpush1.bf16.msra.mxu1 %v3881_v14  ;;  %v4454_v17 = vpop.permute.xlu0 %965  ;;  %v790_v18 = vpop.permute.xlu1 %789 }
 0x2c4   : > { %v798_v39 = vsel %vm795_vm4, %v788_v9, %v790_v18 }
 0x2c5   : > { %1411 = vrot.lane.b32.xlu1 %v4268_v48, %s4129_s20  ;;  %v824_v14 = vmul.f32 %v810_v24, %v798_v39  ;;  %v4498_v15 = vmul.f32 %v1519_v26, %v798_v39  ;;  %s4136_s20 = smov 112  }
 0x2c7   : > { %v4469_v29 = vpop.permute.xlu0 %969  ;;  %v792_v33 = vpop.permute.xlu1 %791  ;;  %5688 = vst [vmem:[#allocation5_spill] sm:$0xff] %v4498_v15 }
 0x2c8   : > { %v796_v2 = vsel %vm795_vm4, %v792_v33, %v4334_v52  ;;  %v797_v3 = vsel %vm795_vm4, %v790_v18, %v792_v33  ;;  %vm1371_vm4 = vcmp.lt.s32.totalorder %v4338_v55, 120 }
 0x2c9   : > { %v825_v18 = vmul.f32 %v814_v30, %v797_v3  ;;  %v826_v33 = vmul.f32 %v818_v31, %v796_v2 }
 0x2cb   : > { %v4496_v9 = vpop.permute.xlu0 %1009  ;;  %v832_v10 = vpop.permute.xlu1 %831 }
 0x2cc   : > { %v842_v16 = vsel %vm839_vm5, %v832_v10, %v4340_v56  ;;  %v843_v19 = vsel %vm839_vm5, %v4363_v1, %v832_v10  ;;  %v4516_v10 = vmul.f32 %v1523_v32, %v797_v3  ;;  %v1731_v32 = vld [vmem:[%s5641_s5 + $0x8] sm:$0xff] }
 0x2cd   : > { %v867_v21 = vmul.f32 %v850_v36, %v843_v19  ;;  %v868_v23 = vmul.f32 %v854_v40, %v842_v16  ;;  %v4506_v52 = vmul.f32 %v1550_v41, %v842_v16  ;;  %v4508_v25 = vmul.f32 %v1562_v42, %v843_v19  ;;  %3776 = vmatprep.mubr.msk.f32.mxu0 %vm1846_vm6, %v1731_v32  ;;  %v3755_v19 = vld [vmem:[%s5637_s1 + $0x14] sm:$0xf] }
 0x2ce   : > { %v4518_v36 = vmul.f32 %v1527_v35, %v796_v2  ;;  %3777 = vmatprep.mubr.msk.f32.mxu1 %vm1846_vm6, %v1731_v32  ;;  %v938_v32 = vrot.slane %v3755_v19, %v4349_v60  ;;  %v950_v24 = vrot.slane %v3755_v19, %v4367_v4 }
 0x2cf   : > { %5689 = vst [vmem:[#allocation6_spill] sm:$0xff] %v4506_v52  ;;  %v3833_v34 = vpack.c.bf16 %v867_v21, %v823_v59  ;;  %v4512_v26 = vpop.permute.xlu0 %1013  ;;  %v836_v39 = vpop.permute.xlu1 %835  ;;  %v3831_v0 = vpack.c.bf16 %v868_v23, %v824_v14  ;;  %v3772_v21 = vld [vmem:[%s5637_s1 + $0x5c] sm:$0xf] }
 0x2d0   : > { %5690 = vst [vmem:[#allocation7_spill] sm:$0xff] %v4518_v36  ;;  %v840_v30 = vsel %vm839_vm5, %v836_v39, %v4363_v1  ;;  %v841_v31 = vsel %vm839_vm5, %v4340_v56, %v836_v39  ;;  %v3754_v56 = vld [vmem:[%s5637_s1 + $0x10] sm:$0xf]  ;;  %v1616_v1 = vrot.slane %v3772_v21, %v4342_v58  ;;  %vm1415_vm5 = vcmp.lt.s32.totalorder %v4338_v55, 119 }
 0x2d1   : > { %v869_v40 = vmul.f32 %v858_v49, %v841_v31  ;;  %v870_v41 = vmul.f32 %v862_v53, %v840_v30  ;;  %v4526_v42 = vmul.f32 %v1554_v54, %v841_v31  ;;  %v4528_v59 = vmul.f32 %v1558_v57, %v840_v30  ;;  %3832 = vmatprep.subr.bf16.mxu0 %v3831_v0  ;;  %v3771_v0 = vld [vmem:[%s5637_s1 + $0x58] sm:$0xf]  ;;  %v1840_v57 = vld [vmem:[%s5642_s6] sm:$0xff] }
 0x2d2   : > { %3834 = vmatpush1.bf16.msra.mxu0 %v3833_v34  ;;  %1843 = vperm.xlu1 %4079, %v1840_v57   ;;  %v894_v3 = vrot.slane %v3754_v56, %v4349_v60  ;;  %v898_v14 = vrot.slane %v3754_v56, %v4342_v58  ;;  %v1581_v16 = vrot.slane %v3771_v0, %v4349_v60 }
 0x2d3   : > { %v3885_v35 = vpack.c.bf16 %v869_v40, %v825_v18  ;;  %v4535_v2 = vpop.permute.xlu0 %1053  ;;  %v876_v49 = vpop.permute.xlu1 %875  ;;  %v3883_v53 = vpack.c.bf16 %v870_v41, %v826_v33  ;;  %v1593_v23 = vrot.slane %v3771_v0, %v4367_v4  ;;  %v902_v33 = vrot.slane %v3754_v56, %v4377_v11 }
 0x2d4   : > { %v906_v34 = vrot.slane %v3754_v56, %v4367_v4  ;;  %v1585_v39 = vrot.slane %v3771_v0, %v4342_v58  ;;  %v886_v31 = vsel %vm883_vm7, %v876_v49, %v4380_v13  ;;  %v887_v40 = vsel %vm883_vm7, %v4402_v28, %v876_v49 }
 0x2d5   : > { %3884 = vmatprep.subr.bf16.mxu1 %v3883_v53  ;;  %v1589_v41 = vrot.slane %v3771_v0, %v4377_v11  ;;  %v1612_v56 = vrot.slane %v3772_v21, %v4349_v60  ;;  %v1624_v53 = vrot.slane %v3772_v21, %v4367_v4  ;;  %v946_v57 = vrot.slane %v3755_v19, %v4377_v11 }
 0x2d6   : > { %3886 = vmatpush1.bf16.msra.mxu1 %v3885_v35  ;;  %v942_v35 = vrot.slane %v3755_v19, %v4342_v58  ;;  %v1620_v49 = vrot.slane %v3772_v21, %v4377_v11  ;;  %v911_v54 = vmul.f32 %v894_v3, %v887_v40  ;;  %v912_v0 = vmul.f32 %v898_v14, %v886_v31 }
 0x2d7   : > { %v4561_v18 = vpop.permute.xlu0 %1057  ;;  %v880_v30 = vpop.permute.xlu1 %879  ;;  %v4590_v6 = vmul.f32 %v1581_v16, %v886_v31  ;;  %v4592_v19 = vmul.f32 %v1593_v23, %v887_v40 }
 0x2d8   : > { %v884_v27 = vsel %vm883_vm7, %v880_v30, %v4402_v28  ;;  %v885_v7 = vsel %vm883_vm7, %v4380_v13, %v880_v30  ;;  %vm2000_vm7 = vcmp.lt.s32.totalorder %v4338_v55, 18 }
 0x2d9   : > { %5691 = vst [vmem:[#allocation8_spill] sm:$0xff] %v4590_v6  ;;  %5692 = vst [vmem:[#allocation9_spill] sm:$0xff] %v4592_v19  ;;  %v913_v30 = vmul.f32 %v902_v33, %v885_v7  ;;  %v914_v15 = vmul.f32 %v906_v34, %v884_v27 }
 0x2db   : > { %v4588_v50 = vpop.permute.xlu0 %1097  ;;  %v920_v12 = vpop.permute.xlu1 %919 }
 0x2dc   : > { %v930_v3 = vsel %vm927_vm8, %v920_v12, %v4424_v46  ;;  %v931_v14 = vsel %vm927_vm8, %v4442_v8, %v920_v12  ;;  %v4610_v12 = vmul.f32 %v1585_v39, %v885_v7 }
 0x2dd   : > { %v955_v28 = vmul.f32 %v938_v32, %v931_v14  ;;  %v956_v21 = vmul.f32 %v942_v35, %v930_v3  ;;  %v4600_v5 = vmul.f32 %v1612_v56, %v930_v3  ;;  %v4602_v13 = vmul.f32 %v1624_v53, %v931_v14 }
 0x2de   : > { %5694 = vst [vmem:[#allocation11_spill] sm:$0xff] %v4610_v12  ;;  %v4612_v32 = vmul.f32 %v1589_v41, %v884_v27 }
 0x2df   : > { %5693 = vst [vmem:[#allocation10_spill] sm:$0xff] %v4600_v5  ;;  %v3837_v16 = vpack.c.bf16 %v955_v28, %v911_v54  ;;  %v4606_v31 = vpop.permute.xlu0 %1101  ;;  %v924_v40 = vpop.permute.xlu1 %923  ;;  %v3835_v52 = vpack.c.bf16 %v956_v21, %v912_v0  ;;  %v3757_v0 = vld [vmem:[%s5637_s1 + $0x1c] sm:$0xf] }
 0x2e0   : > { %5695 = vst [vmem:[#allocation12_spill] sm:$0xff] %v4612_v32  ;;  %v928_v33 = vsel %vm927_vm8, %v924_v40, %v4442_v8  ;;  %v929_v54 = vsel %vm927_vm8, %v4424_v46, %v924_v40  ;;  %v3756_v8 = vld [vmem:[%s5637_s1 + $0x18] sm:$0xf]  ;;  %v3773_v46 = vld [vmem:[%s5637_s1 + $0x60] sm:$0xf]  ;;  %vm2131_vm8 = vcmp.lt.s32.totalorder %v4338_v55, 2 }
 0x2e1   : > { %v957_v34 = vmul.f32 %v946_v57, %v929_v54  ;;  %v958_v35 = vmul.f32 %v950_v24, %v928_v33  ;;  %v4620_v56 = vmul.f32 %v1616_v1, %v929_v54  ;;  %v4622_v53 = vmul.f32 %v1620_v49, %v928_v33  ;;  %3836 = vmatprep.subr.bf16.mxu0 %v3835_v52 }
 0x2e2   : > { %3838 = vmatpush1.bf16.msra.mxu0 %v3837_v16  ;;  %v982_v52 = vrot.slane %v3756_v8, %v4349_v60  ;;  %v986_v57 = vrot.slane %v3756_v8, %v4342_v58  ;;  %v1643_v49 = vrot.slane %v3773_v46, %v4349_v60  ;;  %v1655_v3 = vrot.slane %v3773_v46, %v4367_v4 }
 0x2e3   : > { %5696 = vst [vmem:[#allocation13_spill] sm:$0xff] %v4620_v56  ;;  %5697 = vst [vmem:[#allocation14_spill] sm:$0xff] %v4622_v53  ;;  %v3889_v7 = vpack.c.bf16 %v957_v34, %v913_v30  ;;  %v964_v39 = vpop.permute.xlu1 %963  ;;  %v3887_v24 = vpack.c.bf16 %v958_v35, %v914_v15  ;;  %v4634_v41 = vpop.permute.xlu0 %1141  ;;  %v3774_v15 = vld [vmem:[%s5637_s1 + $0x64] sm:$0xf]  ;;  %v990_v14 = vrot.slane %v3756_v8, %v4377_v11 }
 0x2e4   : > { %v994_v28 = vrot.slane %v3756_v8, %v4367_v4  ;;  %v1647_v21 = vrot.slane %v3773_v46, %v4342_v58  ;;  %v974_v16 = vsel %vm971_vm9, %v964_v39, %v4454_v17  ;;  %v975_v40 = vsel %vm971_vm9, %v4469_v29, %v964_v39 }
 0x2e5   : > { %3888 = vmatprep.subr.bf16.mxu1 %v3887_v24  ;;  %v1651_v33 = vrot.slane %v3773_v46, %v4377_v11  ;;  %v1026_v54 = vrot.slane %v3757_v0, %v4349_v60  ;;  %v1030_v34 = vrot.slane %v3757_v0, %v4342_v58  ;;  %v1674_v35 = vrot.slane %v3774_v15, %v4349_v60 }
 0x2e6   : > { %3890 = vmatpush1.bf16.msra.mxu1 %v3889_v7  ;;  %v1686_v7 = vrot.slane %v3774_v15, %v4367_v4  ;;  %v1034_v8 = vrot.slane %v3757_v0, %v4377_v11  ;;  %v1038_v24 = vrot.slane %v3757_v0, %v4367_v4  ;;  %v1678_v23 = vrot.slane %v3774_v15, %v4342_v58 }
 0x2e7   : > { %v968_v30 = vpop.permute.xlu1 %967  ;;  %v1682_v39 = vrot.slane %v3774_v15, %v4377_v11  ;;  %v999_v27 = vmul.f32 %v982_v52, %v975_v40  ;;  %v1000_v46 = vmul.f32 %v986_v57, %v974_v16  ;;  %v4666_v1 = vpop.permute.xlu0 %1145  ;;  %v4674_v32 = vmul.f32 %v1643_v49, %v974_v16 }
 0x2e8   : > { %v972_v36 = vsel %vm971_vm9, %v968_v30, %v4469_v29  ;;  %v973_v6 = vsel %vm971_vm9, %v4454_v17, %v968_v30  ;;  %v4676_v0 = vmul.f32 %v1655_v3, %v975_v40  ;;  %vm2087_vm9 = vcmp.lt.s32.totalorder %v4338_v55, 14 }
 0x2e9   : > { %v1001_v17 = vmul.f32 %v990_v14, %v973_v6  ;;  %v1002_v30 = vmul.f32 %v994_v28, %v972_v36  ;;  %v4692_v19 = vmul.f32 %v1647_v21, %v973_v6 }
 0x2eb   : > { %v1008_v5 = vpop.permute.xlu1 %1007  ;;  %v4702_v14 = vpop.permute.xlu0 %1185 }
 0x2ec   : > { %v1018_v52 = vsel %vm1015_vm10, %v1008_v5, %v4496_v9  ;;  %v1019_v57 = vsel %vm1015_vm10, %v4512_v26, %v1008_v5  ;;  %v4694_v5 = vmul.f32 %v1651_v33, %v972_v36 }
 0x2ed   : > { %v1043_v15 = vmul.f32 %v1026_v54, %v1019_v57  ;;  %v1044_v53 = vmul.f32 %v1030_v34, %v1018_v52  ;;  %v4684_v29 = vmul.f32 %v1674_v35, %v1018_v52  ;;  %v4686_v12 = vmul.f32 %v1686_v7, %v1019_v57 }
 0x2ef   : > { %v3841_v49 = vpack.c.bf16 %v1043_v15, %v999_v27  ;;  %v1012_v16 = vpop.permute.xlu1 %1011  ;;  %v3839_v40 = vpack.c.bf16 %v1044_v53, %v1000_v46  ;;  %v4718_v7 = vpop.permute.xlu0 %1189 }
 0x2f0   : > { %v1016_v54 = vsel %vm1015_vm10, %v1012_v16, %v4512_v26  ;;  %v1017_v27 = vsel %vm1015_vm10, %v4496_v9, %v1012_v16  ;;  %v3758_v9 = vld [vmem:[%s5637_s1 + $0x20] sm:$0xf]  ;;  %vm2206_vm10 = vcmp.lt.s32.totalorder %v4338_v55, 126 }
 0x2f1   : > { %v1045_v28 = vmul.f32 %v1034_v8, %v1017_v27  ;;  %v1046_v34 = vmul.f32 %v1038_v24, %v1016_v54  ;;  %v4704_v53 = vmul.f32 %v1678_v23, %v1017_v27  ;;  %v4706_v35 = vmul.f32 %v1682_v39, %v1016_v54  ;;  %3840 = vmatprep.subr.bf16.mxu0 %v3839_v40  ;;  %v3759_v23 = vld [vmem:[%s5637_s1 + $0x24] sm:$0xf] }
 0x2f2   : > { %3842 = vmatpush1.bf16.msra.mxu0 %v3841_v49  ;;  %v1070_v24 = vrot.slane %v3758_v9, %v4349_v60  ;;  %v1074_v39 = vrot.slane %v3758_v9, %v4342_v58  ;;  %v1114_v46 = vrot.slane %v3759_v23, %v4349_v60  ;;  %v1118_v52 = vrot.slane %v3759_v23, %v4342_v58 }
 0x2f3   : > { %v3893_v6 = vpack.c.bf16 %v1045_v28, %v1001_v17  ;;  %v1052_v21 = vpop.permute.xlu1 %1051  ;;  %v3891_v26 = vpack.c.bf16 %v1046_v34, %v1002_v30  ;;  %v1078_v17 = vrot.slane %v3758_v9, %v4377_v11  ;;  %v1082_v30 = vrot.slane %v3758_v9, %v4367_v4  ;;  %v4746_v28 = vpop.permute.xlu0 %1229 }
 0x2f4   : > { %v4729_v57 = vsel %vm1059_vm11, %v1052_v21, %v4535_v2  ;;  %v4734_v15 = vsel %vm1059_vm11, %v4561_v18, %v1052_v21  ;;  %v1122_v54 = vrot.slane %v3759_v23, %v4377_v11  ;;  %v1126_v27 = vrot.slane %v3759_v23, %v4367_v4 }
 0x2f5   : > { %3892 = vmatprep.subr.bf16.mxu1 %v3891_v26  ;;  %5698 = vst [vmem:[#allocation15_spill] sm:$0xff] %v4729_v57  ;;  %v1087_v34 = vmul.f32 %v1070_v24, %v4734_v15 }
 0x2f6   : > { %3894 = vmatpush1.bf16.msra.mxu1 %v3893_v6  ;;  %v1088_v6 = vmul.f32 %v1074_v39, %v4729_v57 }
 0x2f7   : > { %v1056_v8 = vpop.permute.xlu1 %1055 }
 0x2f8   : > { %v4753_v9 = vsel %vm1059_vm11, %v1056_v8, %v4561_v18 }
 0x2f9   : > { %v1090_v18 = vmul.f32 %v1082_v30, %v4753_v9 }
 0x2fb   : > { %v1096_v49 = vpop.permute.xlu1 %1095 }
 0x2fc   : > { %v1106_v16 = vsel %vm1103_vm12, %v1096_v49, %v4588_v50  ;;  %v1107_v40 = vsel %vm1103_vm12, %v4606_v31, %v1096_v49  ;;  %v4758_v49 = vsel %vm1059_vm11, %v4535_v2, %v1056_v8  ;;  %v4768_v2 = vpop.permute.xlu0 %1233  ;;  %vm2250_vm11 = vcmp.lt.s32.totalorder %v4338_v55, 114 }
 0x2fd   : > { %v1131_v21 = vmul.f32 %v1114_v46, %v1107_v40  ;;  %v1132_v26 = vmul.f32 %v1118_v52, %v1106_v16  ;;  %v1089_v46 = vmul.f32 %v1078_v17, %v4758_v49 }
 0x2ff   : > { %v3845_v3 = vpack.c.bf16 %v1131_v21, %v1087_v34  ;;  %v1100_v23 = vpop.permute.xlu1 %1099  ;;  %v3843_v36 = vpack.c.bf16 %v1132_v26, %v1088_v6 }
 0x300   : > { %v1104_v24 = vsel %vm1103_vm12, %v1100_v23, %v4606_v31  ;;  %v1105_v39 = vsel %vm1103_vm12, %v4588_v50, %v1100_v23  ;;  %v3760_v31 = vld [vmem:[%s5637_s1 + $0x28] sm:$0xf]  ;;  %v3761_v50 = vld [vmem:[%s5637_s1 + $0x2c] sm:$0xf]  ;;  %vm2294_vm12 = vcmp.lt.s32.totalorder %v4338_v55, 112 }
 0x301   : > { %v1133_v52 = vmul.f32 %v1122_v54, %v1105_v39  ;;  %v1134_v16 = vmul.f32 %v1126_v27, %v1104_v24  ;;  %3844 = vmatprep.subr.bf16.mxu0 %v3843_v36  ;;  %v4778_v36 = vpop.permute.xlu0 %1277  ;;  %v1162_v30 = vrot.slane %v3760_v31, %v4342_v58  ;;  %v1202_v54 = vrot.slane %v3761_v50, %v4349_v60 }
 0x302   : > { %3846 = vmatpush1.bf16.msra.mxu0 %v3845_v3  ;;  %v1158_v3 = vrot.slane %v3760_v31, %v4349_v60  ;;  %v1206_v27 = vrot.slane %v3761_v50, %v4342_v58  ;;  %v1166_v26 = vrot.slane %v3760_v31, %v4377_v11  ;;  %v1170_v23 = vrot.slane %v3760_v31, %v4367_v4  ;;  %v3762_v31 = vld [vmem:[%s5637_s1 + $0x30] sm:$0xf] }
 0x303   : > { %v3897_v8 = vpack.c.bf16 %v1133_v52, %v1089_v46  ;;  %v1140_v40 = vpop.permute.xlu1 %1139  ;;  %v3895_v34 = vpack.c.bf16 %v1134_v16, %v1090_v18  ;;  %v1210_v18 = vrot.slane %v3761_v50, %v4377_v11  ;;  %v1214_v52 = vrot.slane %v3761_v50, %v4367_v4 }
 0x304   : > { %v1150_v6 = vsel %vm1147_vm13, %v1140_v40, %v4634_v41  ;;  %v1151_v21 = vsel %vm1147_vm13, %v4666_v1, %v1140_v40 }
 0x305   : > { %3896 = vmatprep.subr.bf16.mxu1 %v3895_v34  ;;  %v1175_v16 = vmul.f32 %v1158_v3, %v1151_v21  ;;  %v4809_v56 = vpop.permute.xlu0 %1281 }
 0x306   : > { %3898 = vmatpush1.bf16.msra.mxu1 %v3897_v8  ;;  %v1176_v8 = vmul.f32 %v1162_v30, %v1150_v6 }
 0x307   : > { %v1144_v17 = vpop.permute.xlu1 %1143 }
 0x308   : > { %v1148_v33 = vsel %vm1147_vm13, %v1144_v17, %v4666_v1  ;;  %v1246_v1 = vrot.slane %v3762_v31, %v4349_v60 }
 0x30b   : > { %v1184_v24 = vpop.permute.xlu1 %1183 }
 0x30c   : > { %v1194_v39 = vsel %vm1191_vm14, %v1184_v24, %v4702_v14  ;;  %v1195_v46 = vsel %vm1191_vm14, %v4718_v7, %v1184_v24  ;;  %v1149_v24 = vsel %vm1147_vm13, %v4634_v41, %v1144_v17  ;;  %v1178_v17 = vmul.f32 %v1170_v23, %v1148_v33 }
 0x30d   : > { %v1219_v40 = vmul.f32 %v1202_v54, %v1195_v46  ;;  %v1220_v34 = vmul.f32 %v1206_v27, %v1194_v39  ;;  %v1250_v27 = vrot.slane %v3762_v31, %v4342_v58  ;;  %v1177_v41 = vmul.f32 %v1166_v26, %v1149_v24 }
 0x30e   : > { %v1254_v33 = vrot.slane %v3762_v31, %v4377_v11  ;;  %v1258_v26 = vrot.slane %v3762_v31, %v4367_v4  ;;  %vm2338_vm13 = vcmp.lt.s32.totalorder %v4338_v55, 110 }
 0x30f   : > { %v3849_v57 = vpack.c.bf16 %v1219_v40, %v1175_v16  ;;  %v1188_v50 = vpop.permute.xlu1 %1187  ;;  %v3847_v3 = vpack.c.bf16 %v1220_v34, %v1176_v8  ;;  %v1322_v8 = vpop.permute.xlu0 %1321 }
 0x310   : > { %v1192_v30 = vsel %vm1191_vm14, %v1188_v50, %v4718_v7  ;;  %v1193_v54 = vsel %vm1191_vm14, %v4702_v14, %v1188_v50  ;;  %vm3365_vm14 = vcmask 64512  }
 0x311   : > { %v1221_v6 = vmul.f32 %v1210_v18, %v1193_v54  ;;  %v1222_v21 = vmul.f32 %v1214_v52, %v1192_v30  ;;  %3848 = vmatprep.subr.bf16.mxu0 %v3847_v3 }
 0x312   : > { %3850 = vmatpush1.bf16.msra.mxu0 %v3849_v57 }
 0x313   : > { %v3901_v39 = vpack.c.bf16 %v1221_v6, %v1177_v41  ;;  %v1228_v46 = vpop.permute.xlu1 %1227  ;;  %v3899_v16 = vpack.c.bf16 %v1222_v21, %v1178_v17  ;;  %v1326_v30 = vpop.permute.xlu0 %1325 }
 0x314   : > { %v1238_v7 = vsel %vm1235_vm15, %v1228_v46, %v4746_v28  ;;  %v1239_v14 = vsel %vm1235_vm15, %v4768_v2, %v1228_v46 }
 0x315   : > { %v1263_v40 = vmul.f32 %v1246_v1, %v1239_v14  ;;  %v1264_v34 = vmul.f32 %v1250_v27, %v1238_v7  ;;  %3900 = vmatprep.subr.bf16.mxu1 %v3899_v16 }
 0x316   : > { %3902 = vmatpush1.bf16.msra.mxu1 %v3901_v39 }
 0x317   : > { %v3853_v57 = vpack.c.bf16 %v4258_v44, %v1263_v40  ;;  %v1232_v23 = vpop.permute.xlu1 %1231  ;;  %v3851_v18 = vpack.c.bf16 %v4260_v45, %v1264_v34  ;;  %v3763_v45 = vld [vmem:[%s5637_s1 + $0x38] sm:$0xf]  ;;  %v1366_v1 = vpop.permute.xlu0 %1365 }
 0x318   : > { %v1236_v52 = vsel %vm1235_vm15, %v1232_v23, %v4768_v2  ;;  %v1237_v24 = vsel %vm1235_vm15, %v4746_v28, %v1232_v23  ;;  %v3764_v28 = vld [vmem:[%s5637_s1 + $0x3c] sm:$0xf]  ;;  %v1306_v27 = vrot.slane %v3763_v45, %v4367_v4  ;;  %v1298_v41 = vrot.slane %v3763_v45, %v4342_v58 }
 0x319   : > { %v1265_v50 = vmul.f32 %v1254_v33, %v1237_v24  ;;  %v1266_v3 = vmul.f32 %v1258_v26, %v1236_v52  ;;  %3852 = vmatprep.subr.bf16.mxu0 %v3851_v18  ;;  %v1302_v6 = vrot.slane %v3763_v45, %v4377_v11  ;;  %v1338_v21 = vrot.slane %v3764_v28, %v4349_v60 }
 0x31a   : > { %3854 = vmatpush1.bf16.msra.mxu0 %v3853_v57  ;;  %v1342_v46 = vrot.slane %v3764_v28, %v4342_v58  ;;  %v1346_v40 = vrot.slane %v3764_v28, %v4377_v11  ;;  %v1294_v34 = vrot.slane %v3763_v45, %v4349_v60 }
 0x31b   : > { %v3905_v31 = vpack.c.bf16 %v4268_v48, %v1265_v50  ;;  %v1276_v54 = vpop.permute.xlu1 %1275  ;;  %v3903_v44 = vpack.c.bf16 %v4264_v47, %v1266_v3  ;;  %v1350_v47 = vrot.slane %v3764_v28, %v4367_v4  ;;  %v1370_v57 = vpop.permute.xlu0 %1369 }
 0x31c   : > { %v1287_v48 = vsel %vm1283_vm2, %v4809_v56, %v1276_v54  ;;  %v1286_v23 = vsel %vm1283_vm2, %v1276_v54, %v4778_v36 }
 0x31d   : > { %3904 = vmatprep.subr.bf16.mxu1 %v3903_v44  ;;  %v1314_v16 = vmul.f32 %v1306_v27, %v1287_v48  ;;  %v1311_v28 = vmul.f32 %v1294_v34, %v1286_v23 }
 0x31e   : > { %3906 = vmatpush1.bf16.msra.mxu1 %v3905_v31 }
 0x31f   : > { %v1280_v2 = vpop.permute.xlu1 %1279 }
 0x320   : > { %v1284_v33 = vsel %vm1283_vm2, %v1280_v2, %v4809_v56  ;;  %v1285_v26 = vsel %vm1283_vm2, %v4778_v36, %v1280_v2  ;;  %v1410_v36 = vpop.permute.xlu0 %1409 }
 0x321   : > { %v1312_v31 = vmul.f32 %v1298_v41, %v1285_v26  ;;  %v1313_v56 = vmul.f32 %v1302_v6, %v1284_v33 }
 0x323   : > { %v1320_v17 = vpop.permute.xlu1 %1319 }
 0x324   : > { %v1331_v39 = vsel %vm1327_vm3, %v1326_v30, %v1320_v17  ;;  %v1330_v7 = vsel %vm1327_vm3, %v1320_v17, %v1322_v8 }
 0x325   : > { %v1358_v14 = vmul.f32 %v1350_v47, %v1331_v39  ;;  %v1355_v24 = vmul.f32 %v1338_v21, %v1330_v7  ;;  %v1414_v21 = vpop.permute.xlu0 %1413 }
 0x327   : > { %v1324_v18 = vpop.permute.xlu1 %1323  ;;  %v3907_v52 = vpack.c.bf16 %v1358_v14, %v1314_v16  ;;  %v3857_v48 = vpack.c.bf16 %v1355_v24, %v1311_v28 }
 0x328   : > { %v1328_v50 = vsel %vm1327_vm3, %v1324_v18, %v1326_v30  ;;  %v1329_v3 = vsel %vm1327_vm3, %v1322_v8, %v1324_v18  ;;  %v3765_v30 = vld [vmem:[%s5637_s1 + $0x40] sm:$0xf]  ;;  %v3766_v8 = vld [vmem:[%s5637_s1 + $0x44] sm:$0xf] }
 0x329   : > { %v1356_v44 = vmul.f32 %v1342_v46, %v1329_v3  ;;  %v1357_v45 = vmul.f32 %v1346_v40, %v1328_v50  ;;  %3908 = vmatprep.subr.bf16.mxu1 %v3907_v52  ;;  %v1394_v41 = vrot.slane %v3765_v30, %v4367_v4  ;;  %v1438_v17 = vrot.slane %v3766_v8, %v4367_v4 }
 0x32a   : > { %v1386_v39 = vrot.slane %v3765_v30, %v4342_v58  ;;  %v1390_v16 = vrot.slane %v3765_v30, %v4377_v11  ;;  %v1426_v7 = vrot.slane %v3766_v8, %v4349_v60  ;;  %v1430_v40 = vrot.slane %v3766_v8, %v4342_v58 }
 0x32b   : > { %v3909_v2 = vpack.c.bf16 %v1357_v45, %v1313_v56  ;;  %v1364_v27 = vpop.permute.xlu1 %1363  ;;  %v3855_v47 = vpack.c.bf16 %v1356_v44, %v1312_v31  ;;  %v1434_v23 = vrot.slane %v3766_v8, %v4377_v11  ;;  %v1382_v18 = vrot.slane %v3765_v30, %v4349_v60 }
 0x32c   : > { %v1375_v6 = vsel %vm1371_vm4, %v1370_v57, %v1364_v27  ;;  %v1374_v50 = vsel %vm1371_vm4, %v1364_v27, %v1366_v1  ;;  %v5700_v27 = vpack.c.bf16 %v4415_v38, %v4413_v37  ;;  %v3775_v37 = vld [vmem:[%s5637_s1 + $0x68] sm:$0xf]  ;;  %v5705_v38 = vld [vmem:[#allocation7_spill] sm:$0xff] }
 0x32d   : > { %3856 = vmatprep.subr.bf16.mxu0 %v3855_v47  ;;  %3910 = vmatpush1.bf16.msra.mxu1 %v3909_v2  ;;  %v1402_v34 = vmul.f32 %v1394_v41, %v1375_v6  ;;  %v5702_v41 = vpack.c.bf16 %v4391_v22, %v4389_v20  ;;  %v5710_v22 = vld [vmem:[#allocation9_spill] sm:$0xff]  ;;  %v5713_v6 = vld [vmem:[#allocation11_spill] sm:$0xff] }
 0x32e   : > { %3858 = vmatpush1.bf16.msra.mxu0 %v3857_v48 }
 0x32f   : > { %v1368_v54 = vpop.permute.xlu1 %1367 }
 0x330   : > { %v1372_v52 = vsel %vm1371_vm4, %v1368_v54, %v1370_v57  ;;  %v1373_v24 = vsel %vm1371_vm4, %v1366_v1, %v1368_v54  ;;  %v1399_v57 = vmul.f32 %v1382_v18, %v1374_v50  ;;  %v5699_v1 = vpack.c.bf16 %v4436_v63, %v4428_v51  ;;  %v5708_v63 = vld [vmem:[#allocation5_spill] sm:$0xff] }
 0x331   : > { %v1400_v28 = vmul.f32 %v1386_v39, %v1373_v24  ;;  %v1401_v2 = vmul.f32 %v1390_v16, %v1372_v52  ;;  %v5704_v51 = vpack.c.bf16 %v4526_v42, %v4516_v10  ;;  %v1717_v42 = vrot.slane %v3775_v37, %v4367_v4  ;;  %v5715_v39 = vld [vmem:[#allocation14_spill] sm:$0xff] }
 0x332   : > { %v5718_v16 = vld [vmem:[#allocation10_spill] sm:$0xff]  ;;  %v5723_v18 = vpack.c.bf16 %v4706_v35, %v4694_v5 }
 0x333   : > { %v1408_v46 = vpop.permute.xlu1 %1407 }
 0x334   : > { %v1419_v14 = vsel %vm1415_vm5, %v1414_v21, %v1408_v46  ;;  %v1418_v33 = vsel %vm1415_vm5, %v1408_v46, %v1410_v36  ;;  %v5716_v46 = vld [vmem:[#allocation12_spill] sm:$0xff] }
 0x335   : > { %v1446_v26 = vmul.f32 %v1438_v17, %v1419_v14  ;;  %v1443_v56 = vmul.f32 %v1426_v7, %v1418_v33  ;;  %v5703_v17 = vpack.c.bf16 %v4508_v25, %v4489_v61  ;;  %v5711_v61 = vpack.c.bf16 %v4602_v13, %v5710_v22  ;;  %v5712_v25 = vld [vmem:[#allocation13_spill] sm:$0xff]  ;;  %v5719_v7 = vld [vmem:[#allocation8_spill] sm:$0xff] }
 0x336   : > { %v5714_v10 = vpack.c.bf16 %v5712_v25, %v5713_v6  ;;  %v5720_v14 = vpack.c.bf16 %v5718_v16, %v5719_v7  ;;  %v5721_v13 = vpack.c.bf16 %v4686_v12, %v4676_v0  ;;  %v1705_v33 = vrot.slane %v3775_v37, %v4349_v60 }
 0x337   : > { %v1412_v3 = vpop.permute.xlu1 %1411  ;;  %v3911_v31 = vpack.c.bf16 %v1446_v26, %v1402_v34  ;;  %v3861_v54 = vpack.c.bf16 %v1443_v56, %v1399_v57  ;;  %v5722_v34 = vpack.c.bf16 %v4704_v53, %v4692_v19  ;;  %v1725_v26 = vmul.f32 %v1717_v42, %v4734_v15  ;;  %v1730_v19 = vld [vmem:[%s5641_s5] sm:$0xff]  ;;  %v3794_v57 = vld [vmem:[%s5638_s2 + $0x48] sm:$0xf] }
 0x338   : > { %v1416_v44 = vsel %vm1415_vm5, %v1412_v3, %v1414_v21  ;;  %v1417_v45 = vsel %vm1415_vm5, %v1410_v36, %v1412_v3  ;;  %v5701_v36 = vpack.c.bf16 %v4434_v62, %v4422_v43  ;;  %v5706_v43 = vpack.c.bf16 %v4528_v59, %v5705_v38  ;;  %v5707_v62 = vld [vmem:[#allocation6_spill] sm:$0xff]  ;;  %v5725_v53 = vld [vmem:[#allocation15_spill] sm:$0xff] }
 0x339   : > { %v1444_v47 = vmul.f32 %v1430_v40, %v1417_v45  ;;  %v1445_v48 = vmul.f32 %v1434_v23, %v1416_v44  ;;  %3912 = vmatprep.subr.bf16.mxu1 %v3911_v31  ;;  %v5709_v20 = vpack.c.bf16 %v5707_v62, %v5708_v63  ;;  %v1709_v21 = vrot.slane %v3775_v37, %v4342_v58  ;;  %v3014_v3 = vld [vmem:[%s5644_s8] sm:$0xf] }
 0x33a   : > { %v5717_v59 = vpack.c.bf16 %v5715_v39, %v5716_v46  ;;  %v1713_v40 = vrot.slane %v3775_v37, %v4377_v11  ;;  %v5724_v12 = vpack.c.bf16 %v4684_v29, %v4674_v32  ;;  %v1722_v15 = vmul.f32 %v1705_v33, %v5725_v53  ;;  %v3167_v31 = vld [vmem:[%s5646_s10] sm:$0xff] }
 0x33b   : > { %v3913_v30 = vpack.c.bf16 %v1445_v48, %v1401_v2  ;;  %v3859_v8 = vpack.c.bf16 %v1444_v47, %v1400_v28  ;;  %v1723_v23 = vmul.f32 %v1709_v21, %v4758_v49  ;;  %v3359_v56 = vld [vmem:[%s5648_s12] sm:$0xf]  ;;  %v2640_v62 = vrot.slane %v3794_v57, %v4377_v11 }
 0x33c   : > { %v1724_v0 = vmul.f32 %v1713_v40, %v4753_v9  ;;  %v3661_v44 = vld [vmem:[%s5650_s14] sm:$0xf]  ;;  %v2644_v63 = vrot.slane %v3794_v57, %v4367_v4 }
 0x33d   : > { %3860 = vmatprep.subr.bf16.mxu0 %v3859_v8  ;;  %3914 = vmatpush1.bf16.msra.mxu1 %v3913_v30  ;;  %v5023_v45 = vld [vmem:[%s5643_s7] sm:$0xff]  ;;  %v3795_v8 = vld [vmem:[%s5638_s2 + $0x4c] sm:$0xf] }
 0x33e   : > { %3862 = vmatpush1.bf16.msra.mxu0 %v3861_v54  ;;  %3916 = vmatprep.subr.bf16.mxu1 %v5699_v1  ;;  %5726 = vst [vmem:[#allocation7_spill] sm:$0xff] %v5023_v45  ;;  %v3021_v28 = vcombine.high %v5023_v45, %v5023_v45  ;;  %v2005_v48 = vld [vmem:[%s5638_s2] sm:$0xf]  ;;  %v2663_v37 = vrot.slane %v3795_v8, %v4349_v60 }
 0x33f   : > { %3864 = vmatprep.subr.bf16.mxu0 %v5700_v27  ;;  %v2018_v1 = vrot.slane %v2005_v48, %v4377_v11  ;;  %v2632_v27 = vrot.slane %v3794_v57, %v4349_v60  ;;  %v2671_v7 = vrot.slane %v3795_v8, %v4377_v11 }
 0x341   : > { %3918 = vmatpush1.bf16.msra.mxu1 %v5701_v36  ;;  %v2022_v36 = vrot.slane %v2005_v48, %v4367_v4 }
 0x342   : > { %3866 = vmatpush1.bf16.msra.mxu0 %v5702_v41  ;;  %3920 = vmatprep.subr.bf16.mxu1 %v5703_v17  ;;  %v3778_v41 = vld [vmem:[%s5638_s2 + $0x4] sm:$0xf]  ;;  %v2636_v17 = vrot.slane %v3794_v57, %v4342_v58 }
 0x343   : > { %3868 = vmatprep.subr.bf16.mxu0 %v5704_v51  ;;  %v2010_v51 = vrot.slane %v2005_v48, %v4349_v60  ;;  %v2066_v6 = vrot.slane %v3778_v41, %v4367_v4  ;;  %v2054_v39 = vrot.slane %v3778_v41, %v4349_v60  ;;  %v2058_v46 = vrot.slane %v3778_v41, %v4342_v58 }
 0x345   : > { %3922 = vmatpush1.bf16.msra.mxu1 %v5706_v43  ;;  %v2014_v43 = vrot.slane %v2005_v48, %v4342_v58 }
 0x346   : > { %3870 = vmatpush1.bf16.msra.mxu0 %v5709_v20  ;;  %3924 = vmatprep.subr.bf16.mxu1 %v5711_v61  ;;  %v2062_v61 = vrot.slane %v3778_v41, %v4377_v11  ;;  %v5134_v41 = vld [vmem:[%s5638_s2 + $0x10] sm:$0xf] }
 0x347   : > { %3872 = vmatprep.subr.bf16.mxu0 %v5714_v10  ;;  %v2667_v10 = vrot.slane %v3795_v8, %v4342_v58 }
 0x349   : > { %3926 = vmatpush1.bf16.msra.mxu1 %v5717_v59 }
 0x34a   : > { %3874 = vmatpush1.bf16.msra.mxu0 %v5720_v14  ;;  %3928 = vmatprep.subr.bf16.mxu1 %v5721_v13  ;;  %v2675_v14 = vrot.slane %v3795_v8, %v4367_v4 }
 0x34b   : > { %3876 = vmatprep.subr.bf16.mxu0 %v5722_v34 }
 0x34d   : > { %3930 = vmatpush1.bf16.msra.mxu1 %v5723_v18 }
 0x34e   : > { %3878 = vmatpush1.bf16.msra.mxu0 %v5724_v12  ;;  %1973 = vmatprep.subr.mxu1 %v1725_v26 }
 0x34f   : > { %1902 = vmatprep.subr.mxu0 %v1723_v23 }
 0x351   : > { %1974 = vmatpush1.msra.mxu1 %v1724_v0  ;;  %v1844_v5 = vpop.permute.xlu1 %1843 }
 0x352   : > { %1903 = vmatpush1.msra.mxu0 %v1722_v15  ;;  %1986 = vmatmul.mubr.f32.vlgmr.msra.gmra.mrb[2].mxu1 %v1730_v19 }
 0x353   : > { %1915 = vmatmul.mubr.f32.vlgmr.msra.gmra.mrb[2].mxu0 %v1730_v19  ;;  %3804 = vmatprep.mubr.msk.f32.mxu1 %vm1846_vm6, %v3021_v28 }
 0x354   : > { %3803 = vmatprep.mubr.msk.f32.mxu0 %vm1846_vm6, %v3021_v28  ;;  %vm2043_vm6 = vcmp.lt.s32.totalorder %v4338_v55, 16 }
 0x425   : > { %v1987_v35 = vpop.f32.mrb[2].mxu1 }
 0x426   : > { %v1916_v49 = vpop.f32.mrb[2].mxu0  ;;  %v1989_v52 = vpop.f32.mrb[3].mxu1  ;;  %v4974_v9 = vadd.f32 %v1987_v35, %v1844_v5 }
 0x427   : > { %v4968_v32 = vadd.f32 %v1916_v49, %v1844_v5  ;;  %v1918_v29 = vpop.f32.mrb[3].mxu0  ;;  %v4976_v50 = vadd.f32 %v1989_v52, %v1844_v5 }
 0x428   : > { %v4970_v24 = vadd.f32 %v1918_v29, %v1844_v5 }
 0x429   : > { %1992 = vrot.lane.b32.xlu0 %v4968_v32, %s4130_s16 }
 0x42a   : > { %1994 = vrot.lane.b32.xlu1 %v4970_v24, %s4130_s16 }
 0x42d   : > { %1996 = vrot.lane.b32.xlu0 %v4974_v9, %s4130_s16 }
 0x42e   : > { %1998 = vrot.lane.b32.xlu1 %v4976_v50, %s4130_s16 }
 0x431   : > { %2035 = vrot.lane.b32.xlu0 %v4968_v32, %s4131_s17 }
 0x432   : > { %2037 = vrot.lane.b32.xlu1 %v4970_v24, %s4131_s17 }
 0x435   : > { %2039 = vrot.lane.b32.xlu0 %v4974_v9, %s4131_s17 }
 0x436   : > { %2041 = vrot.lane.b32.xlu1 %v4976_v50, %s4131_s17 }
 0x439   : > { %2079 = vrot.lane.b32.xlu0 %v4968_v32, %s4132_s21 }
 0x43a   : > { %2081 = vrot.lane.b32.xlu1 %v4970_v24, %s4132_s21 }
 0x43d   : > { %2083 = vrot.lane.b32.xlu0 %v4974_v9, %s4132_s21 }
 0x43e   : > { %2085 = vrot.lane.b32.xlu1 %v4976_v50, %s4132_s21 }
 0x441   : > { %2123 = vrot.lane.b32.xlu0 %v4968_v32, %s4133_s23 }
 0x442   : > { %2125 = vrot.lane.b32.xlu1 %v4970_v24, %s4133_s23 }
 0x445   : > { %2127 = vrot.lane.b32.xlu0 %v4974_v9, %s4133_s23 }
 0x446   : > { %2129 = vrot.lane.b32.xlu1 %v4976_v50, %s4133_s23 }
 0x449   : > { %2198 = vrot.lane.b32.xlu0 %v4968_v32, %s4134_s24 }
 0x44a   : > { %2200 = vrot.lane.b32.xlu1 %v4970_v24, %s4134_s24 }
 0x44d   : > { %2202 = vrot.lane.b32.xlu0 %v4974_v9, %s4134_s24 }
 0x44e   : > { %2204 = vrot.lane.b32.xlu1 %v4976_v50, %s4134_s24 }
 0x451   : > { %2242 = vrot.lane.b32.xlu0 %v4968_v32, %s4135_s26 }
 0x452   : > { %2244 = vrot.lane.b32.xlu1 %v4970_v24, %s4135_s26 }
 0x455   : > { %2246 = vrot.lane.b32.xlu0 %v4974_v9, %s4135_s26 }
 0x456   : > { %2248 = vrot.lane.b32.xlu1 %v4976_v50, %s4135_s26 }
 0x459   : > { %2286 = vrot.lane.b32.xlu0 %v4968_v32, %s4136_s20 }
 0x45a   : > { %2288 = vrot.lane.b32.xlu1 %v4970_v24, %s4136_s20 }
 0x45d   : > { %2290 = vrot.lane.b32.xlu0 %v4974_v9, %s4136_s20 }
 0x45e   : > { %2292 = vrot.lane.b32.xlu1 %v4976_v50, %s4136_s20 }
 0x461   : > { %2330 = vrot.lane.b32.xlu0 %v4968_v32, %s4137_s27 }
 0x462   : > { %2332 = vrot.lane.b32.xlu1 %v4970_v24, %s4137_s27 }
 0x465   : > { %2334 = vrot.lane.b32.xlu0 %v4974_v9, %s4137_s27 }
 0x466   : > { %2336 = vrot.lane.b32.xlu1 %v4976_v50, %s4137_s27 }
 0x469   : > { %3017 = vperm.xlu0 %4078, %v3014_v3  }
 0x46a   : > { %3170 = vperm.xlu1 %4079, %v3167_v31  }
 0x46d   : > { %3362 = vperm.xlu0 %4078, %v3359_v56  }
 0x46e   : > { %3664 = vperm.xlu1 %4079, %v3661_v44  }
 0x49b   : > { %v1993_v2 = vpop.permute.xlu0 %1992 }
 0x49c   : > { %v1995_v47 = vpop.permute.xlu1 %1994 }
 0x49d   : > { %v5051_v38 = vsel %vm2000_vm7, %v1993_v2, %v1995_v47 }
 0x49e   : > { %v5074_v59 = vmul.f32 %v2632_v27, %v5051_v38  ;;  %v2029_v13 = vmul.f32 %v2018_v1, %v5051_v38 }
 0x49f   : > { %v1997_v30 = vpop.permute.xlu0 %1996 }
 0x4a0   : > { %v1999_v54 = vpop.permute.xlu1 %1998  ;;  %v5058_v22 = vsel %vm2000_vm7, %v1995_v47, %v1997_v30  ;;  %5727 = vst [vmem:[#allocation6_spill] sm:$0xff] %v5074_v59 }
 0x4a1   : > { %v5065_v42 = vsel %vm2000_vm7, %v1997_v30, %v1999_v54  ;;  %v2030_v40 = vmul.f32 %v2022_v36, %v5058_v22  ;;  %v5084_v34 = vmul.f32 %v2636_v17, %v5058_v22  ;;  %v5088_v33 = vsel %vm2000_vm7, %v1999_v54, %v1993_v2  ;;  %v3779_v17 = vld [vmem:[%s5638_s2 + $0x8] sm:$0xf] }
 0x4a2   : > { %v2027_v23 = vmul.f32 %v2010_v51, %v5065_v42  ;;  %v5099_v53 = vmul.f32 %v2640_v62, %v5065_v42  ;;  %v2028_v49 = vmul.f32 %v2014_v43, %v5088_v33  ;;  %v5119_v31 = vmul.f32 %v2644_v63, %v5088_v33  ;;  %v3780_v51 = vld [vmem:[%s5638_s2 + $0xc] sm:$0xf] }
 0x4a3   : > { %v2036_v20 = vpop.permute.xlu0 %2035  ;;  %5729 = vst [vmem:[#allocation9_spill] sm:$0xff] %v5084_v34  ;;  %v2177_v62 = vrot.slane %v5134_v41, %v4342_v58  ;;  %v2106_v63 = vrot.slane %v3779_v17, %v4377_v11 }
 0x4a4   : > { %v2038_v25 = vpop.permute.xlu1 %2037  ;;  %5730 = vst [vmem:[#allocation13_spill] sm:$0xff] %v5099_v53  ;;  %5733 = vst [vmem:[#allocation12_spill] sm:$0xff] %v5119_v31 }
 0x4a5   : > { %v5069_v21 = vsel %vm2043_vm6, %v2036_v20, %v2038_v25 }
 0x4a6   : > { %v5077_v16 = vmul.f32 %v2663_v37, %v5069_v21  ;;  %v2073_v18 = vmul.f32 %v2062_v61, %v5069_v21  ;;  %v2154_v61 = vrot.slane %v3780_v51, %v4367_v4 }
 0x4a7   : > { %v2040_v26 = vpop.permute.xlu0 %2039 }
 0x4a8   : > { %5728 = vst [vmem:[#allocation5_spill] sm:$0xff] %v5077_v16  ;;  %v5096_v0 = vsel %vm2043_vm6, %v2038_v25, %v2040_v26  ;;  %v2042_v19 = vpop.permute.xlu1 %2041  ;;  %v3985_v47 = vpack.c.bf16 %v2073_v18, %v2029_v13  ;;  %v2110_v25 = vrot.slane %v3779_v17, %v4367_v4  ;;  %v5322_v16 = vld [vmem:[%s5638_s2 + $0x30] sm:$0xf] }
 0x4a9   : > { %v2074_v15 = vmul.f32 %v2066_v6, %v5096_v0  ;;  %v5103_v5 = vmul.f32 %v2667_v10, %v5096_v0  ;;  %v5107_v35 = vsel %vm2043_vm6, %v2040_v26, %v2042_v19  ;;  %v5112_v52 = vsel %vm2043_vm6, %v2042_v19, %v2036_v20 }
 0x4aa   : > { %v2071_v29 = vmul.f32 %v2054_v39, %v5107_v35  ;;  %v5116_v3 = vmul.f32 %v2671_v7, %v5107_v35  ;;  %v2072_v56 = vmul.f32 %v2058_v46, %v5112_v52  ;;  %v5123_v44 = vmul.f32 %v2675_v14, %v5112_v52  ;;  %v3782_v46 = vld [vmem:[%s5638_s2 + $0x14] sm:$0xf] }
 0x4ab   : > { %5731 = vst [vmem:[#allocation11_spill] sm:$0xff] %v5103_v5  ;;  %v2080_v28 = vpop.permute.xlu0 %2079  ;;  %v3983_v2 = vpack.c.bf16 %v2074_v15, %v2030_v40  ;;  %v2150_v20 = vrot.slane %v3780_v51, %v4377_v11  ;;  %v2098_v6 = vrot.slane %v3779_v17, %v4349_v60  ;;  %v2142_v39 = vrot.slane %v3780_v51, %v4349_v60 }
 0x4ac   : > { %5732 = vst [vmem:[#allocation14_spill] sm:$0xff] %v5116_v3  ;;  %5734 = vst [vmem:[#allocation10_spill] sm:$0xff] %v5123_v44  ;;  %v3933_v48 = vpack.c.bf16 %v2071_v29, %v2027_v23  ;;  %v2082_v30 = vpop.permute.xlu1 %2081  ;;  %v3931_v54 = vpack.c.bf16 %v2072_v56, %v2028_v49  ;;  %v2102_v14 = vrot.slane %v3779_v17, %v4342_v58 }
 0x4ad   : > { %3984 = vmatprep.subr.bf16.mxu1 %v3983_v2  ;;  %v2146_v26 = vrot.slane %v3780_v51, %v4342_v58  ;;  %v5165_v23 = vsel %vm2087_vm9, %v2080_v28, %v2082_v30  ;;  %v2221_v2 = vrot.slane %v3782_v46, %v4342_v58 }
 0x4ae   : > { %3986 = vmatpush1.bf16.msra.mxu1 %v3985_v47  ;;  %3932 = vmatprep.subr.bf16.mxu0 %v3931_v54  ;;  %v2117_v54 = vmul.f32 %v2106_v63, %v5165_v23  ;;  %v2229_v63 = vrot.slane %v3782_v46, %v4367_v4 }
 0x4af   : > { %v2084_v27 = vpop.permute.xlu0 %2083  ;;  %3934 = vmatpush1.bf16.msra.mxu0 %v3933_v48 }
 0x4b0   : > { %v2086_v36 = vpop.permute.xlu1 %2085  ;;  %v5159_v7 = vsel %vm2087_vm9, %v2082_v30, %v2084_v27 }
 0x4b1   : > { %v5162_v13 = vsel %vm2087_vm9, %v2084_v27, %v2086_v36  ;;  %v5167_v18 = vsel %vm2087_vm9, %v2086_v36, %v2080_v28  ;;  %v2118_v28 = vmul.f32 %v2110_v25, %v5159_v7 }
 0x4b2   : > { %v2115_v47 = vmul.f32 %v2098_v6, %v5162_v13  ;;  %v2116_v27 = vmul.f32 %v2102_v14, %v5167_v18  ;;  %v2191_v14 = vmul.f32 %v2177_v62, %v4968_v32 }
 0x4b3   : > { %v2124_v37 = vpop.permute.xlu0 %2123 }
 0x4b4   : > { %v2126_v43 = vpop.permute.xlu1 %2125 }
 0x4b5   : > { %v5153_v10 = vsel %vm2131_vm8, %v2124_v37, %v2126_v43 }
 0x4b6   : > { %v2161_v49 = vmul.f32 %v2150_v20, %v5153_v10 }
 0x4b7   : > { %v2128_v40 = vpop.permute.xlu0 %2127 }
 0x4b8   : > { %v5171_v19 = vsel %vm2131_vm8, %v2126_v43, %v2128_v40  ;;  %v2130_v15 = vpop.permute.xlu1 %2129 }
 0x4b9   : > { %v2162_v29 = vmul.f32 %v2154_v61, %v5171_v19  ;;  %v5178_v56 = vsel %vm2131_vm8, %v2128_v40, %v2130_v15  ;;  %v5185_v48 = vsel %vm2131_vm8, %v2130_v15, %v2124_v37  ;;  %v3989_v61 = vpack.c.bf16 %v2161_v49, %v2117_v54 }
 0x4ba   : > { %v2159_v30 = vmul.f32 %v2142_v39, %v5178_v56  ;;  %v2160_v36 = vmul.f32 %v2146_v26, %v5185_v48  ;;  %v2225_v37 = vrot.slane %v3782_v46, %v4377_v11  ;;  %v2185_v40 = vrot.slane %v5134_v41, %v4367_v4 }
 0x4bb   : > { %v2199_v17 = vpop.permute.xlu0 %2198  ;;  %v3987_v20 = vpack.c.bf16 %v2162_v29, %v2118_v28  ;;  %v2181_v26 = vrot.slane %v5134_v41, %v4377_v11  ;;  %v2173_v49 = vrot.slane %v5134_v41, %v4349_v60  ;;  %v2217_v29 = vrot.slane %v3782_v46, %v4349_v60 }
 0x4bc   : > { %v3937_v51 = vpack.c.bf16 %v2159_v30, %v2115_v47  ;;  %v2201_v43 = vpop.permute.xlu1 %2200  ;;  %v3935_v6 = vpack.c.bf16 %v2160_v36, %v2116_v27  ;;  %v2193_v46 = vmul.f32 %v2185_v40, %v4974_v9  ;;  %v3784_v40 = vld [vmem:[%s5638_s2 + $0x1c] sm:$0xf] }
 0x4bd   : > { %v5193_v25 = vsel %vm2206_vm10, %v2199_v17, %v2201_v43  ;;  %3988 = vmatprep.subr.bf16.mxu1 %v3987_v20  ;;  %v2192_v27 = vmul.f32 %v2181_v26, %v4970_v24  ;;  %v2190_v36 = vmul.f32 %v2173_v49, %v4976_v50  ;;  %v2317_v1 = vrot.slane %v3784_v40, %v4367_v4 }
 0x4be   : > { %v2235_v39 = vmul.f32 %v2221_v2, %v5193_v25  ;;  %3936 = vmatprep.subr.bf16.mxu0 %v3935_v6  ;;  %3990 = vmatpush1.bf16.msra.mxu1 %v3989_v61  ;;  %v2305_v45 = vrot.slane %v3784_v40, %v4349_v60 }
 0x4bf   : > { %v2203_v15 = vpop.permute.xlu0 %2202  ;;  %3938 = vmatpush1.bf16.msra.mxu0 %v3937_v51 }
 0x4c0   : > { %v5208_v2 = vsel %vm2206_vm10, %v2201_v43, %v2203_v15  ;;  %v2205_v62 = vpop.permute.xlu1 %2204  ;;  %v3939_v28 = vpack.c.bf16 %v2235_v39, %v2191_v14  ;;  %v5232_v39 = vld [vmem:[%s5638_s2 + $0x24] sm:$0xf] }
 0x4c1   : > { %v2236_v47 = vmul.f32 %v2225_v37, %v5208_v2  ;;  %v5213_v30 = vsel %vm2206_vm10, %v2203_v15, %v2205_v62  ;;  %v5217_v54 = vsel %vm2206_vm10, %v2205_v62, %v2199_v17  ;;  %v5227_v17 = vld [vmem:[%s5638_s2 + $0x58] sm:$0xf]  ;;  %v5244_v15 = vld [vmem:[%s5638_s2 + $0x28] sm:$0xf] }
 0x4c2   : > { %v2237_v41 = vmul.f32 %v2229_v63, %v5213_v30  ;;  %3940 = vmatprep.subr.bf16.mxu0 %v3939_v28  ;;  %v2234_v51 = vmul.f32 %v2217_v29, %v5217_v54  ;;  %v3783_v63 = vld [vmem:[%s5638_s2 + $0x18] sm:$0xf]  ;;  %v2313_v29 = vrot.slane %v3784_v40, %v4377_v11 }
 0x4c3   : > { %v2243_v43 = vpop.permute.xlu0 %2242  ;;  %v3993_v6 = vpack.c.bf16 %v2236_v47, %v2192_v27  ;;  %v2384_v47 = vrot.slane %v5232_v39, %v4342_v58  ;;  %v2309_v27 = vrot.slane %v3784_v40, %v4342_v58  ;;  %v2273_v12 = vrot.slane %v3783_v63, %v4367_v4 }
 0x4c4   : > { %v2245_v20 = vpop.permute.xlu1 %2244  ;;  %v3991_v61 = vpack.c.bf16 %v2237_v41, %v2193_v46  ;;  %v3941_v37 = vpack.c.bf16 %v2234_v51, %v2190_v36  ;;  %v5259_v41 = vld [vmem:[%s5638_s2 + $0x2c] sm:$0xf]  ;;  %v2265_v46 = vrot.slane %v3783_v63, %v4342_v58  ;;  %v2269_v36 = vrot.slane %v3783_v63, %v4377_v11 }
 0x4c5   : > { %v2261_v28 = vrot.slane %v3783_v63, %v4349_v60  ;;  %v2442_v40 = vrot.slane %v5259_v41, %v4349_v60 }
 0x4c6   : > { %3992 = vmatprep.subr.bf16.mxu1 %v3991_v61  ;;  %3942 = vmatpush1.bf16.msra.mxu0 %v3941_v37 }
 0x4c7   : > { %3994 = vmatpush1.bf16.msra.mxu1 %v3993_v6  ;;  %v2247_v14 = vpop.permute.xlu0 %2246  ;;  %v5272_v6 = vsel %vm2250_vm11, %v2243_v43, %v2245_v20 }
 0x4c8   : > { %v2249_v26 = vpop.permute.xlu1 %2248  ;;  %v2279_v57 = vmul.f32 %v2265_v46, %v5272_v6  ;;  %v3785_v46 = vld [vmem:[%s5638_s2 + $0x20] sm:$0xf] }
 0x4c9   : > { %v5299_v62 = vsel %vm2250_vm11, %v2247_v14, %v2249_v26  ;;  %v5311_v53 = vsel %vm2250_vm11, %v2249_v26, %v2243_v43  ;;  %v2353_v26 = vrot.slane %v3785_v46, %v4342_v58  ;;  %v2357_v5 = vrot.slane %v3785_v46, %v4377_v11 }
 0x4cb   : > { %v2287_v37 = vpop.permute.xlu0 %2286 }
 0x4cc   : > { %v2289_v8 = vpop.permute.xlu1 %2288 }
 0x4cd   : > { %v5288_v49 = vsel %vm2294_vm12, %v2287_v37, %v2289_v8 }
 0x4ce   : > { %5735 = vst [vmem:[#allocation8_spill] sm:$0xff] %v5288_v49  ;;  %v2323_v51 = vmul.f32 %v2309_v27, %v5288_v49  ;;  %v5307_v27 = vsel %vm2250_vm11, %v2245_v20, %v2247_v14 }
 0x4cf   : > { %v2291_v61 = vpop.permute.xlu0 %2290 }
 0x4d0   : > { %v5315_v63 = vsel %vm2294_vm12, %v2289_v8, %v2291_v61  ;;  %v2293_v3 = vpop.permute.xlu1 %2292  ;;  %v3943_v59 = vpack.c.bf16 %v2323_v51, %v2279_v57  ;;  %v2281_v8 = vmul.f32 %v2273_v12, %v5299_v62  ;;  %v2280_v51 = vmul.f32 %v2269_v36, %v5307_v27 }
 0x4d1   : > { %v2324_v20 = vmul.f32 %v2313_v29, %v5315_v63  ;;  %v5327_v43 = vsel %vm2294_vm12, %v2291_v61, %v2293_v3  ;;  %v5333_v57 = vsel %vm2294_vm12, %v2293_v3, %v2287_v37  ;;  %v2454_v29 = vrot.slane %v5259_v41, %v4367_v4 }
 0x4d2   : > { %5736 = vst [vmem:[#allocation15_spill] sm:$0xff] %v5327_v43  ;;  %5737 = vst [vmem:[#allocation16_spill] sm:$0xff] %v5333_v57  ;;  %v2325_v14 = vmul.f32 %v2317_v1, %v5327_v43  ;;  %3944 = vmatprep.subr.bf16.mxu0 %v3943_v59  ;;  %v2278_v61 = vmul.f32 %v2261_v28, %v5311_v53  ;;  %v2322_v31 = vmul.f32 %v2305_v45, %v5333_v57  ;;  %v5351_v1 = vld [vmem:[%s5638_s2 + $0x38] sm:$0xf]  ;;  %v5364_v43 = vld [vmem:[%s5638_s2 + $0x3c] sm:$0xf] }
 0x4d3   : > { %v2331_v44 = vpop.permute.xlu0 %2330  ;;  %v2477_v12 = vrot.slane %v5322_v16, %v4342_v58  ;;  %v3997_v28 = vpack.c.bf16 %v2324_v20, %v2280_v51  ;;  %v2398_v3 = vmul.f32 %v2384_v47, %v5051_v38  ;;  %v2485_v59 = vrot.slane %v5322_v16, %v4367_v4 }
 0x4d4   : > { %v2333_v36 = vpop.permute.xlu1 %2332  ;;  %v3995_v37 = vpack.c.bf16 %v2325_v14, %v2281_v8  ;;  %v3945_v34 = vpack.c.bf16 %v2322_v31, %v2278_v61  ;;  %v2361_v31 = vrot.slane %v3785_v46, %v4367_v4  ;;  %v2512_v14 = vrot.slane %v5351_v1, %v4342_v58 }
 0x4d5   : > { %v5355_v45 = vsel %vm2338_vm13, %v2331_v44, %v2333_v36  ;;  %v2349_v47 = vrot.slane %v3785_v46, %v4349_v60  ;;  %v2539_v46 = vrot.slane %v5364_v43, %v4349_v60 }
 0x4d6   : > { %5738 = vst [vmem:[#allocation17_spill] sm:$0xff] %v5355_v45  ;;  %v2367_v8 = vmul.f32 %v2353_v26, %v5355_v45  ;;  %3996 = vmatprep.subr.bf16.mxu1 %v3995_v37  ;;  %3946 = vmatpush1.bf16.msra.mxu0 %v3945_v34  ;;  %v2520_v26 = vrot.slane %v5351_v1, %v4367_v4 }
 0x4d7   : > { %3998 = vmatpush1.bf16.msra.mxu1 %v3997_v28  ;;  %v2335_v38 = vpop.permute.xlu0 %2334  ;;  %v5739_v34 = vrot.slane %v5232_v39, %v4367_v4 }
 0x4d8   : > { %v5379_v61 = vsel %vm2338_vm13, %v2333_v36, %v2335_v38  ;;  %v2337_v37 = vpop.permute.xlu1 %2336  ;;  %v3947_v20 = vpack.c.bf16 %v2398_v3, %v2367_v8  ;;  %v5740_v36 = vrot.slane %v5259_v41, %v4342_v58  ;;  %v2462_v3 = vmul.f32 %v2454_v29, %v5162_v13 }
 0x4d9   : > { %v2400_v28 = vmul.f32 %v5739_v34, %v5065_v42  ;;  %v2368_v49 = vmul.f32 %v2357_v5, %v5379_v61  ;;  %v5390_v51 = vsel %vm2338_vm13, %v2335_v38, %v2337_v37  ;;  %v5399_v8 = vsel %vm2338_vm13, %v2337_v37, %v2331_v44 }
 0x4da   : > { %v2460_v45 = vmul.f32 %v5740_v36, %v5165_v23  ;;  %v2369_v42 = vmul.f32 %v2361_v31, %v5390_v51  ;;  %3948 = vmatprep.subr.bf16.mxu0 %v3947_v20  ;;  %v5741_v5 = vrot.slane %v5232_v39, %v4377_v11  ;;  %v5742_v34 = vrot.slane %v5232_v39, %v4349_v60 }
 0x4db   : > { %v2543_v29 = vrot.slane %v5364_v43, %v4342_v58  ;;  %v2366_v55 = vmul.f32 %v2349_v47, %v5399_v8  ;;  %v5743_v44 = vrot.slane %v5244_v15, %v4342_v58  ;;  %v5744_v20 = vrot.slane %v5244_v15, %v4367_v4 }
 0x4dc   : > { %v2399_v38 = vmul.f32 %v5741_v5, %v5058_v22  ;;  %v2397_v57 = vmul.f32 %v5742_v34, %v5088_v33  ;;  %v2551_v37 = vrot.slane %v5364_v43, %v4367_v4  ;;  %v3999_v39 = vpack.c.bf16 %v2400_v28, %v2369_v42 }
 0x4dd   : > { %v2429_v31 = vmul.f32 %v5743_v44, %v5069_v21  ;;  %v2431_v22 = vmul.f32 %v5744_v20, %v5107_v35  ;;  %v5745_v33 = vrot.slane %v5259_v41, %v4377_v11  ;;  %v2459_v47 = vmul.f32 %v2442_v40, %v5167_v18  ;;  %v5431_v21 = vld [vmem:[%s5638_s2 + $0x40] sm:$0xf] }
 0x4de   : > { %v4001_v5 = vpack.c.bf16 %v2399_v38, %v2368_v49  ;;  %v3949_v34 = vpack.c.bf16 %v2397_v57, %v2366_v55  ;;  %v2491_v35 = vmul.f32 %v2477_v12, %v5153_v10  ;;  %v2493_v44 = vmul.f32 %v2485_v59, %v5178_v56  ;;  %4000 = vmatprep.subr.bf16.mxu1 %v3999_v39  ;;  %v3793_v57 = vld [vmem:[%s5638_s2 + $0x44] sm:$0xf] }
 0x4df   : > { %v2461_v36 = vmul.f32 %v5745_v33, %v5159_v7  ;;  %v3951_v28 = vpack.c.bf16 %v2460_v45, %v2429_v31  ;;  %v4003_v42 = vpack.c.bf16 %v2462_v3, %v2431_v22  ;;  %v5746_v41 = vrot.slane %v5244_v15, %v4377_v11 }
 0x4e0   : > { %v5747_v40 = vrot.slane %v5244_v15, %v4349_v60  ;;  %v2547_v49 = vrot.slane %v5364_v43, %v4377_v11  ;;  %3950 = vmatpush1.bf16.msra.mxu0 %v3949_v34  ;;  %4002 = vmatpush1.bf16.msra.mxu1 %v4001_v5  ;;  %v2570_v12 = vrot.slane %v5431_v21, %v4349_v60 }
 0x4e1   : > { %v2430_v20 = vmul.f32 %v5746_v41, %v5096_v0  ;;  %v2605_v59 = vrot.slane %v3793_v57, %v4342_v58  ;;  %v2613_v0 = vrot.slane %v3793_v57, %v4367_v4  ;;  %3952 = vmatprep.subr.bf16.mxu0 %v3951_v28  ;;  %4004 = vmatprep.subr.bf16.mxu1 %v4003_v42 }
 0x4e2   : > { %v2428_v33 = vmul.f32 %v5747_v40, %v5112_v52  ;;  %v5748_v43 = vrot.slane %v5322_v16, %v4377_v11  ;;  %v5749_v3 = vrot.slane %v5322_v16, %v4349_v60  ;;  %v2557_v55 = vmul.f32 %v2543_v29, %v5307_v27 }
 0x4e3   : > { %v4005_v15 = vpack.c.bf16 %v2461_v36, %v2430_v20  ;;  %v2559_v31 = vmul.f32 %v2551_v37, %v5311_v53  ;;  %v3955_v22 = vpack.c.bf16 %v4970_v24, %v2491_v35  ;;  %v4007_v39 = vpack.c.bf16 %v4976_v50, %v2493_v44 }
 0x4e4   : > { %v3953_v52 = vpack.c.bf16 %v2459_v47, %v2428_v33  ;;  %v2492_v45 = vmul.f32 %v5748_v43, %v5171_v19  ;;  %v2490_v38 = vmul.f32 %v5749_v3, %v5185_v48  ;;  %v2574_v36 = vrot.slane %v5431_v21, %v4342_v58 }
 0x4e5   : > { %v2582_v47 = vrot.slane %v5431_v21, %v4367_v4  ;;  %v2601_v5 = vrot.slane %v3793_v57, %v4349_v60  ;;  %4006 = vmatpush1.bf16.msra.mxu1 %v4005_v15  ;;  %v2526_v16 = vmul.f32 %v2512_v14, %v5208_v2  ;;  %v2528_v29 = vmul.f32 %v2520_v26, %v5217_v54  ;;  %v5753_v15 = vld [vmem:[#allocation16_spill] sm:$0xff] }
 0x4e6   : > { %3954 = vmatpush1.bf16.msra.mxu0 %v3953_v52  ;;  %v2609_v37 = vrot.slane %v3793_v57, %v4377_v11  ;;  %4008 = vmatprep.subr.bf16.mxu1 %v4007_v39  ;;  %v4009_v34 = vpack.c.bf16 %v4974_v9, %v2492_v45  ;;  %v3957_v35 = vpack.c.bf16 %v4968_v32, %v2490_v38  ;;  %v5754_v45 = vld [vmem:[#allocation17_spill] sm:$0xff] }
 0x4e7   : > { %3956 = vmatprep.subr.bf16.mxu0 %v3955_v22  ;;  %v2556_v44 = vmul.f32 %v2539_v46, %v5272_v6  ;;  %v2558_v28 = vmul.f32 %v2547_v49, %v5299_v62  ;;  %v2619_v42 = vmul.f32 %v2605_v59, %v5379_v61  ;;  %v2621_v41 = vmul.f32 %v2613_v0, %v5399_v8 }
 0x4e8   : > { %v3959_v20 = vpack.c.bf16 %v2557_v55, %v2526_v16  ;;  %v4011_v14 = vpack.c.bf16 %v2559_v31, %v2528_v29  ;;  %v5750_v26 = vrot.slane %v5351_v1, %v4349_v60  ;;  %v5751_v33 = vrot.slane %v5351_v1, %v4377_v11  ;;  %v3797_v1 = vld [vmem:[%s5638_s2 + $0x54] sm:$0xf]  ;;  %v5755_v16 = vld [vmem:[#allocation8_spill] sm:$0xff] }
 0x4e9   : > { %v2578_v46 = vrot.slane %v5431_v21, %v4377_v11  ;;  %4010 = vmatpush1.bf16.msra.mxu1 %v4009_v34  ;;  %v5752_v49 = vrot.slane %v5227_v17, %v4349_v60  ;;  %v2588_v0 = vmul.f32 %v2574_v36, %v5315_v63  ;;  %v2590_v52 = vmul.f32 %v2582_v47, %v5753_v15  ;;  %v3796_v36 = vld [vmem:[%s5638_s2 + $0x50] sm:$0xf]  ;;  %v3799_v47 = vld [vmem:[%s5638_s2 + $0x5c] sm:$0xf]  ;;  %v5756_v34 = vld [vmem:[#allocation15_spill] sm:$0xff] }
 0x4ea   : > { %v2525_v40 = vmul.f32 %v5750_v26, %v5193_v25  ;;  %v2527_v57 = vmul.f32 %v5751_v33, %v5213_v30  ;;  %3958 = vmatpush1.bf16.msra.mxu0 %v3957_v35  ;;  %4012 = vmatprep.subr.bf16.mxu1 %v4011_v14  ;;  %v2618_v3 = vmul.f32 %v2601_v5, %v5754_v45 }
 0x4eb   : > { %v5492_v59 = vmul.f32 %v5752_v49, %v4970_v24  ;;  %3960 = vmatprep.subr.bf16.mxu0 %v3959_v20  ;;  %v2620_v38 = vmul.f32 %v2609_v37, %v5390_v51  ;;  %v2729_v55 = vrot.slane %v3797_v1, %v4342_v58  ;;  %v2737_v31 = vrot.slane %v3797_v1, %v4367_v4  ;;  %v3801_v49 = vld [vmem:[%s5638_s2 + $0x64] sm:$0xf] }
 0x4ec   : > { %v3961_v43 = vpack.c.bf16 %v2556_v44, %v2525_v40  ;;  %v4013_v21 = vpack.c.bf16 %v2558_v28, %v2527_v57  ;;  %v3963_v22 = vpack.c.bf16 %v2619_v42, %v2588_v0  ;;  %v4015_v39 = vpack.c.bf16 %v2621_v41, %v2590_v52 }
 0x4ed   : > { %v2587_v29 = vmul.f32 %v2570_v12, %v5755_v16  ;;  %v2589_v5 = vmul.f32 %v2578_v46, %v5756_v34  ;;  %v5757_v37 = vrot.slane %v5227_v17, %v4342_v58  ;;  %v2698_v44 = vrot.slane %v3796_v36, %v4342_v58 }
 0x4ee   : > { %3962 = vmatpush1.bf16.msra.mxu0 %v3961_v43  ;;  %4014 = vmatpush1.bf16.msra.mxu1 %v4013_v21  ;;  %v2706_v28 = vrot.slane %v3796_v36, %v4367_v4  ;;  %v5758_v42 = vrot.slane %v5227_v17, %v4367_v4  ;;  %v2725_v41 = vrot.slane %v3797_v1, %v4349_v60  ;;  %v3800_v21 = vld [vmem:[%s5638_s2 + $0x60] sm:$0xf] }
 0x4ef   : > { %v2774_v35 = vmul.f32 %v5757_v37, %v4974_v9  ;;  %3964 = vmatprep.subr.bf16.mxu0 %v3963_v22  ;;  %4016 = vmatprep.subr.bf16.mxu1 %v4015_v39  ;;  %v2733_v20 = vrot.slane %v3797_v1, %v4377_v11  ;;  %v3965_v14 = vpack.c.bf16 %v2618_v3, %v2587_v29  ;;  %v5759_v3 = vld [vmem:[#allocation11_spill] sm:$0xff]  ;;  %v5763_v22 = vld [vmem:[#allocation12_spill] sm:$0xff] }
 0x4f0   : > { %v2776_v12 = vmul.f32 %v5758_v42, %v4968_v32  ;;  %v4017_v26 = vpack.c.bf16 %v2620_v38, %v2589_v5  ;;  %v2743_v40 = vmul.f32 %v2729_v55, %v5171_v19  ;;  %v2745_v33 = vmul.f32 %v2737_v31, %v5185_v48  ;;  %v5760_v38 = vld [vmem:[#allocation9_spill] sm:$0xff]  ;;  %v5762_v31 = vld [vmem:[#allocation10_spill] sm:$0xff] }
 0x4f1   : > { %v2799_v57 = vrot.slane %v3799_v47, %v4367_v4  ;;  %v2791_v46 = vrot.slane %v3799_v47, %v4342_v58  ;;  %v2694_v0 = vrot.slane %v3796_v36, %v4349_v60  ;;  %v2702_v52 = vrot.slane %v3796_v36, %v4377_v11 }
 0x4f2   : > { %v2787_v1 = vrot.slane %v3799_v47, %v4349_v60  ;;  %3966 = vmatpush1.bf16.msra.mxu0 %v3965_v14  ;;  %4018 = vmatpush1.bf16.msra.mxu1 %v4017_v26  ;;  %v2712_v19 = vmul.f32 %v2698_v44, %v5159_v7  ;;  %v2714_v48 = vmul.f32 %v2706_v28, %v5167_v18  ;;  %v5765_v26 = vld [vmem:[#allocation5_spill] sm:$0xff] }
 0x4f3   : > { %v2795_v43 = vrot.slane %v3799_v47, %v4377_v11  ;;  %v5761_v55 = vpack.c.bf16 %v5759_v3, %v5760_v38  ;;  %v5764_v39 = vpack.c.bf16 %v5762_v31, %v5763_v22  ;;  %v2742_v36 = vmul.f32 %v2725_v41, %v5153_v10  ;;  %v5766_v10 = vld [vmem:[#allocation6_spill] sm:$0xff] }
 0x4f4   : > { %v2744_v7 = vmul.f32 %v2733_v20, %v5178_v56  ;;  %v2861_v18 = vrot.slane %v3801_v49, %v4367_v4  ;;  %v2853_v47 = vrot.slane %v3801_v49, %v4342_v58  ;;  %v2807_v29 = vmul.f32 %v2799_v57, %v5193_v25  ;;  %v5768_v56 = vld [vmem:[#allocation14_spill] sm:$0xff]  ;;  %v5769_v20 = vld [vmem:[#allocation13_spill] sm:$0xff] }
 0x4f5   : > { %3968 = vmatprep.subr.bf16.mxu0 %v5761_v55  ;;  %4020 = vmatprep.subr.bf16.mxu1 %v5764_v39  ;;  %v2805_v5 = vmul.f32 %v2791_v46, %v5213_v30  ;;  %v3971_v37 = vpack.c.bf16 %v2743_v40, %v2712_v19  ;;  %v4023_v44 = vpack.c.bf16 %v2745_v33, %v2714_v48 }
 0x4f6   : > { %v2711_v28 = vmul.f32 %v2694_v0, %v5165_v23  ;;  %v2713_v42 = vmul.f32 %v2702_v52, %v5162_v13  ;;  %v2830_v14 = vrot.slane %v3800_v21, %v4367_v4  ;;  %v5767_v41 = vpack.c.bf16 %v5765_v26, %v5766_v10 }
 0x4f7   : > { %v5770_v3 = vpack.c.bf16 %v5768_v56, %v5769_v20  ;;  %v2822_v25 = vrot.slane %v3800_v21, %v4342_v58  ;;  %v2849_v30 = vrot.slane %v3801_v49, %v4349_v60  ;;  %v2857_v40 = vrot.slane %v3801_v49, %v4377_v11 }
 0x4f8   : > { %3970 = vmatpush1.bf16.msra.mxu0 %v5767_v41  ;;  %v3973_v23 = vpack.c.bf16 %v2742_v36, %v2711_v28  ;;  %v4025_v13 = vpack.c.bf16 %v2744_v7, %v2713_v42  ;;  %v2804_v33 = vmul.f32 %v2787_v1, %v5208_v2  ;;  %v2806_v57 = vmul.f32 %v2795_v43, %v5217_v54  ;;  %v3802_v2 = vld [vmem:[%s5638_s2 + $0x68] sm:$0xf] }
 0x4f9   : > { %4022 = vmatpush1.bf16.msra.mxu1 %v5770_v3  ;;  %3972 = vmatprep.subr.bf16.mxu0 %v3971_v37  ;;  %v2869_v46 = vmul.f32 %v2861_v18, %v5755_v16  ;;  %v2867_v0 = vmul.f32 %v2853_v47, %v5756_v34  ;;  %v3975_v52 = vpack.c.bf16 %v2805_v5, %v2774_v35  ;;  %v3171_v5 = vpop.permute.xlu1 %3170 }
 0x4fa   : > { %4024 = vmatprep.subr.bf16.mxu1 %v4023_v44  ;;  %v4027_v19 = vpack.c.bf16 %v2807_v29, %v2776_v12  ;;  %v5771_v48 = vrot.slane %v5227_v17, %v4377_v11  ;;  %v2818_v49 = vrot.slane %v3800_v21, %v4349_v60  ;;  %v2826_v55 = vrot.slane %v3800_v21, %v4377_v11 }
 0x4fb   : > { %v2838_v54 = vmul.f32 %v2830_v14, %v5272_v6  ;;  %v2836_v16 = vmul.f32 %v2822_v25, %v5299_v62  ;;  %v3977_v34 = vpack.c.bf16 %v2804_v33, %v5492_v59  ;;  %v2866_v35 = vmul.f32 %v2849_v30, %v5315_v63 }
 0x4fc   : > { %v2775_v38 = vmul.f32 %v5771_v48, %v4976_v50  ;;  %3974 = vmatpush1.bf16.msra.mxu0 %v3973_v23  ;;  %v2868_v12 = vmul.f32 %v2857_v40, %v5753_v15  ;;  %v2884_v21 = vrot.slane %v3802_v2, %v4342_v58  ;;  %v2892_v31 = vrot.slane %v3802_v2, %v4367_v4 }
 0x4fd   : > { %4026 = vmatpush1.bf16.msra.mxu1 %v4025_v13  ;;  %3976 = vmatprep.subr.bf16.mxu0 %v3975_v52  ;;  %v3979_v1 = vpack.c.bf16 %v2867_v0, %v2836_v16  ;;  %v4031_v43 = vpack.c.bf16 %v2869_v46, %v2838_v54  ;;  %v2835_v22 = vmul.f32 %v2818_v49, %v5307_v27  ;;  %v5772_v27 = vld [vmem:[#allocation7_spill] sm:$0xff] }
 0x4fe   : > { %4028 = vmatprep.subr.bf16.mxu1 %v4027_v19  ;;  %v4029_v17 = vpack.c.bf16 %v2806_v57, %v2775_v38  ;;  %v2837_v6 = vmul.f32 %v2826_v55, %v5311_v53  ;;  %v2880_v63 = vrot.slane %v3802_v2, %v4349_v60  ;;  %v2888_v15 = vrot.slane %v3802_v2, %v4377_v11  ;;  %v3018_v11 = vpop.permute.xlu0 %3017  ;;  %v3358_v2 = vld [vmem:[%s5647_s11] sm:$0xf] }
 0x4ff   : > { %v3981_v62 = vpack.c.bf16 %v2866_v35, %v2835_v22  ;;  %v2898_v39 = vmul.f32 %v2884_v21, %v5390_v51  ;;  %v2900_v58 = vmul.f32 %v2892_v31, %v5754_v45  ;;  %v5773_v60 = vmov 0.0  }
 0x500   : > { %3978 = vmatpush1.bf16.msra.mxu0 %v3977_v34  ;;  %v4033_v59 = vpack.c.bf16 %v2868_v12, %v2837_v6  ;;  %v2897_v4 = vmul.f32 %v2880_v63, %v5379_v61  ;;  %v2899_v53 = vmul.f32 %v2888_v15, %v5399_v8  ;;  %v3166_v8 = vld [vmem:[%s5645_s9] sm:$0xff] }
 0x501   : > { %4030 = vmatpush1.bf16.msra.mxu1 %v4029_v17  ;;  %3980 = vmatprep.subr.bf16.mxu0 %v3979_v1  ;;  %v5774_v34 = vld [vmem:[#allocation3_spill] sm:$0xff]  ;;  %v4102_v17 = vld [vmem:[%s4239_s25 + $0x8] sm:$0xff] }
 0x502   : > { %4032 = vmatprep.subr.bf16.mxu1 %v4031_v43  ;;  %v3665_v43 = vpop.permute.xlu1 %3664 }
 0x504   : > { %3982 = vmatpush1.bf16.msra.mxu0 %v3981_v62 }
 0x505   : > { %4034 = vmatpush1.bf16.msra.mxu1 %v4033_v59  ;;  %3076 = vmatprep.subr.mxu0 %v2898_v39 }
 0x506   : > { %3147 = vmatprep.subr.mxu1 %v2900_v58 }
 0x508   : > { %3077 = vmatpush1.msra.mxu0 %v2897_v4 }
 0x509   : > { %3148 = vmatpush1.msra.mxu1 %v2899_v53  ;;  %3089 = vmatmul.mubr.f32.vlgmr.msra.gmra.mrb[4].mxu0 %v5772_v27 }
 0x50a   : > { %3160 = vmatmul.mubr.f32.vlgmr.msra.gmra.mrb[4].mxu1 %v5772_v27  ;;  %3252 = vmatprep.mubr.f32.mxu0 %v5773_v60 }
 0x50b   : > { %3323 = vmatprep.mubr.f32.mxu1 %v5773_v60 }
 0x5dc   : > { %v3090_v51 = vpop.f32.mrb[4].mxu0 }
 0x5dd   : > { %v3161_v45 = vpop.f32.mrb[4].mxu1  ;;  %v3092_v36 = vpop.f32.mrb[5].mxu0  ;;  %v3091_v61 = vadd.f32 %v3090_v51, %v3018_v11 }
 0x5de   : > { %v3163_v7 = vpop.f32.mrb[5].mxu1  ;;  %v3093_v18 = vadd.f32 %v3092_v36, %v3018_v11  ;;  %v3162_v29 = vadd.f32 %v3161_v45, %v3018_v11 }
 0x5df   : > { %v3164_v47 = vadd.f32 %v3163_v7, %v3018_v11 }
 0x5e0   : > { %3805 = vmatprep.subr.msk.mxu0 %vm512_vm0, %v3093_v18 }
 0x5e1   : > { %3808 = vmatprep.subr.msk.mxu1 %vm512_vm0, %v3164_v47  ;;  %3806 = vmatpush1.msk.msra.mxu0 %vm512_vm0, %v3091_v61 }
 0x5e2   : > { %3809 = vmatpush1.msk.msra.mxu1 %vm512_vm0, %v3162_v29  ;;  %3807 = vmatmul.mubr.msk.f32.vlgmr.msra.gmra.mrb[6].mxu0 %vm508_vm1, %v3166_v8 }
 0x5e3   : > { %3810 = vmatmul.mubr.msk.f32.vlgmr.msra.gmra.mrb[6].mxu1 %vm508_vm1, %v3166_v8  ;;  %3433 = vmatprep.mubr.f32.mxu0 %v5773_v60 }
 0x5e4   : > { %3504 = vmatprep.mubr.f32.mxu1 %v5773_v60 }
 0x6b5   : > { %v3254_v37 = vpop.f32.mrb[6].mxu0 }
 0x6b6   : > { %v3325_v44 = vpop.f32.mrb[6].mxu1  ;;  %v3255_v28 = vadd.f32 %v3254_v37, %v3171_v5  ;;  %v3256_v42 = vpop.f32.mrb[7].mxu0 }
 0x6b7   : > { %v3326_v14 = vadd.f32 %v3325_v44, %v3171_v5  ;;  %v3327_v26 = vpop.f32.mrb[7].mxu1  ;;  %v3257_v10 = vadd.f32 %v3256_v42, %v3171_v5 }
 0x6b8   : > { %v3328_v41 = vadd.f32 %v3327_v26, %v3171_v5  ;;  %v3811_v56 = vmul.f32 -1.442695, %v3255_v28 }
 0x6b9   : > { %v3813_v20 = vmul.f32 -1.442695, %v3326_v14  ;;  %v3812_v3 = vmul.f32 -1.442695, %v3257_v10 }
 0x6ba   : > { %v3814_v25 = vmul.f32 -1.442695, %v3328_v41  ;;  %4085 = vpow2.f32 %v3811_v56 }
 0x6bb   : > { %4087 = vpow2.f32 %v3812_v3 }
 0x6bc   : > { %4089 = vpow2.f32 %v3813_v20 }
 0x6bd   : > { %4091 = vpow2.f32 %v3814_v25 }
 0x6c4   : > { %v4086_v30 = vpop.eup %4085 }
 0x6c5   : > { %v4088_v40 = vpop.eup %4087  ;;  %v3342_v23 = vadd.f32 1.0, %v4086_v30 }
 0x6c6   : > { %v4090_v13 = vpop.eup %4089  ;;  %v3343_v33 = vadd.f32 1.0, %v4088_v40 }
 0x6c7   : > { %v4092_v57 = vpop.eup %4091  ;;  %4093 = vrcp.f32 %v3342_v23  ;;  %v3344_v46 = vadd.f32 1.0, %v4090_v13 }
 0x6c8   : > { %4095 = vrcp.f32 %v3343_v33  ;;  %v3345_v0 = vadd.f32 1.0, %v4092_v57 }
 0x6c9   : > { %4097 = vrcp.f32 %v3344_v46 }
 0x6ca   : > { %4099 = vrcp.f32 %v3345_v0 }
 0x6d1   : > { %v4094_v52 = vpop.eup %4093 }
 0x6d2   : > { %v4096_v19 = vpop.eup %4095  ;;  %v3354_v55 = vmul.f32 %v4094_v52, %v4968_v32  ;;  %v4101_v32 = vld [vmem:[%s4239_s25] sm:$0xff]  ;;  %s5776_s25 = sshll.u32 %s5778_s19, 4 }
 0x6d3   : > { %v4098_v48 = vpop.eup %4097  ;;  %v3355_v38 = vmul.f32 %v4096_v19, %v4970_v24  ;;  %v5775_v24 = vld [vmem:[#allocation4_spill] sm:$0xff]  ;;  %s494_s20 = scalar_lea.vmem %s5651_s15, %s5776_s25 }
 0x6d4   : > { %v4100_v49 = vpop.eup %4099  ;;  %v3356_v16 = vmul.f32 %v4098_v48, %v4974_v9  ;;  %v3511_v9 = vld [vmem:[%s5649_s13] sm:$0xf] }
 0x6d5   : > { %3369 = vmatprep.subr.mxu0 %v3355_v38  ;;  %v3357_v54 = vmul.f32 %v4100_v49, %v4976_v50  ;;  %v3363_v50 = vpop.permute.xlu0 %3362 }
 0x6d6   : > { %3370 = vmatpush1.msra.mxu0 %v3354_v55 }
 0x6d7   : > { %3440 = vmatprep.subr.mxu1 %v3357_v54  ;;  %3815 = vmatmul.mubr.msk.f32.vlgmr.msra.gmra.mrb[8].mxu0 %vm3365_vm14, %v3358_v2 }
 0x6d8   : > { %3441 = vmatpush1.msra.mxu1 %v3356_v16  ;;  %3817 = vmatprep.subr.msk.mxu0 %vm512_vm0, %v5774_v34 }
 0x6d9   : > { %3816 = vmatmul.mubr.msk.f32.vlgmr.msra.gmra.mrb[8].mxu1 %vm3365_vm14, %v3358_v2  ;;  %3820 = vmatprep.subr.msk.mxu1 %vm512_vm0, %v5775_v24 }
 0x6da   : > { %3818 = vmatpush1.msk.msra.mxu0 %vm512_vm0, %v4101_v32  ;;  %3821 = vmatpush1.msk.msra.mxu1 %vm512_vm0, %v4102_v17 }
 0x6db   : > { %3579 = vmatprep.mubr.f32.mxu0 %v5773_v60  ;;  %3650 = vmatprep.mubr.f32.mxu1 %v5773_v60 }
 0x6df   : > { %3819 = vmatmul.mubr.msk.f32.vlgmr.msra.gmra.mrb[8].mxu0 %vm508_vm1, %v3511_v9 }
 0x6e1   : > { %3822 = vmatmul.mubr.msk.f32.vlgmr.msra.gmra.mrb[8].mxu1 %vm508_vm1, %v3511_v9 }
 0x7b2   : > { %v3581_v35 = vpop.f32.mrb[8].mxu0 }
 0x7b3   : > { %v4035_v12 = vadd.f32 %v3581_v35, %v3363_v50  ;;  %v3583_v1 = vpop.f32.mrb[9].mxu0 }
 0x7b4   : > { %v4036_v21 = vadd.f32 %v3583_v1, %v3363_v50  ;;  %v3652_v31 = vpop.f32.mrb[8].mxu1 }
 0x7b5   : > { %v3667_v22 = vadd.f32 %v4035_v12, %v3665_v43  ;;  %v4037_v6 = vadd.f32 %v3652_v31, %v3363_v50  ;;  %v3654_v62 = vpop.f32.mrb[9].mxu1 }
 0x7b6   : > { %v3668_v59 = vadd.f32 %v4036_v21, %v3665_v43  ;;  %v4038_v63 = vadd.f32 %v3654_v62, %v3363_v50 }
 0x7b7   : > { %v3669_v15 = vadd.f32 %v4037_v6, %v3665_v43 }
 0x7b8   : > { %v3675_v39 = vcombine.low %v3667_v22, %v3668_v59  ;;  %v3670_v58 = vadd.f32 %v4038_v63, %v3665_v43 }
 0x7ba   : > { %3679 = vst [vmem:[%s494_s20] sm:$0xff] %v3675_v39  ;;  %v3676_v4 = vcombine.low %v3669_v15, %v3670_v58 }
 0x7bc   : > { %3680 = vst [vmem:[%s494_s20 + $0x8] sm:$0xff] %v3676_v4 }
 0x7bd PF: > { %s25_s18 = sadd.s32 1, %s4109_s18  }
 0x7be   : > { %p22_p4 = scmp.ge.s32.totalorder %s25_s18, 4  }
 0x7c0   :  { %24 = sbr.rel (!%p22_p4) target bundleno = 1 (0x1), region = 160 }

</bundles_post_ra>
